<compile_context>
chip_gen: v5e
topology: v5e:2x2
jax: 0.10.0
libtpu: 0.0.40
codegen_flags: <defaults>
</compile_context>

<pallas_src>
import functools
import math

import jax
import jax.numpy as jnp
from jax import lax
from jax.experimental import pallas as pl
from jax.experimental.pallas import tpu as pltpu


def _round_up(v, m):
    return ((v + m - 1) // m) * m


@functools.lru_cache(None)
def _vmem_budget_bytes():
    """Generation-aware VMEM budget (v5e/v6e: 128 MiB physical, v7x: 64 MiB/TC)."""
    cap = None
    try:
        cap = getattr(pltpu.get_tpu_info(), "vmem_capacity_bytes", None)
    except Exception:
        cap = None
    if not cap:
        cap = 64 * 1024 * 1024          # conservative default (v7x-sized)
    return min(int(cap) * 3 // 4, 100 * 1024 * 1024)


def _pick_tn(ocp, vmem_budget):
    # v7x (small budget): prefer 256 (still matches the 256-wide MXU, halves the
    # f32 result / output tile). Big-VMEM parts: prefer 512 to amortize step cost.
    prefs = (512, 256, 128) if vmem_budget >= 96 * 1024 * 1024 else (256, 128, 512)
    for tn in prefs:
        if ocp % tn == 0:
            return tn
    return ocp  # unreachable: ocp is always a multiple of 128


# ----------------------------------------------------------------------------
# Fused im2col + GEMM conv kernel (NHWC, taps folded into the K dimension)
# ----------------------------------------------------------------------------
def _conv_kernel(x_ref, w_ref, b_ref, o_ref, *,
                 kh, kw, sh, sw, dh, dw, toh, ow, cin):
    # x_ref : (1, Hp, Wp, C)      padded NHWC image (bf16), single-buffered resident
    # w_ref : (KH*KW*C, TN)       bf16 weight tile, taps folded into the K axis
    # b_ref : (1, TN)             f32 bias tile
    # o_ref : (1, TOH*OW, TN)     flattened, sublane/lane-dense output tile
    i = pl.program_id(1)
    row0 = i * (toh * sh)                         # first padded-input row of tile

    # Fused im2col: gather every (kh, kw) tap and fold into one (M, KH*KW*C)
    # slab so the MXU sees a single dot with K = KH*KW*C instead of kh*kw dots
    # with K = C (and no per-tap accumulator read-modify-write).
    taps = []
    for ikh in range(kh):                         # static loops over kernel taps
        for ikw in range(kw):
            if sh == 1 and sw == 1:
                patch = x_ref[pl.ds(0, 1),
                              pl.ds(row0 + ikh * dh, toh),
                              pl.ds(ikw * dw, ow), :]
            else:
                # TODO(synk): stride != 1 path (strided ref slices) is untested.
                patch = x_ref[pl.ds(0, 1),
                              pl.ds(row0 + ikh * dh, toh, stride=sh),
                              pl.ds(ikw * dw, ow, stride=sw), :]
            taps.append(patch)
    slab = jnp.concatenate(taps, axis=-1) if len(taps) > 1 else taps[0]
    a = slab.reshape(toh * ow, kh * kw * cin)                       # (M, K) bf16

    acc = jnp.dot(a, w_ref[...], preferred_element_type=jnp.float32)
    out = acc + b_ref[...]                                          # bias once
    o_ref[...] = out.reshape(1, toh * ow, o_ref.shape[-1]).astype(o_ref.dtype)


def conv2d_nhwc(x, w2d, bias_pad, kernel_size, stride, padding, dilation,
                out_dtype=jnp.float32):
    """x: (B, H, W, C) NHWC.  w2d: (KH*KW*C, OCp) bf16 with OCp % 128 == 0 and
    rows ordered (kh, kw, c).  bias_pad: (1, OCp) f32.
    Returns (B, OH, OW, OCp) NHWC in out_dtype."""
    b, h, w, c = x.shape
    kh, kw = kernel_size
    kdim, ocp = w2d.shape
    assert kdim == kh * kw * c and ocp % 128 == 0
    sh, sw = stride
    ph, pw = padding
    dh, dw = dilation
    oh = (h + 2 * ph - dh * (kh - 1) - 1) // sh + 1
    ow = (w + 2 * pw - dw * (kw - 1) - 1) // sw + 1

    vmem_budget = _vmem_budget_bytes()
    target_rows = 1024 if vmem_budget >= 80 * 1024 * 1024 else 512
    toh = max(1, min(oh, target_rows // max(ow, 1)))
    # Round toh so the flattened M tile (toh*ow) is a multiple of 8 (sublane-dense
    # unmasked stores, and satisfies the (8,128) block constraint).
    mult = 8 // math.gcd(ow, 8)
    toh = _round_up(toh, mult)
    n_oh = pl.cdiv(oh, toh)
    oh_pad = n_oh * toh

    # Spatial zero halo (once, cheap) + extra bottom rows so every tile's input
    # window is in bounds.  Cast to bf16 (MXU-native operand dtype).
    rows_needed = (oh_pad - 1) * sh + (kh - 1) * dh + 1
    pad_bot = max(rows_needed - h - ph, 0)
    xp = jnp.pad(x.astype(jnp.bfloat16),
                 ((0, 0), (ph, pad_bot), (pw, pw), (0, 0)))
    hp, wp = xp.shape[1], xp.shape[2]

    tn = _pick_tn(ocp, vmem_budget)
    grid = (b, n_oh, ocp // tn)

    kernel = functools.partial(_conv_kernel, kh=kh, kw=kw, sh=sh, sw=sw,
                               dh=dh, dw=dw, toh=toh, ow=ow, cin=c)

    def build_call(single_buffer_image):
        img_kwargs = {}
        if single_buffer_image:
            # The image block only changes when the batch index changes, so a
            # second pipeline buffer buys nothing and doubles VMEM use.
            img_kwargs["pipeline_mode"] = pl.Buffered(1)
        img_spec = pl.BlockSpec((1, hp, wp, c),
                                lambda bi, i, j: (bi, 0, 0, 0), **img_kwargs)
        return pl.pallas_call(
            kernel,
            out_shape=jax.ShapeDtypeStruct((b, oh_pad * ow, ocp), out_dtype),
            grid=grid,
            in_specs=[
                img_spec,
                pl.BlockSpec((kdim, tn), lambda bi, i, j: (0, j)),
                pl.BlockSpec((1, tn), lambda bi, i, j: (0, j)),
            ],
            out_specs=pl.BlockSpec((1, toh * ow, tn),
                                   lambda bi, i, j: (bi, i, j)),
            compiler_params=pltpu.CompilerParams(
                # batch / output-row axes parallel; OC-tile axis arbitrary so
                # megacore (v7x) splits rows/batches, not OC tiles.
                dimension_semantics=("parallel", "parallel", "arbitrary"),
                vmem_limit_bytes=vmem_budget,
            ),
        )

    try:
        out = build_call(True)(xp, w2d, bias_pad)
    except Exception:
        # pl.Buffered(1) not accepted by this JAX build -> default double buffer.
        out = build_call(False)(xp, w2d, bias_pad)

    out = out.reshape(b, oh_pad, ow, ocp)        # free contiguous reshape
    if oh_pad != oh:
        out = out[:, :oh]
    return out


# ----------------------------------------------------------------------------
# FactorizedConv forward (Pallas-backed)
# ----------------------------------------------------------------------------
class FactorizedConvPallas:
    def __init__(self, weight, bias, rank_scale=1.0, stride=(1, 1), padding=(1, 1),
                 dilation=(1, 1), groups=1, one_conv='auto'):
        assert groups == 1  # TODO(synk): grouped conv path not implemented
        oc, ic, ks1, ks2 = weight.shape
        self.shape = (oc, ic, ks1, ks2)
        self.kernel_size = (ks1, ks2)
        dim1, dim2 = oc * ks1, ic * ks2
        self.rank = max(int(round(rank_scale * dim1)), 1)

        # spectral init (matches torch.svd-based spectral_init)
        w2d = weight.reshape(dim1, dim2).astype(jnp.float32)
        u_f, s_f, vh_f = jnp.linalg.svd(w2d, full_matrices=False)
        r_eff = min(self.rank, s_f.shape[0])
        sqrt_s = jnp.sqrt(s_f[:r_eff])
        self.U = jnp.zeros((dim1, self.rank), jnp.float32).at[:, :r_eff].set(
            u_f[:, :r_eff] * sqrt_s[None, :])
        self.VT = jnp.zeros((self.rank, dim2), jnp.float32).at[:r_eff, :].set(
            sqrt_s[:, None] * vh_f[:r_eff, :])
        self.M = None  # square=False (module default)

        self.bias = bias
        self.stride, self.padding, self.dilation, self.groups = \
            stride, padding, dilation, groups
        self.one_conv = (rank_scale >= 1.0) if one_conv == 'auto' else one_conv

        # ---- precompute bf16 GEMM weight slabs (once per weight update) ----
        # tiny factor product: plain XLA dot (Pallas launch overhead not worth it)
        mvt = self.VT if self.M is None else jnp.dot(self.M, self.VT)
        self._ocp = _round_up(oc, 128)
        self._bias_pad = jnp.zeros((1, self._ocp), jnp.float32)
        if bias is not None:
            self._bias_pad = self._bias_pad.at[0, :oc].set(bias.astype(jnp.float32))

        if self.one_conv:
            w_full = jnp.dot(self.U, mvt).reshape(oc, ks1, ic, ks2)
            w_full = w_full.transpose(0, 2, 1, 3)                     # OIHW
            self._wg = self._prep(w_full)                             # (ks1*ks2*IC, OCp)
        else:
            self._rp = _round_up(self.rank, 128)
            w1 = mvt.T.reshape(ic, ks2, 1, self.rank).transpose(3, 0, 2, 1)   # (R,IC,1,ks2)
            w2 = self.U.reshape(oc, ks1, self.rank, 1).transpose(0, 2, 1, 3)  # (OC,R,ks1,1)
            self._w1g = self._prep(w1)                                # (ks2*IC, Rp)
            self._w2g = self._prep(w2, c_pad=self._rp)                # (ks1*Rp, OCp)
            self._bias1_pad = jnp.zeros((1, self._rp), jnp.float32)

    @staticmethod
    def _prep(w_oihw, c_pad=None):
        """OIHW f32 -> (KH*KW*C_pad, OC_pad) bf16, rows ordered (kh, kw, c),
        output channels zero-padded to a multiple of 128 (lane-dense TN)."""
        o, i, kh, kw = w_oihw.shape
        op = _round_up(o, 128)
        ip = i if c_pad is None else c_pad
        wk = jnp.transpose(w_oihw, (2, 3, 1, 0))                      # (KH,KW,I,O)
        wk = jnp.pad(wk, ((0, 0), (0, 0), (0, ip - i), (0, op - o)))
        return wk.reshape(kh * kw * ip, op).astype(jnp.bfloat16)

    def forward(self, x, mask):
        oc = self.shape[0]
        ks1, ks2 = self.kernel_size
        # single NCHW -> NHWC transpose at the boundary (C on lanes inside Pallas)
        x_nhwc = jnp.transpose(x, (0, 2, 3, 1))
        if self.one_conv:
            y = conv2d_nhwc(x_nhwc, self._wg, self._bias_pad, (ks1, ks2),
                            self.stride, self.padding, self.dilation)
            # matches torch FactorizedConv: one_conv branch returns only the output
            return jnp.transpose(y[..., :oc], (0, 3, 1, 2))           # back to NCHW

        # separable path: width conv into rank space, then height conv.
        # intermediate stays NHWC / bf16 / lane-padded (no HBM slice, no NCHW).
        y1 = conv2d_nhwc(x_nhwc, self._w1g, self._bias1_pad, (1, ks2),
                         (1, self.stride[1]), (0, self.padding[1]),
                         (1, self.dilation[1]), out_dtype=jnp.bfloat16)
        y2 = conv2d_nhwc(y1, self._w2g, self._bias_pad, (ks1, 1),
                         (self.stride[0], 1), (self.padding[0], 0),
                         (self.dilation[0], 1))
        # slice to true OC before the layout transpose (cuts transpose volume)
        out = jnp.transpose(y2[..., :oc], (0, 3, 1, 2))               # NCHW
        mask_out = self.return_output_mask(mask, out.shape[2])
        return out, mask_out

    def return_output_mask(self, mask, t):
        # matches the torch module exactly
        stride = self.stride[0]
        k = self.kernel_size[0]
        return mask[:, math.floor(k / 2)::stride][:, :t]


# ----------------------------------------------------------------------------
# main
# ----------------------------------------------------------------------------
if __name__ == "__main__":
    key = jax.random.PRNGKey(0)
    k_w, k_b, k_x, k_m = jax.random.split(key, 4)

    B, IC, OC, H, W = 2, 4, 8, 16, 16
    KH = KW = 3
    stride, padding, dilation = (1, 1), (1, 1), (1, 1)

    weight = jax.random.normal(k_w, (OC, IC, KH, KW), jnp.float32) * 0.1
    bias = jax.random.normal(k_b, (OC,), jnp.float32) * 0.1
    x = jax.random.normal(k_x, (B, IC, H, W), jnp.float32)
    mask = (jax.random.uniform(k_m, (B, H)) > 0.2).astype(jnp.float32)

    bf16 = jnp.bfloat16
    dn = ('NCHW', 'OIHW', 'NCHW')

    # --- one_conv branch (default for rank_scale >= 1.0) ---
    fc = FactorizedConvPallas(weight, bias, rank_scale=1.0, stride=stride,
                              padding=padding, dilation=dilation)
    out1 = jax.block_until_ready(fc.forward(x, mask))

    # reference: same bf16 operands / f32 accumulation as the kernel
    w_full_ref = (fc.U @ fc.VT).reshape(OC, KH, IC, KW).transpose(0, 2, 1, 3)
    ref1 = lax.conv_general_dilated(
        x.astype(bf16), w_full_ref.astype(bf16), window_strides=stride,
        padding=((1, 1), (1, 1)), rhs_dilation=dilation, dimension_numbers=dn,
        preferred_element_type=jnp.float32)
    ref1 = ref1 + bias[None, :, None, None]
    assert jnp.allclose(out1, ref1, rtol=2e-2, atol=2e-2), "one_conv mismatch"

    # --- one_conv with dilation=2 (exercises the dilated tap-offset path) ---
    fc3 = FactorizedConvPallas(weight, bias, rank_scale=1.0, stride=(1, 1),
                               padding=(2, 2), dilation=(2, 2))
    out3 = jax.block_until_ready(fc3.forward(x, mask))
    w_full_ref3 = (fc3.U @ fc3.VT).reshape(OC, KH, IC, KW).transpose(0, 2, 1, 3)
    ref3 = lax.conv_general_dilated(
        x.astype(bf16), w_full_ref3.astype(bf16), window_strides=(1, 1),
        padding=((2, 2), (2, 2)), rhs_dilation=(2, 2), dimension_numbers=dn,
        preferred_element_type=jnp.float32) + bias[None, :, None, None]
    assert jnp.allclose(out3, ref3, rtol=2e-2, atol=2e-2), "dilated one_conv mismatch"

    # --- two-conv (separable) branch, one_conv=False ---
    fc2 = FactorizedConvPallas(weight, bias, rank_scale=1.0, stride=stride,
                               padding=padding, dilation=dilation, one_conv=False)
    out2, mask_out = fc2.forward(x, mask)
    out2 = jax.block_until_ready(out2)
    mask_out = jax.block_until_ready(mask_out)

    w1_ref = fc2.VT.T.reshape(IC, KW, 1, fc2.rank).transpose(3, 0, 2, 1)
    w2_ref = fc2.U.reshape(OC, KH, fc2.rank, 1).transpose(0, 2, 1, 3)
    x1_ref = lax.conv_general_dilated(
        x.astype(bf16), w1_ref.astype(bf16), window_strides=(1, stride[1]),
        padding=((0, 0), (1, 1)), rhs_dilation=(1, dilation[1]),
        dimension_numbers=dn, preferred_element_type=jnp.float32)
    ref2 = lax.conv_general_dilated(
        x1_ref.astype(bf16), w2_ref.astype(bf16), window_strides=(stride[0], 1),
        padding=((1, 1), (0, 0)), rhs_dilation=(dilation[0], 1),
        dimension_numbers=dn, preferred_element_type=jnp.float32)
    ref2 = ref2 + bias[None, :, None, None]
    assert jnp.allclose(out2, ref2, rtol=2e-2, atol=2e-2), "two-conv mismatch"

    # mask semantics: mask[:, floor(k/2)::stride][:, :T] (matches torch module)
    mask_ref = mask[:, KH // 2::stride[0]][:, :out2.shape[2]]
    assert mask_out.shape == mask_ref.shape
    assert bool(jnp.all(mask_out == mask_ref)), "mask mismatch"

    print("KERNEL_OK")
</pallas_src>

<mosaic_0001>
module attributes {stable_mosaic.version = 11 : i64} {
  func.func @_conv_kernel(%arg0: i32, %arg1: i32, %arg2: i32, %arg3: memref<1x18x18x4xbf16, #tpu.memory_space<vmem>>, %arg4: memref<36x128xbf16, #tpu.memory_space<vmem>>, %arg5: memref<1x128xf32, #tpu.memory_space<vmem>>, %arg6: memref<1x256x128xf32, #tpu.memory_space<vmem>>) attributes {dimension_semantics = [#tpu.dimension_semantics<parallel>, #tpu.dimension_semantics<parallel>, #tpu.dimension_semantics<arbitrary>], iteration_bounds = array<i64: 2, 1, 1>, scalar_prefetch = 0 : i64, scratch_operands = 0 : i64, tpu.core_type = #tpu.core_type<tc>, window_params = [{pipeline_mode = #tpu.pipeline_mode<synchronous>, transform_indices = @transform_0, window_bounds = array<i64: 1, 18, 18, 4>}, {transform_indices = @transform_1, window_bounds = array<i64: 36, 128>}, {transform_indices = @transform_2, window_bounds = array<i64: 1, 128>}, {transform_indices = @transform_3, window_bounds = array<i64: 1, 256, 128>}]} {
    %c16_i32 = arith.constant 16 : i32
    %0 = arith.muli %arg1, %c16_i32 : i32
    %c0_i32 = arith.constant 0 : i32
    %1 = arith.addi %0, %c0_i32 : i32
    %c0 = arith.constant 0 : index
    %2 = arith.index_cast %1 : i32 to index
    %c0_0 = arith.constant 0 : index
    %c0_1 = arith.constant 0 : index
    %3 = vector.load %arg3[%c0, %2, %c0_0, %c0_1] : memref<1x18x18x4xbf16, #tpu.memory_space<vmem>>, vector<1x16x16x4xbf16>
    %c0_i32_2 = arith.constant 0 : i32
    %4 = arith.addi %0, %c0_i32_2 : i32
    %c0_3 = arith.constant 0 : index
    %5 = arith.index_cast %4 : i32 to index
    %c1 = arith.constant 1 : index
    %c0_4 = arith.constant 0 : index
    %6 = vector.load %arg3[%c0_3, %5, %c1, %c0_4] : memref<1x18x18x4xbf16, #tpu.memory_space<vmem>>, vector<1x16x16x4xbf16>
    %c0_i32_5 = arith.constant 0 : i32
    %7 = arith.addi %0, %c0_i32_5 : i32
    %c0_6 = arith.constant 0 : index
    %8 = arith.index_cast %7 : i32 to index
    %c2 = arith.constant 2 : index
    %c0_7 = arith.constant 0 : index
    %9 = vector.load %arg3[%c0_6, %8, %c2, %c0_7] : memref<1x18x18x4xbf16, #tpu.memory_space<vmem>>, vector<1x16x16x4xbf16>
    %c1_i32 = arith.constant 1 : i32
    %10 = arith.addi %0, %c1_i32 : i32
    %c0_8 = arith.constant 0 : index
    %11 = arith.index_cast %10 : i32 to index
    %c0_9 = arith.constant 0 : index
    %c0_10 = arith.constant 0 : index
    %12 = vector.load %arg3[%c0_8, %11, %c0_9, %c0_10] : memref<1x18x18x4xbf16, #tpu.memory_space<vmem>>, vector<1x16x16x4xbf16>
    %c1_i32_11 = arith.constant 1 : i32
    %13 = arith.addi %0, %c1_i32_11 : i32
    %c0_12 = arith.constant 0 : index
    %14 = arith.index_cast %13 : i32 to index
    %c1_13 = arith.constant 1 : index
    %c0_14 = arith.constant 0 : index
    %15 = vector.load %arg3[%c0_12, %14, %c1_13, %c0_14] : memref<1x18x18x4xbf16, #tpu.memory_space<vmem>>, vector<1x16x16x4xbf16>
    %c1_i32_15 = arith.constant 1 : i32
    %16 = arith.addi %0, %c1_i32_15 : i32
    %c0_16 = arith.constant 0 : index
    %17 = arith.index_cast %16 : i32 to index
    %c2_17 = arith.constant 2 : index
    %c0_18 = arith.constant 0 : index
    %18 = vector.load %arg3[%c0_16, %17, %c2_17, %c0_18] : memref<1x18x18x4xbf16, #tpu.memory_space<vmem>>, vector<1x16x16x4xbf16>
    %c2_i32 = arith.constant 2 : i32
    %19 = arith.addi %0, %c2_i32 : i32
    %c0_19 = arith.constant 0 : index
    %20 = arith.index_cast %19 : i32 to index
    %c0_20 = arith.constant 0 : index
    %c0_21 = arith.constant 0 : index
    %21 = vector.load %arg3[%c0_19, %20, %c0_20, %c0_21] : memref<1x18x18x4xbf16, #tpu.memory_space<vmem>>, vector<1x16x16x4xbf16>
    %c2_i32_22 = arith.constant 2 : i32
    %22 = arith.addi %0, %c2_i32_22 : i32
    %c0_23 = arith.constant 0 : index
    %23 = arith.index_cast %22 : i32 to index
    %c1_24 = arith.constant 1 : index
    %c0_25 = arith.constant 0 : index
    %24 = vector.load %arg3[%c0_23, %23, %c1_24, %c0_25] : memref<1x18x18x4xbf16, #tpu.memory_space<vmem>>, vector<1x16x16x4xbf16>
    %c2_i32_26 = arith.constant 2 : i32
    %25 = arith.addi %0, %c2_i32_26 : i32
    %c0_27 = arith.constant 0 : index
    %26 = arith.index_cast %25 : i32 to index
    %c2_28 = arith.constant 2 : index
    %c0_29 = arith.constant 0 : index
    %27 = vector.load %arg3[%c0_27, %26, %c2_28, %c0_29] : memref<1x18x18x4xbf16, #tpu.memory_space<vmem>>, vector<1x16x16x4xbf16>
    %28 = tpu.concatenate %3, %6, %9, %12, %15, %18, %21, %24, %27 in 3 : vector<1x16x16x4xbf16>, vector<1x16x16x4xbf16>, vector<1x16x16x4xbf16>, vector<1x16x16x4xbf16>, vector<1x16x16x4xbf16>, vector<1x16x16x4xbf16>, vector<1x16x16x4xbf16>, vector<1x16x16x4xbf16>, vector<1x16x16x4xbf16> -> vector<1x16x16x36xbf16>
    %29 = vector.shape_cast %28 : vector<1x16x16x36xbf16> to vector<256x36xbf16>
    %c0_30 = arith.constant 0 : index
    %c0_31 = arith.constant 0 : index
    %30 = vector.load %arg4[%c0_30, %c0_31] : memref<36x128xbf16, #tpu.memory_space<vmem>>, vector<36x128xbf16>
    %cst = arith.constant dense<0.000000e+00> : vector<256x128xf32>
    %31 = tpu.matmul %29, %30, %cst {dimension_numbers = #tpu.dot_dimension_numbers<[1], [0], [0], [1], [0, 0, 1, 1], [], []>} : vector<256x36xbf16>, vector<36x128xbf16>, vector<256x128xf32> -> vector<256x128xf32>
    %c0_32 = arith.constant 0 : index
    %c0_33 = arith.constant 0 : index
    %32 = vector.load %arg5[%c0_32, %c0_33] : memref<1x128xf32, #tpu.memory_space<vmem>>, vector<1x128xf32>
    %33 = vector.broadcast %32 : vector<1x128xf32> to vector<256x128xf32>
    %34 = arith.addf %31, %33 : vector<256x128xf32>
    %35 = vector.shape_cast %34 : vector<256x128xf32> to vector<1x256x128xf32>
    %c0_34 = arith.constant 0 : index
    %c0_35 = arith.constant 0 : index
    %c0_36 = arith.constant 0 : index
    %36 = vector.load %arg6[%c0_34, %c0_35, %c0_36] : memref<1x256x128xf32, #tpu.memory_space<vmem>>, vector<1x256x128xf32>
    tpu.vector_store %arg6[%c0_34, %c0_35, %c0_36], %35 {strides = array<i32>} : memref<1x256x128xf32, #tpu.memory_space<vmem>>, vector<1x256x128xf32>,
    return
  }
  func.func @transform_0(%arg0: i32, %arg1: i32, %arg2: i32) -> (i32, i32, i32, i32) {
    %c0_i32 = arith.constant 0 : i32
    %c0_i32_0 = arith.constant 0 : i32
    %c0_i32_1 = arith.constant 0 : i32
    %c0_i32_2 = arith.constant 0 : i32
    return %arg0, %c0_i32, %c0_i32_0, %c0_i32_1 : i32, i32, i32, i32
  }
  func.func @transform_1(%arg0: i32, %arg1: i32, %arg2: i32) -> (i32, i32) {
    %c0_i32 = arith.constant 0 : i32
    %c0_i32_0 = arith.constant 0 : i32
    return %c0_i32, %arg2 : i32, i32
  }
  func.func @transform_2(%arg0: i32, %arg1: i32, %arg2: i32) -> (i32, i32) {
    %c0_i32 = arith.constant 0 : i32
    %c0_i32_0 = arith.constant 0 : i32
    return %c0_i32, %arg2 : i32, i32
  }
  func.func @transform_3(%arg0: i32, %arg1: i32, %arg2: i32) -> (i32, i32, i32) {
    %c0_i32 = arith.constant 0 : i32
    return %arg0, %arg1, %arg2 : i32, i32, i32
  }
}

module attributes {stable_mosaic.version = 11 : i64} {
  func.func @_conv_kernel(%arg0: i32, %arg1: i32, %arg2: i32, %arg3: memref<1x18x18x4xbf16, #tpu.memory_space<vmem>>, %arg4: memref<36x128xbf16, #tpu.memory_space<vmem>>, %arg5: memref<1x128xf32, #tpu.memory_space<vmem>>, %arg6: memref<1x256x128xf32, #tpu.memory_space<vmem>>) attributes {dimension_semantics = [#tpu.dimension_semantics<parallel>, #tpu.dimension_semantics<parallel>, #tpu.dimension_semantics<arbitrary>], iteration_bounds = array<i64: 2, 1, 1>, scalar_prefetch = 0 : i64, scratch_operands = 0 : i64, tpu.core_type = #tpu.core_type<tc>, window_params = [{transform_indices = @transform_0, window_bounds = array<i64: 1, 18, 18, 4>}, {transform_indices = @transform_1, window_bounds = array<i64: 36, 128>}, {transform_indices = @transform_2, window_bounds = array<i64: 1, 128>}, {transform_indices = @transform_3, window_bounds = array<i64: 1, 256, 128>}]} {
    %c16_i32 = arith.constant 16 : i32
    %0 = arith.muli %arg1, %c16_i32 : i32
    %c0_i32 = arith.constant 0 : i32
    %1 = arith.addi %0, %c0_i32 : i32
    %c0 = arith.constant 0 : index
    %2 = arith.index_cast %1 : i32 to index
    %c0_0 = arith.constant 0 : index
    %c0_1 = arith.constant 0 : index
    %3 = vector.load %arg3[%c0, %2, %c0_0, %c0_1] : memref<1x18x18x4xbf16, #tpu.memory_space<vmem>>, vector<1x16x16x4xbf16>
    %c0_i32_2 = arith.constant 0 : i32
    %4 = arith.addi %0, %c0_i32_2 : i32
    %c0_3 = arith.constant 0 : index
    %5 = arith.index_cast %4 : i32 to index
    %c1 = arith.constant 1 : index
    %c0_4 = arith.constant 0 : index
    %6 = vector.load %arg3[%c0_3, %5, %c1, %c0_4] : memref<1x18x18x4xbf16, #tpu.memory_space<vmem>>, vector<1x16x16x4xbf16>
    %c0_i32_5 = arith.constant 0 : i32
    %7 = arith.addi %0, %c0_i32_5 : i32
    %c0_6 = arith.constant 0 : index
    %8 = arith.index_cast %7 : i32 to index
    %c2 = arith.constant 2 : index
    %c0_7 = arith.constant 0 : index
    %9 = vector.load %arg3[%c0_6, %8, %c2, %c0_7] : memref<1x18x18x4xbf16, #tpu.memory_space<vmem>>, vector<1x16x16x4xbf16>
    %c1_i32 = arith.constant 1 : i32
    %10 = arith.addi %0, %c1_i32 : i32
    %c0_8 = arith.constant 0 : index
    %11 = arith.index_cast %10 : i32 to index
    %c0_9 = arith.constant 0 : index
    %c0_10 = arith.constant 0 : index
    %12 = vector.load %arg3[%c0_8, %11, %c0_9, %c0_10] : memref<1x18x18x4xbf16, #tpu.memory_space<vmem>>, vector<1x16x16x4xbf16>
    %c1_i32_11 = arith.constant 1 : i32
    %13 = arith.addi %0, %c1_i32_11 : i32
    %c0_12 = arith.constant 0 : index
    %14 = arith.index_cast %13 : i32 to index
    %c1_13 = arith.constant 1 : index
    %c0_14 = arith.constant 0 : index
    %15 = vector.load %arg3[%c0_12, %14, %c1_13, %c0_14] : memref<1x18x18x4xbf16, #tpu.memory_space<vmem>>, vector<1x16x16x4xbf16>
    %c1_i32_15 = arith.constant 1 : i32
    %16 = arith.addi %0, %c1_i32_15 : i32
    %c0_16 = arith.constant 0 : index
    %17 = arith.index_cast %16 : i32 to index
    %c2_17 = arith.constant 2 : index
    %c0_18 = arith.constant 0 : index
    %18 = vector.load %arg3[%c0_16, %17, %c2_17, %c0_18] : memref<1x18x18x4xbf16, #tpu.memory_space<vmem>>, vector<1x16x16x4xbf16>
    %c2_i32 = arith.constant 2 : i32
    %19 = arith.addi %0, %c2_i32 : i32
    %c0_19 = arith.constant 0 : index
    %20 = arith.index_cast %19 : i32 to index
    %c0_20 = arith.constant 0 : index
    %c0_21 = arith.constant 0 : index
    %21 = vector.load %arg3[%c0_19, %20, %c0_20, %c0_21] : memref<1x18x18x4xbf16, #tpu.memory_space<vmem>>, vector<1x16x16x4xbf16>
    %c2_i32_22 = arith.constant 2 : i32
    %22 = arith.addi %0, %c2_i32_22 : i32
    %c0_23 = arith.constant 0 : index
    %23 = arith.index_cast %22 : i32 to index
    %c1_24 = arith.constant 1 : index
    %c0_25 = arith.constant 0 : index
    %24 = vector.load %arg3[%c0_23, %23, %c1_24, %c0_25] : memref<1x18x18x4xbf16, #tpu.memory_space<vmem>>, vector<1x16x16x4xbf16>
    %c2_i32_26 = arith.constant 2 : i32
    %25 = arith.addi %0, %c2_i32_26 : i32
    %c0_27 = arith.constant 0 : index
    %26 = arith.index_cast %25 : i32 to index
    %c2_28 = arith.constant 2 : index
    %c0_29 = arith.constant 0 : index
    %27 = vector.load %arg3[%c0_27, %26, %c2_28, %c0_29] : memref<1x18x18x4xbf16, #tpu.memory_space<vmem>>, vector<1x16x16x4xbf16>
    %28 = tpu.concatenate %3, %6, %9, %12, %15, %18, %21, %24, %27 in 3 : vector<1x16x16x4xbf16>, vector<1x16x16x4xbf16>, vector<1x16x16x4xbf16>, vector<1x16x16x4xbf16>, vector<1x16x16x4xbf16>, vector<1x16x16x4xbf16>, vector<1x16x16x4xbf16>, vector<1x16x16x4xbf16>, vector<1x16x16x4xbf16> -> vector<1x16x16x36xbf16>
    %29 = vector.shape_cast %28 : vector<1x16x16x36xbf16> to vector<256x36xbf16>
    %c0_30 = arith.constant 0 : index
    %c0_31 = arith.constant 0 : index
    %30 = vector.load %arg4[%c0_30, %c0_31] : memref<36x128xbf16, #tpu.memory_space<vmem>>, vector<36x128xbf16>
    %cst = arith.constant dense<0.000000e+00> : vector<256x128xf32>
    %31 = tpu.matmul %29, %30, %cst {dimension_numbers = #tpu.dot_dimension_numbers<[1], [0], [0], [1], [0, 0, 1, 1], [], []>} : vector<256x36xbf16>, vector<36x128xbf16>, vector<256x128xf32> -> vector<256x128xf32>
    %c0_32 = arith.constant 0 : index
    %c0_33 = arith.constant 0 : index
    %32 = vector.load %arg5[%c0_32, %c0_33] : memref<1x128xf32, #tpu.memory_space<vmem>>, vector<1x128xf32>
    %33 = vector.broadcast %32 : vector<1x128xf32> to vector<256x128xf32>
    %34 = arith.addf %31, %33 : vector<256x128xf32>
    %35 = vector.shape_cast %34 : vector<256x128xf32> to vector<1x256x128xf32>
    %c0_34 = arith.constant 0 : index
    %c0_35 = arith.constant 0 : index
    %c0_36 = arith.constant 0 : index
    %36 = vector.load %arg6[%c0_34, %c0_35, %c0_36] : memref<1x256x128xf32, #tpu.memory_space<vmem>>, vector<1x256x128xf32>
    tpu.vector_store %arg6[%c0_34, %c0_35, %c0_36], %35 {strides = array<i32>} : memref<1x256x128xf32, #tpu.memory_space<vmem>>, vector<1x256x128xf32>,
    return
  }
  func.func @transform_0(%arg0: i32, %arg1: i32, %arg2: i32) -> (i32, i32, i32, i32) {
    %c0_i32 = arith.constant 0 : i32
    %c0_i32_0 = arith.constant 0 : i32
    %c0_i32_1 = arith.constant 0 : i32
    %c0_i32_2 = arith.constant 0 : i32
    return %arg0, %c0_i32, %c0_i32_0, %c0_i32_1 : i32, i32, i32, i32
  }
  func.func @transform_1(%arg0: i32, %arg1: i32, %arg2: i32) -> (i32, i32) {
    %c0_i32 = arith.constant 0 : i32
    %c0_i32_0 = arith.constant 0 : i32
    return %c0_i32, %arg2 : i32, i32
  }
  func.func @transform_2(%arg0: i32, %arg1: i32, %arg2: i32) -> (i32, i32) {
    %c0_i32 = arith.constant 0 : i32
    %c0_i32_0 = arith.constant 0 : i32
    return %c0_i32, %arg2 : i32, i32
  }
  func.func @transform_3(%arg0: i32, %arg1: i32, %arg2: i32) -> (i32, i32, i32) {
    %c0_i32 = arith.constant 0 : i32
    return %arg0, %arg1, %arg2 : i32, i32, i32
  }
}

</mosaic_0001>

<bundles_post_ra>
// kernel: tpu_custom_call.1
= control target key start
LH: loop header
LB: loop body
LE: loop exit
PB: predicated region body
PF: predicated region fallthrough
CT: control target
= control target key end

     0   :  { %8 = vsyncpa [#allocation3], 0  ;;  %s4440_s0 = inlined_call_operand.vmem [shape: bf16[2,18,18,4], index: 0, kind: input, shape index: {}]   ;;  %s4441_s1 = inlined_call_operand.vmem [shape: bf16[36,128], index: 1, kind: input, shape index: {}]   ;;  %s4442_s2 = inlined_call_operand.vmem [shape: f32[1,128], index: 2, kind: input, shape index: {}]   ;;  %s4443_s3 = inlined_call_operand.hbm [shape: f32[2,256,128], index: 3, kind: output, shape index: {}]  }
   0x1   :  { %10 = vsyncpa [#allocation3 + $0x1], 0  ;;  %s3137_s12 = smov 0   ;;  %s3139_s13 = smov 0  }
   0x2   :  { %s3141_s14 = smov 0   ;;  %s3143_s15 = smov 0  }
   0x3   :  { %s3145_s16 = smov 0   ;;  %s3147_s17 = smov 0  }
   0x4 LB: > { %s2517_s18 = sadd.s32 4294967295, %s3106_s17   ;;  %s2518_s19 = sadd.s32 4294967294, %s3106_s17   ;;  %s3106_s17 = sphi %s3147_s17, %s16_s17   ;;  %s3102_s16 = sphi %s3145_s16, %s4461_s16   ;;  %s3098_s15 = sphi %s3143_s15, %s4460_s15   ;;  %s3094_s14 = sphi %s3141_s14, %s4459_s14   ;;  %s3090_s13 = sphi %s3139_s13, %s4458_s13   ;;  %s3086_s12 = sphi %s3137_s12, %s4457_s12  }
   0x5   : > { %s35_s20 = sadd.s32 1, %s3102_s16  ;;  %s124_s21 = sadd.s32 1, %s3094_s14 }
   0x6   : > { %p37_p0 = scmp.ge.s32.totalorder %s35_s20, 2  ;;  %p134_p1 = scmp.ne.s32.totalorder %s3094_s14, %s3090_s13 }
   0x7   : > { %p135_p2 = scmp.eq.s32.totalorder %s2517_s18, 1  ;;  %p140_p3 = scmp.ne.s32.totalorder %s3090_s13, %s3086_s12 }
   0x8   : > { %s4463_s20 = smov (%p37_p0, %s35_s20), 0  ;;  %p141_p5 = scmp.eq.s32.totalorder %s2518_s19, 1 }
   0x9   : > { %p3177_p4 = por %p135_p2, %p134_p1  ;;  %s117_s23 = ssub.s32 %s3102_s16, %s4463_s20 }
   0xa   : > { %p2522_p6 = scmp.ge.s32.totalorder %s3106_s17, 1  ;;  %p122_p7 = scmp.eq.s32.totalorder %s117_s23, 0 }
   0xb   : > { %p3184_p8 = por %p141_p5, %p140_p3  ;;  %p180_p9 = scmp.lt.s32.totalorder %s3106_s17, 3 }
   0xc   : > { %s3190_s25 = scalar_select %p122_p7, %s3094_s14, %s124_s21  }
   0xd   : > { %p181_p10 = pnand %p2522_p6, %p180_p9 }
   0xf   : > { %184 = sbr.rel (%p181_p10) target bundleno = 631 (0x277), region = 32 }
  0x14   : > { %p211_p11 = scmp.lt.s32.totalorder %s3098_s15, 1  ;;  %vm557_vm0 = vsmask.f32 7424  ;;  %s3108_s4 = smov 4   ;;  %vm830_vm1 = vcmask 1046528   ;;  %vm1935_vm2 = vcmask 31744  }
  0x15   : > { %s3109_s5 = smov 8   ;;  %s3110_s6 = smov 12   ;;  %vm1968_vm3 = vcmask 64512   ;;  %vm2001_vm4 = vcmask 97280   ;;  %vm2256_vm5 = vcmask 1041408   ;;  %vm2034_vm6 = vcmask 130048  }
  0x16   : > { %s212_s26 = scalar_select %p211_p11, %s3098_s15, 1  ;;  %vm2067_vm7 = vcmask 162816   ;;  %vm2100_vm8 = vcmask 195584   ;;  %vm2133_vm9 = vcmask 228352   ;;  %vm2166_vm10 = vcmask 261120  }
  0x17   : > { %s3111_s7 = smov 16   ;;  %s3112_s8 = smov 20   ;;  %vm2223_vm11 = vcmask 293888  }
  0x18   : > { %s2885_s27 = smul.u32 216, %s212_s26  ;;  %s3113_s9 = smov 28  }
  0x19   : > { %s3114_s10 = smov 24   ;;  %s3115_s11 = smov 32  }
  0x1a   : > { %s3197_s30 = scalar_lea.vmem %s4440_s0, %s2885_s27  ;;  %s208_s28 = sand.u32 1, %s3090_s13  }
  0x1b   : > { %v3200_v0 = vld [vmem:[%s3197_s30 + $0x30] sm:$0xff]   ;;  %v265_v1 = vld [vmem:[%s3197_s30 + $0x38] sm:$0x1]  ;;  %v263_v6 = vld [vmem:[%s3197_s30 + $0x20] sm:$0x1]  ;;  %s2523_s29 = sshll.u32 %s208_s28, 8 }
  0x1c   : > { %v3204_v2 = vld [vmem:[%s3197_s30 + $0x18] sm:$0xff]   ;;  %v529_v3 = vunpack.c.l.b16 %v265_v1  ;;  %v607_v4 = vshrl.u32 %v3200_v0, 16  ;;  %v609_v5 = vshll.u32 %v3200_v0, 16  ;;  %v2686_v8 = vld [vmem:[%s3197_s30] sm:$0xff]   ;;  %v527_v9 = vunpack.c.l.b16 %v263_v6  ;;  %v261_v11 = vld [vmem:[%s3197_s30 + $0x8] sm:$0x1] }
  0x1d   : > { %v583_v7 = vshrl.u32 %v3204_v2, 16  ;;  %v585_v10 = vshll.u32 %v3204_v2, 16  ;;  %v559_v12 = vshrl.u32 %v2686_v8, 16  ;;  %v561_v13 = vshll.u32 %v2686_v8, 16  ;;  %v3214_v14 = vld [vmem:[%s3197_s30 + $0x60] sm:$0xff]   ;;  %v3244_v42 = vld [vmem:[%s3197_s30 + $0x48] sm:$0xff]  }
  0x1e   : > { %v3216_v15 = vpack.c.b16 %v529_v3, %v529_v3  ;;  %v611_v16 = vrot.slane %v609_v5, 1  ;;  %v525_v17 = vunpack.c.l.b16 %v261_v11  ;;  %v269_v18 = vld [vmem:[%s3197_s30 + $0x68] sm:$0x1]  ;;  %v655_v19 = vshrl.u32 %v3214_v14, 16  ;;  %v264_v30 = vld [vmem:[%s3197_s30 + $0x2c] sm:$0x1] }
  0x1f   : > { %v3220_v20 = vpack.c.b16 %v527_v9, %v527_v9  ;;  %v587_v21 = vrot.slane %v585_v10, 1  ;;  %v563_v22 = vrot.slane %v561_v13, 1  ;;  %v533_v23 = vunpack.c.l.b16 %v269_v18  ;;  %v3223_v24 = vld [vmem:[%s3197_s30 + $0x24] sm:$0xff]   ;;  %v267_v35 = vld [vmem:[%s3197_s30 + $0x50] sm:$0x1]  ;;  %v3256_v50 = vld [vmem:[%s3197_s30 + $0x3c] sm:$0xff]  }
  0x20   : > { %v3226_v25 = vld [vmem:[%s3197_s30 + $0x24] sm:$0xf0]  ;;  %v3228_v26 = vor.u32 %v611_v16, %v607_v4  ;;  %v614_v27 = vshll.u32 %v3216_v15, 16  ;;  %v3231_v28 = vpack.c.b16 %v525_v17, %v525_v17  ;;  %v657_v29 = vshll.u32 %v3214_v14, 16  ;;  %v3259_v51 = vld [vmem:[%s3197_s30 + $0x3c] sm:$0xf0] }
  0x21   : > { %v3235_v31 = vor.u32 %v587_v21, %v583_v7  ;;  %v590_v32 = vshll.u32 %v3220_v20, 16  ;;  %v564_v33 = vor.u32 %v563_v22, %v559_v12  ;;  %v3238_v34 = vpack.c.b16 %v533_v23, %v533_v23  ;;  %v266_v56 = vld [vmem:[%s3197_s30 + $0x44] sm:$0x1]  ;;  %v3269_v57 = vld [vmem:[%s3197_s30 + $0x54] sm:$0xff]   ;;  %v268_v3 = vld [vmem:[%s3197_s30 + $0x5c] sm:$0x1] }
  0x22   : > { %4449 = vst [vmem:[#allocation5_spill] sm:$0xff] %v3228_v26  ;;  %v616_v36 = vrot.slane %v614_v27, 1  ;;  %v566_v37 = vshll.u32 %v3231_v28, 16  ;;  %v659_v38 = vrot.slane %v657_v29, 1  ;;  %v528_v41 = vunpack.c.l.b16 %v264_v30  ;;  %v3272_v58 = vld [vmem:[%s3197_s30 + $0x54] sm:$0xf0] }
  0x23   : > { %v592_v39 = vrot.slane %v590_v32, 1  ;;  %v662_v40 = vshll.u32 %v3238_v34, 16  ;;  %v531_v46 = vunpack.c.l.b16 %v267_v35  ;;  %v631_v54 = vshrl.u32 %v3244_v42, 16  ;;  %v3283_v4 = vld [vmem:[%s3197_s30 + $0xc] sm:$0xff]   ;;  %v262_v16 = vld [vmem:[%s3197_s30 + $0x14] sm:$0x1] }
  0x24   : > { %v617_v43 = vsel %vm557_vm0, %v3228_v26, %v616_v36  ;;  %v568_v44 = vrot.slane %v566_v37, 1  ;;  %v3248_v45 = vor.u32 %v659_v38, %v655_v19  ;;  %v3253_v49 = vpack.c.b16 %v528_v41, %v528_v41  ;;  %v3286_v5 = vld [vmem:[%s3197_s30 + $0xc] sm:$0xf0]  ;;  %v3298_v21 = vld [vmem:[%s3197_s30 + $0x84] sm:$0xff]   ;;  %v272_v36 = vld [vmem:[%s3197_s30 + $0x8c] sm:$0x1] }
  0x25   : > { %758 = vrot.lane.b32.xlu2 %v617_v43, %s3108_s4  ;;  %v593_v47 = vsel %vm557_vm0, %v3235_v31, %v592_v39  ;;  %v664_v48 = vrot.slane %v662_v40, 1  ;;  %v3263_v53 = vpack.c.b16 %v531_v46, %v531_v46  ;;  %v633_v55 = vshll.u32 %v3244_v42, 16  ;;  %v3301_v22 = vld [vmem:[%s3197_s30 + $0x84] sm:$0xf0]  ;;  %v271_v43 = vld [vmem:[%s3197_s30 + $0x80] sm:$0x1] }
  0x26   : > { %4450 = vst [vmem:[#allocation6_spill] sm:$0xff] %v3248_v45  ;;  %754 = vrot.lane.b32.xlu1 %v593_v47, %s3108_s4  ;;  %v569_v52 = vsel %vm557_vm0, %v564_v33, %v568_v44  ;;  %v595_v60 = vshrl.u32 %v3223_v24, 16  ;;  %v597_v61 = vshll.u32 %v3223_v24, 16  ;;  %v602_v62 = vshll.u32 %v3253_v49, 16  ;;  %s3048_s27 = scalar_lea.hbm %s4443_s3, 512 }
  0x27   : > { %750 = vrot.lane.b32.xlu0 %v569_v52, %s3108_s4  ;;  %v665_v59 = vsel %vm557_vm0, %v3248_v45, %v664_v48  ;;  %v635_v63 = vrot.slane %v633_v55, 1  ;;  %v638_v1 = vshll.u32 %v3263_v53, 16  ;;  %v530_v8 = vunpack.c.l.b16 %v266_v56  ;;  %v3322_v56 = vld [vmem:[%s3197_s30 + $0x78] sm:$0xff]   ;;  %v2960_v45 = vld [vmem:[%s3197_s30 + $0x24] sm:$0xe] }
  0x28   : > { %v599_v6 = vrot.slane %v597_v61, 1  ;;  %v604_v7 = vrot.slane %v602_v62, 1  ;;  %v532_v13 = vunpack.c.l.b16 %v268_v3  ;;  %v619_v18 = vshrl.u32 %v3256_v50, 16  ;;  %v270_v3 = vld [vmem:[%s3197_s30 + $0x74] sm:$0x1] }
  0x29   : > { %v3288_v9 = vor.u32 %v635_v63, %v631_v54  ;;  %v640_v10 = vrot.slane %v638_v1, 1  ;;  %v3290_v12 = vpack.c.b16 %v530_v8, %v530_v8  ;;  %v621_v19 = vshll.u32 %v3256_v50, 16  ;;  %v3328_v63 = vld [vmem:[%s3197_s30 + $0x6c] sm:$0xff]  }
  0x2a   : > { %v600_v11 = vor.u32 %v599_v6, %v595_v60  ;;  %v3306_v29 = vpack.c.b16 %v532_v13, %v532_v13  ;;  %v643_v32 = vshrl.u32 %v3269_v57, 16  ;;  %v645_v33 = vshll.u32 %v3269_v57, 16  ;;  %v3331_v1 = vld [vmem:[%s3197_s30 + $0x6c] sm:$0xf0] }
  0x2b   : > { %v641_v17 = vsel %vm557_vm0, %v3288_v9, %v640_v10  ;;  %v626_v27 = vshll.u32 %v3290_v12, 16  ;;  %v623_v30 = vrot.slane %v621_v19, 1  ;;  %v526_v35 = vunpack.c.l.b16 %v262_v16 }
  0x2c   : > { %v605_v23 = vsel %vm557_vm0, %v600_v11, %v604_v7  ;;  %v650_v38 = vshll.u32 %v3306_v29, 16  ;;  %v647_v40 = vrot.slane %v645_v33, 1  ;;  %v571_v46 = vshrl.u32 %v3283_v4, 16 }
  0x2d   : > { %766 = vrot.lane.b32.xlu2 %v665_v59, %s3108_s4  ;;  %v628_v37 = vrot.slane %v626_v27, 1  ;;  %v624_v39 = vor.u32 %v623_v30, %v619_v18  ;;  %v3314_v41 = vpack.c.b16 %v526_v35, %v526_v35  ;;  %v573_v47 = vshll.u32 %v3283_v4, 16  ;;  %v275_v18 = vld [vmem:[%s3197_s30 + $0xb0] sm:$0x1]  ;;  %v3345_v27 = vld [vmem:[%s3197_s30 + $0xa8] sm:$0xff]  }
  0x2e   : > { %756 = vrot.lane.b32.xlu1 %v605_v23, %s3108_s4  ;;  %v652_v44 = vrot.slane %v650_v38, 1  ;;  %v536_v48 = vunpack.c.l.b16 %v272_v36  ;;  %v648_v54 = vor.u32 %v647_v40, %v643_v32  ;;  %v535_v61 = vunpack.c.l.b16 %v271_v43  ;;  %v3356_v40 = vld [vmem:[%s3197_s30 + $0x9c] sm:$0xf0] }
  0x2f   : > { %762 = vrot.lane.b32.xlu0 %v641_v17, %s3108_s4  ;;  %v629_v52 = vsel %vm557_vm0, %v624_v39, %v628_v37  ;;  %v578_v55 = vshll.u32 %v3314_v41, 16  ;;  %v575_v59 = vrot.slane %v573_v47, 1  ;;  %v679_v62 = vshrl.u32 %v3322_v56, 16  ;;  %v3353_v39 = vld [vmem:[%s3197_s30 + $0x9c] sm:$0xff]  }
  0x30   : > { %v3324_v60 = vpack.c.b16 %v536_v48, %v536_v48  ;;  %v653_v6 = vsel %vm557_vm0, %v648_v54, %v652_v44  ;;  %v691_v8 = vshrl.u32 %v3298_v21, 16  ;;  %v693_v10 = vshll.u32 %v3298_v21, 16  ;;  %v274_v48 = vld [vmem:[%s3197_s30 + $0xa4] sm:$0x1] }
  0x31   : > { %v580_v7 = vrot.slane %v578_v55, 1  ;;  %v576_v11 = vor.u32 %v575_v59, %v571_v46  ;;  %v3339_v16 = vpack.c.b16 %v535_v61, %v535_v61  ;;  %v681_v17 = vshll.u32 %v3322_v56, 16  ;;  %v273_v61 = vld [vmem:[%s3197_s30 + $0x98] sm:$0x1] }
  0x32   : > { %v698_v13 = vshll.u32 %v3324_v60, 16  ;;  %v695_v19 = vrot.slane %v693_v10, 1  ;;  %v534_v23 = vunpack.c.l.b16 %v270_v3  ;;  %v539_v38 = vunpack.c.l.b16 %v275_v18 }
  0x33   : > { %v581_v30 = vsel %vm557_vm0, %v576_v11, %v580_v7  ;;  %v683_v33 = vrot.slane %v681_v17, 1  ;;  %v686_v35 = vshll.u32 %v3339_v16, 16  ;;  %v727_v46 = vshrl.u32 %v3345_v27, 16  ;;  %v3373_v7 = vld [vmem:[%s3197_s30 + $0x90] sm:$0xff]  }
  0x34   : > { %v700_v32 = vrot.slane %v698_v13, 1  ;;  %v696_v36 = vor.u32 %v695_v19, %v691_v8  ;;  %v3350_v37 = vpack.c.b16 %v534_v23, %v534_v23  ;;  %v729_v47 = vshll.u32 %v3345_v27, 16  ;;  %v2957_v13 = vld [vmem:[%s3197_s30 + $0xc] sm:$0xe] }
  0x35   : > { %760 = vrot.lane.b32.xlu2 %v629_v52, %s3108_s4  ;;  %v3358_v43 = vor.u32 %v683_v33, %v679_v62  ;;  %v688_v44 = vrot.slane %v686_v35, 1  ;;  %v667_v54 = vshrl.u32 %v3328_v63, 16  ;;  %v669_v55 = vshll.u32 %v3328_v63, 16 }
  0x36   : > { %764 = vrot.lane.b32.xlu1 %v653_v6, %s3108_s4  ;;  %v701_v52 = vsel %vm557_vm0, %v696_v36, %v700_v32  ;;  %v674_v59 = vshll.u32 %v3350_v37, 16  ;;  %v3370_v3 = vpack.c.b16 %v539_v38, %v539_v38  ;;  %v731_v6 = vrot.slane %v729_v47, 1 }
  0x37   : > { %752 = vrot.lane.b32.xlu0 %v581_v30, %s3108_s4  ;;  %v689_v62 = vsel %vm557_vm0, %v3358_v43, %v688_v44  ;;  %v671_v8 = vrot.slane %v669_v55, 1  ;;  %v538_v11 = vunpack.c.l.b16 %v274_v48  ;;  %v537_v19 = vunpack.c.l.b16 %v273_v61  ;;  %v3392_v48 = vld [vmem:[%s3197_s30 + $0xb4] sm:$0xff]   ;;  %v2805_v61 = vld [vmem:[%s3197_s30] sm:$0xe] }
  0x38   : > { %v676_v10 = vrot.slane %v674_v59, 1  ;;  %v3377_v17 = vor.u32 %v731_v6, %v727_v46  ;;  %v734_v18 = vshll.u32 %v3370_v3, 16  ;;  %v705_v32 = vshll.u32 %v3373_v7, 16  ;;  %v2804_v59 = vld [vmem:[%s3197_s30] sm:$0xf0] }
  0x39   : > { %v672_v23 = vor.u32 %v671_v8, %v667_v54  ;;  %v3381_v30 = vpack.c.b16 %v538_v11, %v538_v11  ;;  %v3384_v35 = vpack.c.b16 %v537_v19, %v537_v19  ;;  %v703_v36 = vshrl.u32 %v3373_v7, 16  ;;  %v276_v11 = vld [vmem:[%s3197_s30 + $0xbc] sm:$0x1] }
  0x3a   : > { %v736_v33 = vrot.slane %v734_v18, 1  ;;  %v715_v44 = vshrl.u32 %v3353_v39, 16  ;;  %v717_v46 = vshll.u32 %v3353_v39, 16  ;;  %v707_v54 = vrot.slane %v705_v32, 1 }
  0x3b   : > { %v677_v38 = vsel %vm557_vm0, %v672_v23, %v676_v10  ;;  %v722_v47 = vshll.u32 %v3381_v30, 16  ;;  %v710_v55 = vshll.u32 %v3384_v35, 16  ;;  %v2958_v10 = vor.u32 %v2957_v13, %v3286_v5 }
  0x3c   : > { %v719_v6 = vrot.slane %v717_v46, 1  ;;  %v3405_v18 = vor.u32 %v707_v54, %v703_v36  ;;  %v2806_v32 = vor.u32 %v2805_v61, %v2804_v59  ;;  %v540_v26 = vunpack.c.l.b16 %v276_v11 }
  0x3d   : > { %772 = vrot.lane.b32.xlu2 %v701_v52, %s3108_s4  ;;  %v3395_v52 = vld [vmem:[%s3197_s30 + $0xb4] sm:$0xf0]  ;;  %v724_v8 = vrot.slane %v722_v47, 1  ;;  %v712_v19 = vrot.slane %v710_v55, 1  ;;  %v834_v5 = vrot.slane %v2958_v10, 1  ;;  %v832_v13 = vrot.slane %v3231_v28, 1 }
  0x3e   : > { %770 = vrot.lane.b32.xlu1 %v689_v62, %s3108_s4  ;;  %v737_v62 = vsel %vm557_vm0, %v3377_v17, %v736_v33  ;;  %4451 = vst [vmem:[#allocation7_spill] sm:$0xff] %v3405_v18  ;;  %v720_v23 = vor.u32 %v719_v6, %v715_v44  ;;  %v3415_v36 = vpack.c.b16 %v540_v26, %v540_v26  ;;  %v2810_v44 = vld [vmem:[%s3197_s30 + $0x30] sm:$0xf0]  ;;  %v831_v47 = vrot.slane %v2806_v32, 1  ;;  %v2808_v26 = vld [vmem:[%s3197_s30 + $0x18] sm:$0xe] }
  0x3f   : > { %768 = vrot.lane.b32.xlu0 %v677_v38, %s3108_s4  ;;  %v835_v38 = vrot.slane %v3314_v41, 1  ;;  %v713_v46 = vsel %vm557_vm0, %v3405_v18, %v712_v19  ;;  %v2811_v41 = vld [vmem:[%s3197_s30 + $0x30] sm:$0xe]  ;;  %v739_v54 = vshrl.u32 %v3392_v48, 16  ;;  %v741_v55 = vshll.u32 %v3392_v48, 16 }
  0x40   : > { %v725_v33 = vsel %vm557_vm0, %v720_v23, %v724_v8  ;;  %v746_v59 = vshll.u32 %v3415_v36, 16  ;;  %v2812_v6 = vor.u32 %v2811_v41, %v2810_v44  ;;  %v2807_v8 = vld [vmem:[%s3197_s30 + $0x18] sm:$0xf0]  ;;  %v2963_v10 = vld [vmem:[%s3197_s30 + $0x54] sm:$0xe]  ;;  %v833_v11 = vsel %vm830_vm1, %v831_v47, %v832_v13 }
  0x41   : > { %v836_v61 = vsel %vm830_vm1, %v834_v5, %v835_v38  ;;  %v2961_v23 = vor.u32 %v2960_v45, %v3226_v25  ;;  %v844_v32 = vrot.slane %v3216_v15, 1  ;;  %v2966_v5 = vld [vmem:[%s3197_s30 + $0x3c] sm:$0xe]  ;;  %v841_v13 = vrot.slane %v3253_v49, 1  ;;  %v2813_v45 = vld [vmem:[%s3197_s30 + $0x48] sm:$0xf0] }
  0x42   : > { %v748_v28 = vrot.slane %v746_v59, 1  ;;  %v838_v25 = vrot.slane %v3220_v20, 1  ;;  %v2814_v41 = vld [vmem:[%s3197_s30 + $0x48] sm:$0xe]  ;;  %v2969_v49 = vld [vmem:[%s3197_s30 + $0x6c] sm:$0xe] }
  0x43   : > { %v840_v44 = vrot.slane %v2961_v23, 1  ;;  %v2815_v59 = vor.u32 %v2814_v41, %v2813_v45  ;;  %v856_v45 = vrot.slane %v3238_v34, 1  ;;  %v2823_v41 = vld [vmem:[%s3197_s30 + $0x90] sm:$0xe] }
  0x45   : > { %778 = vrot.lane.b32.xlu2 %v737_v62, %s3108_s4  ;;  %v743_v62 = vrot.slane %v741_v55, 1  ;;  %v842_v55 = vsel %vm830_vm1, %v840_v44, %v841_v13 }
  0x46   : > { %776 = vrot.lane.b32.xlu1 %v725_v33, %s3108_s4  ;;  %v843_v33 = vrot.slane %v2812_v6, 1  ;;  %v2967_v6 = vor.u32 %v2966_v5, %v3259_v51  ;;  %v2972_v51 = vld [vmem:[%s3197_s30 + $0x9c] sm:$0xe] }
  0x47   : > { %774 = vrot.lane.b32.xlu0 %v713_v46, %s3108_s4  ;;  %v744_v19 = vor.u32 %v743_v62, %v739_v54  ;;  %v2809_v46 = vor.u32 %v2808_v26, %v2807_v8  ;;  %v2964_v54 = vor.u32 %v2963_v10, %v3272_v58  ;;  %v853_v62 = vrot.slane %v3306_v29, 1  ;;  %v2819_v8 = vld [vmem:[%s3197_s30 + $0x78] sm:$0xf0]  ;;  %v2820_v58 = vld [vmem:[%s3197_s30 + $0x78] sm:$0xe] }
  0x48   : > { %v845_v15 = vsel %vm830_vm1, %v843_v33, %v844_v32  ;;  %v850_v26 = vrot.slane %v3263_v53, 1  ;;  %v2821_v23 = vor.u32 %v2820_v58, %v2819_v8  ;;  %v2816_v32 = vld [vmem:[%s3197_s30 + $0x60] sm:$0xf0]  ;;  %v2817_v29 = vld [vmem:[%s3197_s30 + $0x60] sm:$0xe]  ;;  %v2970_v33 = vor.u32 %v2969_v49, %v3331_v1  ;;  %v3483_v58 = vld [vmem:[%s3197_s30 + $0xc] sm:$0xff]  }
  0x49   : > { %v749_v38 = vsel %vm557_vm0, %v744_v19, %v748_v28  ;;  %v837_v47 = vrot.slane %v2809_v46, 1  ;;  %v852_v20 = vrot.slane %v2964_v54, 1  ;;  %v849_v28 = vrot.slane %v2815_v59, 1  ;;  %v2822_v1 = vld [vmem:[%s3197_s30 + $0x90] sm:$0xf0] }
  0x4a   : > { %v847_v19 = vrot.slane %v3290_v12, 1  ;;  %v862_v53 = vrot.slane %v3339_v16, 1  ;;  %v861_v5 = vrot.slane %v2821_v23, 1  ;;  %v2818_v44 = vor.u32 %v2817_v29, %v2816_v32  ;;  %v2975_v12 = vld [vmem:[%s3197_s30 + $0x84] sm:$0xe] }
  0x4b   : > { %v854_v10 = vsel %vm830_vm1, %v852_v20, %v853_v62  ;;  %v858_v13 = vrot.slane %v2970_v33, 1  ;;  %v871_v49 = vrot.slane %v3381_v30, 1  ;;  %v868_v20 = vrot.slane %v3384_v35, 1  ;;  %v2825_v30 = vld [vmem:[%s3197_s30 + $0xa8] sm:$0xf0]  ;;  %v3500_v29 = vld [vmem:[%s3197_s30 + $0x24] sm:$0xff]  }
  0x4c   : > { %v855_v16 = vrot.slane %v2818_v44, 1  ;;  %v865_v8 = vrot.slane %v3324_v60, 1  ;;  %v874_v32 = vrot.slane %v3370_v3, 1  ;;  %v3511_v3 = vld [vmem:[%s3197_s30 + $0x54] sm:$0xff]   ;;  %v3519_v33 = vld [vmem:[%s3197_s30 + $0x3c] sm:$0xff]  }
  0x4d   : > { %881 = vrot.lane.b32.xlu2 %v836_v61, %s3109_s5  ;;  %v839_v61 = vsel %vm830_vm1, %v837_v47, %v838_v25  ;;  %v859_v25 = vrot.slane %v3350_v37, 1  ;;  %v2973_v47 = vor.u32 %v2972_v51, %v3356_v40  ;;  %v2978_v37 = vld [vmem:[%s3197_s30 + $0xb4] sm:$0xe]  ;;  %v3503_v51 = vld [vmem:[%s3197_s30 + $0x24] sm:$0xf0] }
  0x4e   : > { %879 = vrot.lane.b32.xlu1 %v833_v11, %s3109_s5  ;;  %v846_v11 = vrot.slane %v2967_v6, 1  ;;  %v857_v59 = vsel %vm830_vm1, %v855_v16, %v856_v45  ;;  %4452 = vst [vmem:[#allocation8_spill] sm:$0xff] %v3503_v51  ;;  %v3532_v44 = vld [vmem:[%s3197_s30 + $0x6c] sm:$0xf0]  ;;  %v3552_v45 = vld [vmem:[%s3197_s30 + $0x84] sm:$0xf0] }
  0x4f   : > { %780 = vrot.lane.b32.xlu0 %v749_v38, %s3108_s4  ;;  %v851_v38 = vsel %vm830_vm1, %v849_v28, %v850_v26  ;;  %v860_v54 = vsel %vm830_vm1, %v858_v13, %v859_v25  ;;  %v870_v34 = vrot.slane %v2973_v47, 1  ;;  %v3486_v28 = vld [vmem:[%s3197_s30 + $0xc] sm:$0xf0]  ;;  %v3543_v13 = vld [vmem:[%s3197_s30 + $0x9c] sm:$0xff]   ;;  %v3549_v25 = vld [vmem:[%s3197_s30 + $0x84] sm:$0xff]  }
  0x50   : > { %v848_v46 = vsel %vm830_vm1, %v846_v11, %v847_v19  ;;  %v877_v19 = vrot.slane %v3415_v36, 1  ;;  %v2557_v16 = vld [vmem:[%s3197_s30 + $0x14] sm:$0x1]  ;;  %v1216_v51 = vshrl.u32 %v3543_v13, 16 }
  0x51   : > { %v872_v62 = vsel %vm830_vm1, %v870_v34, %v871_v49  ;;  %v3563_v47 = vld [vmem:[%s3197_s30 + $0xb4] sm:$0xff]  }
  0x55   : > { %887 = vrot.lane.b32.xlu2 %v845_v15, %s3109_s5  ;;  %v863_v15 = vsel %vm830_vm1, %v861_v5, %v862_v53  ;;  %v3522_v53 = vld [vmem:[%s3197_s30 + $0x3c] sm:$0xf0]  ;;  %v2541_v5 = vld [vmem:[%s3197_s30 + $0x6c] sm:$0xff]  }
  0x56   : > { %885 = vrot.lane.b32.xlu1 %v842_v55, %s3109_s5  ;;  %v2824_v55 = vor.u32 %v2823_v41, %v2822_v1  ;;  %v2558_v41 = vld [vmem:[%s3197_s30 + $0x20] sm:$0x1] }
  0x57   : > { %883 = vrot.lane.b32.xlu0 %v839_v61, %s3109_s5  ;;  %v2976_v61 = vor.u32 %v2975_v12, %v3301_v22  ;;  %v2826_v22 = vld [vmem:[%s3197_s30 + $0xa8] sm:$0xe] }
  0x58   : > { %v867_v40 = vrot.slane %v2824_v55, 1  ;;  %v2827_v11 = vor.u32 %v2826_v22, %v2825_v30  ;;  %v1040_v55 = vunpack.c.l.b16 %v2558_v41 }
  0x59   : > { %v864_v6 = vrot.slane %v2976_v61, 1 }
  0x5a   : > { %v869_v26 = vsel %vm830_vm1, %v867_v40, %v868_v20  ;;  %v873_v23 = vrot.slane %v2827_v11, 1  ;;  %v3578_v61 = vpack.c.b16 %v1040_v55, %v1040_v55  ;;  %v1074_v40 = vshll.u32 %v3483_v58, 16 }
  0x5b   : > { %v866_v35 = vsel %vm830_vm1, %v864_v6, %v865_v8  ;;  %v3588_v6 = vld [vmem:[%s3197_s30 + $0xc0] sm:$0xff]   ;;  %v1168_v8 = vshrl.u32 %v2541_v5, 16  ;;  %v1072_v11 = vshrl.u32 %v3483_v58, 16 }
  0x5c   : > { %v875_v36 = vsel %vm830_vm1, %v873_v23, %v874_v32  ;;  %v2984_v23 = vld [vmem:[%s3197_s30 + $0x6c] sm:$0xe] }
  0x5d   : > { %893 = vrot.lane.b32.xlu2 %v854_v10, %s3109_s5  ;;  %v2979_v10 = vor.u32 %v2978_v37, %v3395_v52  ;;  %v1039_v37 = vunpack.c.l.b16 %v2557_v16  ;;  %v1218_v16 = vshll.u32 %v3543_v13, 16 }
  0x5e   : > { %891 = vrot.lane.b32.xlu1 %v851_v38, %s3109_s5  ;;  %v3514_v38 = vld [vmem:[%s3197_s30 + $0x54] sm:$0xf0] }
  0x5f   : > { %889 = vrot.lane.b32.xlu0 %v848_v46, %s3109_s5  ;;  %v876_v60 = vrot.slane %v2979_v10, 1  ;;  %v2981_v10 = vld [vmem:[%s3197_s30 + $0x9c] sm:$0xe] }
  0x61   : > { %v878_v52 = vsel %vm830_vm1, %v876_v60, %v877_v19  ;;  %v1076_v60 = vrot.slane %v1074_v40, 1 }
  0x63   : > { %v1077_v55 = vor.u32 %v1076_v60, %v1072_v11  ;;  %v1220_v60 = vrot.slane %v1218_v16, 1  ;;  %v2633_v16 = vld [vmem:[%s3197_s30 + $0xb0] sm:$0x1] }
  0x65   : > { %899 = vrot.lane.b32.xlu2 %v863_v15, %s3109_s5 }
  0x66   : > { %897 = vrot.lane.b32.xlu1 %v860_v54, %s3109_s5  ;;  %v3566_v54 = vld [vmem:[%s3197_s30 + $0xb4] sm:$0xf0] }
  0x67   : > { %895 = vrot.lane.b32.xlu0 %v857_v59, %s3109_s5  ;;  %v1170_v59 = vshll.u32 %v2541_v5, 16 }
  0x69   : > { %v1172_v30 = vrot.slane %v1170_v59, 1 }
  0x6b   : > { %v1173_v32 = vor.u32 %v1172_v30, %v1168_v8 }
  0x6d   : > { %905 = vrot.lane.b32.xlu2 %v872_v62, %s3109_s5  ;;  %v3585_v62 = vpack.c.b16 %v1039_v37, %v1039_v37 }
  0x6e   : > { %903 = vrot.lane.b32.xlu1 %v869_v26, %s3109_s5  ;;  %v2569_v26 = vld [vmem:[%s3197_s30 + $0xa4] sm:$0x1] }
  0x6f   : > { %901 = vrot.lane.b32.xlu0 %v866_v35, %s3109_s5  ;;  %v1091_v35 = vshll.u32 %v3578_v61, 16  ;;  %v1079_v19 = vshll.u32 %v3585_v62, 16 }
  0x71   : > { %v1081_v37 = vrot.slane %v1079_v19, 1 }
  0x75   : > { %991 = vrot.lane.b32.xlu2 %v3483_v58, %s3110_s6 }
  0x76   : > { %909 = vrot.lane.b32.xlu1 %v878_v52, %s3109_s5 }
  0x77   : > { %907 = vrot.lane.b32.xlu0 %v875_v36, %s3109_s5  ;;  %v1051_v36 = vunpack.c.l.b16 %v2569_v26  ;;  %v2985_v26 = vor.u32 %v2984_v23, %v3532_v44 }
  0x79   : > { %v1067_v40 = vpack.c.b16 %v1051_v36, %v1051_v36 }
  0x7b   : > { %v1380_v18 = vrot.slane %v1067_v40, 1  ;;  %v1223_v19 = vshll.u32 %v1067_v40, 16  ;;  %v2870_v40 = vld [vmem:[%s3197_s30 + $0xa8] sm:$0xf0] }
  0x7d   : > { %997 = vrot.lane.b32.xlu2 %v3200_v0, %s3110_s6  ;;  %v1225_v36 = vrot.slane %v1223_v19, 1 }
  0x7e   : > { %995 = vrot.lane.b32.xlu1 %v3500_v29, %s3110_s6 }
  0x7f   : > { %v3526_v46 = vpop.permute.xlu2 %758  ;;  %993 = vrot.lane.b32.xlu0 %v3204_v2, %s3110_s6  ;;  %v2980_v2 = vld [vmem:[%s3197_s30 + $0x9c] sm:$0xf0] }
  0x80   : > { %v2982_v8 = vor.u32 %v2981_v10, %v2980_v2  ;;  %v1367_v10 = vrot.slane %v2985_v26, 1  ;;  %v2864_v26 = vld [vmem:[%s3197_s30 + $0x78] sm:$0xf0] }
  0x82   : > { %v1379_v11 = vrot.slane %v2982_v8, 1  ;;  %v2871_v8 = vld [vmem:[%s3197_s30 + $0xa8] sm:$0xe] }
  0x83   : > { %v2872_v19 = vor.u32 %v2871_v8, %v2870_v40 }
  0x85   : > { %1003 = vrot.lane.b32.xlu2 %v3511_v3, %s3110_s6 }
  0x86   : > { %1001 = vrot.lane.b32.xlu1 %v3244_v42, %s3110_s6  ;;  %v2565_v42 = vld [vmem:[%s3197_s30 + $0x74] sm:$0x1] }
  0x87   : > { %v3538_v12 = vpop.permute.xlu2 %766  ;;  %999 = vrot.lane.b32.xlu0 %v3519_v33, %s3110_s6  ;;  %v1047_v15 = vunpack.c.l.b16 %v2565_v42  ;;  %v2629_v42 = vld [vmem:[%s3197_s30 + $0x80] sm:$0x1] }
  0x88   : > { %v1559_v30 = vunpack.c.l.b16 %v2629_v42 }
  0x89   : > { %v3570_v34 = vpack.c.b16 %v1047_v15, %v1047_v15  ;;  %v1093_v15 = vrot.slane %v1091_v35, 1  ;;  %v1082_v35 = vsel %vm557_vm0, %v1077_v55, %v1081_v37  ;;  %v1563_v37 = vunpack.c.l.b16 %v2633_v16  ;;  %v2621_v16 = vld [vmem:[%s3197_s30 + $0x20] sm:$0x1] }
  0x8a   : > { %v1551_v40 = vunpack.c.l.b16 %v2621_v16 }
  0x8b   : > { %v1175_v22 = vshll.u32 %v3570_v34, 16  ;;  %v1368_v44 = vrot.slane %v3570_v34, 1 }
  0x8d   : > { %1009 = vrot.lane.b32.xlu2 %v3322_v56, %s3110_s6  ;;  %v1177_v52 = vrot.slane %v1175_v22, 1  ;;  %v1094_v22 = vsel %vm557_vm0, %v3235_v31, %v1093_v15  ;;  %v1369_v34 = vsel %vm830_vm1, %v1367_v10, %v1368_v44 }
  0x8e   : > { %1007 = vrot.lane.b32.xlu1 %v2541_v5, %s3110_s6 }
  0x8f   : > { %v3555_v1 = vpop.permute.xlu2 %760  ;;  %1005 = vrot.lane.b32.xlu0 %v3214_v14, %s3110_s6  ;;  %v1178_v59 = vsel %vm557_vm0, %v1173_v32, %v1177_v52  ;;  %v3618_v32 = vpack.c.b16 %v1559_v30, %v1559_v30  ;;  %v1221_v52 = vor.u32 %v1220_v60, %v1216_v51  ;;  %v1579_v60 = vpack.c.b16 %v1563_v37, %v1563_v37 }
  0x90   : > { %v1122_v37 = vshll.u32 %v3519_v33, 16 }
  0x91   : > { %v1687_v42 = vshll.u32 %v3618_v32, 16 }
  0x93   : > { %v1689_v51 = vrot.slane %v1687_v42, 1 }
  0x95   : > { %1015 = vrot.lane.b32.xlu2 %v3543_v13, %s3110_s6  ;;  %v1381_v13 = vsel %vm830_vm1, %v1379_v11, %v1380_v18  ;;  %v1226_v18 = vsel %vm557_vm0, %v1221_v52, %v1225_v36  ;;  %v1690_v11 = vsel %vm557_vm0, %v3358_v43, %v1689_v51  ;;  %v1892_v52 = vrot.slane %v1579_v60, 1 }
  0x96   : > { %1013 = vrot.lane.b32.xlu1 %v3373_v7, %s3110_s6  ;;  %v1735_v36 = vshll.u32 %v1579_v60, 16  ;;  %v1880_v51 = vrot.slane %v3618_v32, 1 }
  0x97   : > { %v3574_v14 = vpop.permute.xlu2 %772  ;;  %1011 = vrot.lane.b32.xlu0 %v3549_v25, %s3110_s6 }
  0x98   : > { %v3576_v49 = vpop.permute.xlu1 %754 }
  0x99   : > { %v3583_v20 = vpop.permute.xlu0 %750 }
  0x9d   : > { %1021 = vrot.lane.b32.xlu2 %v3588_v6, %s3110_s6 }
  0x9e   : > { %1019 = vrot.lane.b32.xlu1 %v3563_v47, %s3110_s6 }
  0x9f   : > { %v3601_v5 = vpop.permute.xlu2 %778  ;;  %1017 = vrot.lane.b32.xlu0 %v3345_v27, %s3110_s6  ;;  %s4307_s6 = scalar_lea.vmem [#allocation2], %s2523_s29 }
  0xa0   : > { %v3604_v41 = vpop.permute.xlu1 %756 }
  0xa1   : > { %v3609_v58 = vpop.permute.xlu0 %762 }
  0xa5   : > { %1279 = vrot.lane.b32.xlu2 %v1178_v59, %s3111_s7 }
  0xa6   : > { %1265 = vrot.lane.b32.xlu1 %v1094_v22, %s3111_s7 }
  0xa7   : > { %v882_v2 = vpop.permute.xlu2 %881  ;;  %1263 = vrot.lane.b32.xlu0 %v1082_v35, %s3111_s7  ;;  %v2865_v35 = vld [vmem:[%s3197_s30 + $0x78] sm:$0xe] }
  0xa8   : > { %v765_v31 = vpop.permute.xlu1 %764  ;;  %v2866_v10 = vor.u32 %v2865_v35, %v2864_v26  ;;  %v3671_v26 = vld [vmem:[%s3197_s30 + $0x18] sm:$0xff]  }
  0xa9   : > { %v753_v23 = vpop.permute.xlu0 %752  ;;  %v1951_v42 = vsel %vm1935_vm2, %v3269_v57, %v765_v31 }
  0xaa   : > { %v1939_v15 = vsel %vm1935_vm2, %v3283_v4, %v753_v23  ;;  %v1945_v4 = vsel %vm1935_vm2, %v3200_v0, %v3526_v46  ;;  %v2561_v0 = vld [vmem:[%s3197_s30 + $0x44] sm:$0x1]  ;;  %v2987_v46 = vld [vmem:[%s3197_s30 + $0x3c] sm:$0xe]  ;;  %v2990_v23 = vld [vmem:[%s3197_s30 + $0xc] sm:$0xe] }
  0xab   : > { %v3630_v55 = vsel %vm1968_vm3, %v1939_v15, %v882_v2  ;;  %v1043_v44 = vunpack.c.l.b16 %v2561_v0  ;;  %v2988_v31 = vor.u32 %v2987_v46, %v3522_v53  ;;  %v1120_v53 = vshrl.u32 %v3519_v33, 16 }
  0xad   : > { %1415 = vrot.lane.b32.xlu2 %v1381_v13, %s3112_s8  ;;  %v1891_v13 = vrot.slane %v2872_v19, 1  ;;  %v1059_v57 = vpack.c.b16 %v1043_v44, %v1043_v44  ;;  %v1355_v60 = vrot.slane %v2988_v31, 1  ;;  %v1124_v19 = vrot.slane %v1122_v37, 1 }
  0xae   : > { %1407 = vrot.lane.b32.xlu1 %v1369_v34, %s3112_s8  ;;  %v1586_v44 = vshll.u32 %v3671_v26, 16 }
  0xaf   : > { %v888_v59 = vpop.permute.xlu2 %887  ;;  %1287 = vrot.lane.b32.xlu0 %v1226_v18, %s3111_s7  ;;  %v1879_v18 = vrot.slane %v2866_v10, 1  ;;  %v1356_v32 = vrot.slane %v1059_v57, 1  ;;  %v1127_v0 = vshll.u32 %v1059_v57, 16  ;;  %v3679_v10 = vpack.c.b16 %v1551_v40, %v1551_v40  ;;  %v2625_v57 = vld [vmem:[%s3197_s30 + $0x50] sm:$0x1] }
  0xb0   : > { %v771_v30 = vpop.permute.xlu1 %770  ;;  %v3641_v22 = vsel %vm1968_vm3, %v1945_v4, %v888_v59  ;;  %v1893_v59 = vsel %vm830_vm1, %v1891_v13, %v1892_v52  ;;  %v1344_v52 = vrot.slane %v3585_v62, 1  ;;  %v1588_v37 = vrot.slane %v1586_v44, 1 }
  0xb1   : > { %v3650_v2 = vpop.permute.xlu0 %768  ;;  %v1881_v35 = vsel %vm830_vm1, %v1879_v18, %v1880_v51  ;;  %v1957_v13 = vsel %vm1935_vm2, %v3322_v56, %v771_v30  ;;  %v1125_v30 = vor.u32 %v1124_v19, %v1120_v53  ;;  %v1129_v16 = vrot.slane %v1127_v0, 1  ;;  %v2858_v53 = vld [vmem:[%s3197_s30 + $0x48] sm:$0xf0]  ;;  %v2859_v19 = vld [vmem:[%s3197_s30 + $0x48] sm:$0xe] }
  0xb2   : > { %v1584_v51 = vshrl.u32 %v3671_v26, 16  ;;  %v1591_v62 = vshll.u32 %v3679_v10, 16  ;;  %v1943_v44 = vsel %vm1935_vm2, %v3223_v24, %v3604_v41  ;;  %v2566_v24 = vld [vmem:[%s3197_s30 + $0x80] sm:$0x1] }
  0xb3   : > { %v1130_v40 = vsel %vm557_vm0, %v1125_v30, %v1129_v16 }
  0xb5   : > { %1791 = vrot.lane.b32.xlu2 %v1690_v11, %s3113_s9  ;;  %v2991_v11 = vor.u32 %v2990_v23, %v3486_v28 }
  0xb6   : > { %1527 = vrot.lane.b32.xlu1 %v3345_v27, %s3114_s10  ;;  %v1737_v27 = vrot.slane %v1735_v36, 1  ;;  %v2951_v36 = vld [vmem:[%s3197_s30] sm:$0xff]  }
  0xb7   : > { %v894_v15 = vpop.permute.xlu2 %893  ;;  %1519 = vrot.lane.b32.xlu0 %v3322_v56, %s3114_s10  ;;  %v1343_v33 = vrot.slane %v2991_v11, 1  ;;  %v1357_v56 = vsel %vm830_vm1, %v1355_v60, %v1356_v32  ;;  %v1593_v32 = vrot.slane %v1591_v62, 1 }
  0xb8   : > { %v3660_v34 = vsel %vm1968_vm3, %v1951_v42, %v894_v15  ;;  %v777_v4 = vpop.permute.xlu1 %776  ;;  %v1738_v46 = vsel %vm557_vm0, %v3377_v17, %v1737_v27  ;;  %v1937_v42 = vsel %vm1935_vm2, %v2951_v36, %v3583_v20  ;;  %v1555_v27 = vunpack.c.l.b16 %v2625_v57 }
  0xb9   : > { %v3668_v8 = vpop.permute.xlu0 %774  ;;  %v1345_v20 = vsel %vm830_vm1, %v1343_v33, %v1344_v52  ;;  %v1963_v11 = vsel %vm1935_vm2, %v3353_v39, %v777_v4  ;;  %v2852_v39 = vld [vmem:[%s3197_s30 + $0x18] sm:$0xf0]  ;;  %v2853_v4 = vld [vmem:[%s3197_s30 + $0x18] sm:$0xe]  ;;  %v2570_v33 = vld [vmem:[%s3197_s30 + $0xb0] sm:$0x1] }
  0xba   : > { %v2854_v16 = vor.u32 %v2853_v4, %v2852_v39 }
  0xbd   : > { %1927 = vrot.lane.b32.xlu2 %v1893_v59, %s3115_s11  ;;  %v2798_v59 = vld [vmem:[%s3197_s30 + $0x48] sm:$0xff]  }
  0xbe   : > { %1919 = vrot.lane.b32.xlu1 %v1881_v35, %s3115_s11  ;;  %v1589_v35 = vor.u32 %v1588_v37, %v1584_v51  ;;  %v1052_v51 = vunpack.c.l.b16 %v2570_v33  ;;  %v1632_v37 = vshrl.u32 %v2798_v59, 16  ;;  %v1947_v33 = vsel %vm1935_vm2, %v3256_v50, %v3555_v1 }
  0xbf   : > { %v900_v28 = vpop.permute.xlu2 %899  ;;  %1799 = vrot.lane.b32.xlu0 %v1738_v46, %s3113_s9  ;;  %v1634_v46 = vshll.u32 %v2798_v59, 16 }
  0xc0   : > { %v3686_v23 = vsel %vm1968_vm3, %v1957_v13, %v900_v28  ;;  %v880_v15 = vpop.permute.xlu1 %879  ;;  %v1571_v28 = vpack.c.b16 %v1555_v27, %v1555_v27  ;;  %v1594_v36 = vsel %vm557_vm0, %v1589_v35, %v1593_v32  ;;  %v2840_v35 = vld [vmem:[%s3197_s30 + $0x78] sm:$0xf0]  ;;  %v2841_v32 = vld [vmem:[%s3197_s30 + $0x78] sm:$0xe] }
  0xc1   : > { %v1970_v18 = vsel %vm1968_vm3, %v1937_v42, %v880_v15  ;;  %v3698_v31 = vpop.permute.xlu0 %780  ;;  %v2860_v42 = vor.u32 %v2859_v19, %v2858_v53  ;;  %v2952_v15 = vld [vmem:[%s3197_s30 + $0x18] sm:$0xff]   ;;  %v1636_v62 = vrot.slane %v1634_v46, 1  ;;  %v1856_v53 = vrot.slane %v3679_v10, 1 }
  0xc2   : > { %v1639_v57 = vshll.u32 %v1571_v28, 16  ;;  %v1868_v27 = vrot.slane %v1571_v28, 1  ;;  %v3736_v19 = vpack.c.b16 %v1052_v51, %v1052_v51  ;;  %v2842_v4 = vor.u32 %v2841_v32, %v2840_v35  ;;  %v2992_v51 = vld [vmem:[%s3197_s30 + $0x84] sm:$0xf0] }
  0xc4   : > { %v1641_v28 = vrot.slane %v1639_v57, 1 }
  0xc5   : > { %1399 = vrot.lane.b32.xlu2 %v1357_v56, %s3112_s8  ;;  %v1941_v56 = vsel %vm1935_vm2, %v2952_v15, %v3576_v49  ;;  %v3755_v15 = vld [vmem:[%s3197_s30 + $0xb4] sm:$0xff]  }
  0xc6   : > { %1391 = vrot.lane.b32.xlu1 %v1345_v20, %s3112_s8  ;;  %v1867_v20 = vrot.slane %v2860_v42, 1  ;;  %v1235_v42 = vshll.u32 %v3736_v19, 16 }
  0xc7   : > { %v906_v60 = vpop.permute.xlu2 %905  ;;  %1271 = vrot.lane.b32.xlu0 %v1130_v40, %s3111_s7  ;;  %v1048_v40 = vunpack.c.l.b16 %v2566_v24  ;;  %v1370_v24 = vrot.slane %v2842_v4, 1 }
  0xc8   : > { %v3710_v0 = vsel %vm1968_vm3, %v1963_v11, %v906_v60  ;;  %v886_v13 = vpop.permute.xlu1 %885  ;;  %v1855_v60 = vrot.slane %v2854_v16, 1  ;;  %v1869_v39 = vsel %vm830_vm1, %v1867_v20, %v1868_v27  ;;  %v3762_v16 = vld [vmem:[%s3197_s30 + $0x84] sm:$0xff]   ;;  %v1237_v57 = vrot.slane %v1235_v42, 1 }
  0xc9   : > { %v1976_v52 = vsel %vm1968_vm3, %v1943_v44, %v886_v13  ;;  %v884_v30 = vpop.permute.xlu0 %883  ;;  %v2953_v44 = vld [vmem:[%s3197_s30 + $0x48] sm:$0xff]   ;;  %v1637_v13 = vor.u32 %v1636_v62, %v1632_v37  ;;  %v1064_v10 = vpack.c.b16 %v1048_v40, %v1048_v40  ;;  %v1955_v20 = vsel %vm1935_vm2, %v3328_v63, %v3650_v2  ;;  %v2634_v40 = vld [vmem:[%s3197_s30 + $0xbc] sm:$0x1] }
  0xca   : > { %v3726_v41 = vsel %vm1968_vm3, %v1941_v56, %v884_v30  ;;  %v1949_v46 = vsel %vm1935_vm2, %v2953_v44, %v3609_v58  ;;  %v3758_v56 = vld [vmem:[%s3197_s30 + $0xb4] sm:$0xf0]  ;;  %v2954_v44 = vld [vmem:[%s3197_s30 + $0x60] sm:$0xff]   ;;  %v1238_v2 = vsel %vm557_vm0, %v3377_v17, %v1237_v57  ;;  %v1961_v17 = vsel %vm1935_vm2, %v3373_v7, %v3668_v8 }
  0xcb   : > { %v1642_v30 = vsel %vm557_vm0, %v1637_v13, %v1641_v28  ;;  %v1371_v50 = vrot.slane %v1064_v10, 1  ;;  %v1187_v1 = vshll.u32 %v1064_v10, 16  ;;  %v2630_v13 = vld [vmem:[%s3197_s30 + $0x8c] sm:$0x1]  ;;  %v1564_v28 = vunpack.c.l.b16 %v2634_v40 }
  0xcc   : > { %v1560_v4 = vunpack.c.l.b16 %v2630_v13  ;;  %v1959_v57 = vsel %vm1935_vm2, %v3298_v21, %v3574_v14  ;;  %v1740_v8 = vshrl.u32 %v3755_v15, 16 }
  0xcd   : > { %1775 = vrot.lane.b32.xlu2 %v1594_v36, %s3113_s9  ;;  %v1372_v35 = vsel %vm830_vm1, %v1370_v24, %v1371_v50  ;;  %v1189_v32 = vrot.slane %v1187_v1, 1  ;;  %v2562_v24 = vld [vmem:[%s3197_s30 + $0x50] sm:$0x1] }
  0xce   : > { %1511 = vrot.lane.b32.xlu1 %v2798_v59, %s3114_s10  ;;  %v1576_v1 = vpack.c.b16 %v1560_v4, %v1560_v4 }
  0xcf   : > { %v992_v49 = vpop.permute.xlu2 %991  ;;  %1503 = vrot.lane.b32.xlu0 %v3671_v26, %s3114_s10  ;;  %v1857_v26 = vsel %vm830_vm1, %v1855_v60, %v1856_v53  ;;  %v2846_v60 = vld [vmem:[%s3197_s30 + $0xa8] sm:$0xf0]  ;;  %v2847_v53 = vld [vmem:[%s3197_s30 + $0xa8] sm:$0xe]  ;;  %v1190_v10 = vsel %vm557_vm0, %v3358_v43, %v1189_v32  ;;  %v1694_v43 = vshll.u32 %v3762_v16, 16 }
  0xd0   : > { %v3733_v11 = vsel %vm2001_vm4, %v1970_v18, %v992_v49  ;;  %v892_v59 = vpop.permute.xlu1 %891  ;;  %v1883_v32 = vrot.slane %v1576_v1, 1 }
  0xd1   : > { %v1982_v18 = vsel %vm1968_vm3, %v1949_v46, %v892_v59  ;;  %v890_v58 = vpop.permute.xlu0 %889  ;;  %v2993_v59 = vld [vmem:[%s3197_s30 + $0x84] sm:$0xe] }
  0xd2   : > { %v3749_v36 = vsel %vm1968_vm3, %v1947_v33, %v890_v58  ;;  %v1742_v58 = vshll.u32 %v3755_v15, 16 }
  0xd5   : > { %1911 = vrot.lane.b32.xlu2 %v1869_v39, %s3115_s11  ;;  %v2848_v39 = vor.u32 %v2847_v53, %v2846_v60  ;;  %v1699_v60 = vshll.u32 %v1576_v1, 16  ;;  %v2996_v53 = vld [vmem:[%s3197_s30 + $0xb4] sm:$0xe] }
  0xd6   : > { %1903 = vrot.lane.b32.xlu1 %v1857_v26, %s3115_s11  ;;  %v3796_v26 = vpack.c.b16 %v1564_v28, %v1564_v28  ;;  %v1967_v28 = vsel %vm1935_vm2, %v3392_v48, %v3698_v31 }
  0xd7   : > { %v998_v37 = vpop.permute.xlu2 %997  ;;  %1783 = vrot.lane.b32.xlu0 %v1642_v30, %s3113_s9  ;;  %v1382_v30 = vrot.slane %v2848_v39, 1 }
  0xd8   : > { %v3767_v62 = vsel %vm2001_vm4, %v1976_v52, %v998_v37  ;;  %v898_v27 = vpop.permute.xlu1 %897  ;;  %v1953_v52 = vsel %vm1935_vm2, %v2954_v44, %v3538_v12  ;;  %v2994_v37 = vor.u32 %v2993_v59, %v2992_v51  ;;  %v1747_v40 = vshll.u32 %v3796_v26, 16 }
  0xd9   : > { %v1988_v49 = vsel %vm1968_vm3, %v1955_v20, %v898_v27  ;;  %v896_v46 = vpop.permute.xlu0 %895  ;;  %v1744_v27 = vrot.slane %v1742_v58, 1  ;;  %v1696_v51 = vrot.slane %v1694_v43, 1  ;;  %v2955_v58 = vld [vmem:[%s3197_s30 + $0xa8] sm:$0xff]  }
  0xda   : > { %v3784_v63 = vsel %vm1968_vm3, %v1953_v52, %v896_v46  ;;  %v1882_v14 = vrot.slane %v2994_v37, 1  ;;  %v2828_v52 = vld [vmem:[%s3197_s30 + $0x18] sm:$0xf0]  ;;  %v2829_v46 = vld [vmem:[%s3197_s30 + $0x18] sm:$0xe]  ;;  %v1749_v59 = vrot.slane %v1747_v40, 1 }
  0xdb   : > { %v1347_v37 = vrot.slane %v3578_v61, 1 }
  0xdc   : > { %v1884_v4 = vsel %vm830_vm1, %v1882_v14, %v1883_v32  ;;  %v2835_v14 = vld [vmem:[%s3197_s30 + $0x48] sm:$0xe]  ;;  %v2999_v32 = vld [vmem:[%s3197_s30 + $0x24] sm:$0xe] }
  0xdd   : > { %1409 = vrot.lane.b32.xlu2 %v1372_v35, %s3112_s8  ;;  %v1044_v35 = vunpack.c.l.b16 %v2562_v24  ;;  %v3847_v24 = vld [vmem:[%s3197_s30 + $0x54] sm:$0xff]  }
  0xde   : > { %1289 = vrot.lane.b32.xlu1 %v1238_v2, %s3111_s7 }
  0xdf   : > { %v1004_v12 = vpop.permute.xlu2 %1003  ;;  %1281 = vrot.lane.b32.xlu0 %v1190_v10, %s3111_s7  ;;  %v3828_v2 = vpack.c.b16 %v1044_v35, %v1044_v35  ;;  %v1895_v35 = vrot.slane %v3796_v26, 1 }
  0xe0   : > { %v3793_v33 = vsel %vm2001_vm4, %v1982_v18, %v1004_v12  ;;  %v904_v42 = vpop.permute.xlu1 %903  ;;  %v1383_v18 = vrot.slane %v3736_v19, 1  ;;  %v1692_v19 = vshrl.u32 %v3762_v16, 16  ;;  %v2830_v12 = vor.u32 %v2829_v46, %v2828_v52 }
  0xe1   : > { %v3805_v50 = vsel %vm1968_vm3, %v1961_v17, %v904_v42  ;;  %v902_v7 = vpop.permute.xlu0 %901  ;;  %v1965_v17 = vsel %vm1935_vm2, %v2955_v58, %v3601_v5  ;;  %v1139_v43 = vshll.u32 %v3828_v2, 16  ;;  %v2567_v58 = vld [vmem:[%s3197_s30 + $0x8c] sm:$0x1] }
  0xe2   : > { %v3813_v20 = vsel %vm1968_vm3, %v1959_v57, %v902_v7  ;;  %v1384_v21 = vsel %vm830_vm1, %v1382_v30, %v1383_v18  ;;  %v1697_v39 = vor.u32 %v1696_v51, %v1692_v19  ;;  %v2997_v30 = vor.u32 %v2996_v53, %v3758_v56  ;;  %v3850_v18 = vld [vmem:[%s3197_s30 + $0x54] sm:$0xf0]  ;;  %v3855_v57 = vld [vmem:[%s3197_s30 + $0x24] sm:$0xff]   ;;  %v2626_v19 = vld [vmem:[%s3197_s30 + $0x5c] sm:$0x1] }
  0xe3   : > { %v1346_v1 = vrot.slane %v2830_v12, 1  ;;  %v2998_v7 = vld [vmem:[%s3197_s30 + $0x24] sm:$0xf0]  ;;  %v1141_v56 = vrot.slane %v1139_v43, 1  ;;  %v2622_v53 = vld [vmem:[%s3197_s30 + $0x2c] sm:$0x1]  ;;  %v1556_v52 = vunpack.c.l.b16 %v2626_v19 }
  0xe4   : > { %v1894_v40 = vrot.slane %v2997_v30, 1  ;;  %v3000_v12 = vor.u32 %v2999_v32, %v2998_v7  ;;  %v1644_v30 = vshrl.u32 %v3847_v24, 16  ;;  %v1049_v7 = vunpack.c.l.b16 %v2567_v58  ;;  %v2203_v58 = vld [vmem:[%s4441_s1 + $0x10] sm:$0x3] }
  0xe5   : > { %1529 = vrot.lane.b32.xlu2 %v3755_v15, %s3114_s10  ;;  %v1745_v15 = vor.u32 %v1744_v27, %v1740_v8  ;;  %v1348_v61 = vsel %vm830_vm1, %v1346_v1, %v1347_v37  ;;  %v1142_v26 = vsel %vm557_vm0, %v3288_v9, %v1141_v56 }
  0xe6   : > { %1521 = vrot.lane.b32.xlu1 %v3762_v16, %s3114_s10  ;;  %v1896_v46 = vsel %vm830_vm1, %v1894_v40, %v1895_v35  ;;  %v1242_v40 = vshll.u32 %v3563_v47, 16 }
  0xe7   : > { %v1010_v44 = vpop.permute.xlu2 %1009  ;;  %1417 = vrot.lane.b32.xlu0 %v1384_v21, %s3112_s8  ;;  %v1750_v31 = vsel %vm557_vm0, %v1745_v15, %v1749_v59  ;;  %v2834_v21 = vld [vmem:[%s3197_s30 + $0x48] sm:$0xf0]  ;;  %v1552_v15 = vunpack.c.l.b16 %v2622_v53 }
  0xe8   : > { %v3826_v13 = vsel %vm2001_vm4, %v1988_v49, %v1010_v44  ;;  %v910_v16 = vpop.permute.xlu1 %909  ;;  %v1701_v49 = vrot.slane %v1699_v60, 1 }
  0xe9   : > { %v2000_v10 = vsel %vm1968_vm3, %v1967_v28, %v910_v16  ;;  %v908_v42 = vpop.permute.xlu0 %907  ;;  %v2571_v28 = vld [vmem:[%s3197_s30 + $0xbc] sm:$0x1] }
  0xea   : > { %v3840_v48 = vsel %vm1968_vm3, %v1965_v17, %v908_v42  ;;  %v1702_v5 = vsel %vm557_vm0, %v1697_v39, %v1701_v49  ;;  %v3887_v39 = vpack.c.b16 %v1556_v52, %v1556_v52  ;;  %v1359_v42 = vrot.slane %v3828_v2, 1 }
  0xeb   : > { %v1596_v2 = vshrl.u32 %v3855_v57, 16 }
  0xec   : > { %v1651_v37 = vshll.u32 %v3887_v39, 16 }
  0xed   : > { %1921 = vrot.lane.b32.xlu2 %v1884_v4, %s3115_s11  ;;  %v1598_v4 = vshll.u32 %v3855_v57, 16 }
  0xee   : > { %1801 = vrot.lane.b32.xlu1 %v1750_v31, %s3113_s9  ;;  %v1053_v31 = vunpack.c.l.b16 %v2571_v28  ;;  %v1653_v32 = vrot.slane %v1651_v37, 1  ;;  %v1192_v28 = vshrl.u32 %v3549_v25, 16 }
  0xef   : > { %v3859_v8 = vpop.permute.xlu2 %1015  ;;  %1793 = vrot.lane.b32.xlu0 %v1702_v5, %s3113_s9 }
  0xf0   : > { %v996_v27 = vpop.permute.xlu1 %995 }
  0xf1   : > { %v3866_v51 = vsel %vm2001_vm4, %v3726_v41, %v996_v27  ;;  %v994_v60 = vpop.permute.xlu0 %993  ;;  %v2836_v41 = vor.u32 %v2835_v14, %v2834_v21  ;;  %v1600_v27 = vrot.slane %v1598_v4, 1  ;;  %v1194_v21 = vshll.u32 %v3549_v25, 16 }
  0xf2   : > { %v3875_v44 = vsel %vm2001_vm4, %v3630_v55, %v994_v60  ;;  %v1646_v55 = vshll.u32 %v3847_v24, 16  ;;  %v3916_v60 = vpack.c.b16 %v1049_v7, %v1049_v7 }
  0xf3   : > { %v1358_v49 = vrot.slane %v2836_v41, 1  ;;  %v1601_v52 = vor.u32 %v1600_v27, %v1596_v2  ;;  %v2631_v27 = vld [vmem:[%s3197_s30 + $0x98] sm:$0x1] }
  0xf4   : > { %v1648_v1 = vrot.slane %v1646_v55, 1  ;;  %v1196_v55 = vrot.slane %v1194_v21, 1 }
  0xf5   : > { %1393 = vrot.lane.b32.xlu2 %v1348_v61, %s3112_s8  ;;  %v1360_v35 = vsel %vm830_vm1, %v1358_v49, %v1359_v42  ;;  %v3908_v61 = vpack.c.b16 %v1053_v31, %v1053_v31  ;;  %v1199_v49 = vshll.u32 %v3916_v60, 16  ;;  %v2217_v31 = vunpack.c.l.b16 %v2203_v58 }
  0xf6   : > { %1273 = vrot.lane.b32.xlu1 %v1142_v26, %s3111_s7 }
  0xf7   : > { %v1022_v59 = vpop.permute.xlu2 %1021  ;;  %1929 = vrot.lane.b32.xlu0 %v1896_v46, %s3115_s11  ;;  %v1240_v46 = vshrl.u32 %v3563_v47, 16  ;;  %v1201_v37 = vrot.slane %v1199_v49, 1 }
  0xf8   : > { %v3884_v16 = vsel %vm2001_vm4, %v2000_v10, %v1022_v59  ;;  %v1002_v9 = vpop.permute.xlu1 %1001  ;;  %v1568_v10 = vpack.c.b16 %v1552_v15, %v1552_v15  ;;  %v1244_v15 = vrot.slane %v1242_v40, 1 }
  0xf9   : > { %v3894_v17 = vsel %vm2001_vm4, %v3749_v36, %v1002_v9  ;;  %v1000_v43 = vpop.permute.xlu0 %999  ;;  %v1858_v36 = vrot.slane %v3000_v12, 1  ;;  %v3005_v12 = vld [vmem:[%s3197_s30 + $0xb4] sm:$0xe] }
  0xfa   : > { %v3900_v5 = vsel %vm2001_vm4, %v3641_v22, %v1000_v43  ;;  %v1859_v56 = vrot.slane %v1568_v10, 1  ;;  %v1603_v19 = vshll.u32 %v1568_v10, 16  ;;  %v3002_v22 = vld [vmem:[%s3197_s30 + $0x54] sm:$0xe]  ;;  %v1245_v42 = vor.u32 %v1244_v15, %v1240_v46  ;;  %v2559_v15 = vld [vmem:[%s3197_s30 + $0x2c] sm:$0x1] }
  0xfb   : > { %v3003_v47 = vor.u32 %v3002_v22, %v3850_v18  ;;  %v2220_v18 = vpack.c.b16 %v2217_v31, %v2217_v31 }
  0xfc   : > { %v1860_v26 = vsel %vm830_vm1, %v1858_v36, %v1859_v56  ;;  %v1605_v41 = vrot.slane %v1603_v19, 1  ;;  %v1871_v56 = vrot.slane %v3887_v39, 1 }
  0xfd   : > { %1513 = vrot.lane.b32.xlu2 %v3847_v24, %s3114_s10  ;;  %v1649_v24 = vor.u32 %v1648_v1, %v1644_v30  ;;  %v1197_v30 = vor.u32 %v1196_v55, %v1192_v28  ;;  %v3008_v1 = vld [vmem:[%s3197_s30 + $0x84] sm:$0xe]  ;;  %v1870_v36 = vrot.slane %v3003_v47, 1  ;;  %v2258_v19 = vsel %vm2256_vm5, %v2220_v18, 0 }
  0xfe   : > { %1505 = vrot.lane.b32.xlu1 %v3855_v57, %s3114_s10  ;;  %v1247_v57 = vshll.u32 %v3908_v61, 16  ;;  %v1606_v25 = vsel %vm557_vm0, %v1601_v52, %v1605_v41  ;;  %2877 = vmatpush.bf16.msra.mxu2 %v2258_v19  ;;  %v2801_v52 = vld [vmem:[%s3197_s30 + $0x90] sm:$0xff]   ;;  %v3009_v46 = vor.u32 %v3008_v1, %v3552_v45  ;;  %v1386_v28 = vrot.slane %v3908_v61, 1 }
  0xff   : > { %v3914_v14 = vpop.permute.xlu2 %1279  ;;  %1401 = vrot.lane.b32.xlu0 %v1360_v35, %s3112_s8  ;;  %v1654_v4 = vsel %vm557_vm0, %v1649_v24, %v1653_v32  ;;  %2878 = vmatpush.bf16.msra.mxu3 %v2258_v19  ;;  %v1202_v39 = vsel %vm557_vm0, %v1197_v30, %v1201_v37  ;;  %v3006_v24 = vor.u32 %v3005_v12, %v3566_v54  ;;  %v1561_v32 = vunpack.c.l.b16 %v2631_v27 }
 0x100   : > { %v3919_v53 = vpop.permute.xlu1 %1007  ;;  %v1249_v10 = vrot.slane %v1247_v57, 1  ;;  %2265 = vmatpush.bf16.msra.mxu0 %v2258_v19  ;;  %2876 = vmatpush.bf16.msra.mxu1 %v2258_v19  ;;  %v1706_v57 = vshll.u32 %v2801_v52, 16  ;;  %v1252_v45 = vshrl.u32 %v3588_v6, 16  ;;  %v1373_v58 = vrot.slane %v3009_v46, 1  ;;  %v2873_v19 = vld [vmem:[%s3197_s30 + $0xc0] sm:$0xf0] }
 0x101   : > { %v1006_v59 = vpop.permute.xlu0 %1005  ;;  %v3972_v55 = vpack.c.b16 %v1561_v32, %v1561_v32  ;;  %v1098_v18 = vshll.u32 %v3500_v29, 16  ;;  %v1096_v32 = vshrl.u32 %v3500_v29, 16  ;;  %v2563_v46 = vld [vmem:[%s3197_s30 + $0x5c] sm:$0x1]  ;;  %v2623_v29 = vld [vmem:[%s3197_s30 + $0x38] sm:$0x1] }
 0x102   : > { %v3927_v9 = vsel %vm2001_vm4, %v3660_v34, %v1006_v59  ;;  %v2635_v34 = vld [vmem:[%s3197_s30 + $0xc8] sm:$0x1]  ;;  %v1250_v35 = vsel %vm557_vm0, %v1245_v42, %v1249_v10  ;;  %v1385_v59 = vrot.slane %v3006_v24, 1  ;;  %v1041_v42 = vunpack.c.l.b16 %v2559_v15  ;;  %v3011_v15 = vld [vmem:[%s3197_s30 + $0x54] sm:$0xe] }
 0x103   : > { %v1565_v2 = vunpack.c.l.b16 %v2635_v34  ;;  %v1704_v34 = vshrl.u32 %v2801_v52, 16  ;;  %v1708_v30 = vrot.slane %v1706_v57, 1  ;;  %v1711_v37 = vshll.u32 %v3972_v55, 16 }
 0x104   : > { %v1387_v1 = vsel %vm830_vm1, %v1385_v59, %v1386_v28 }
 0x105   : > { %1905 = vrot.lane.b32.xlu2 %v1860_v26, %s3115_s11  ;;  %v1254_v26 = vshll.u32 %v3588_v6, 16  ;;  %v3963_v41 = vpack.c.b16 %v1565_v2, %v1565_v2  ;;  %v1713_v2 = vrot.slane %v1711_v37, 1 }
 0x106   : > { %1785 = vrot.lane.b32.xlu1 %v1654_v4, %s3113_s9  ;;  %v2682_v4 = vld [vmem:[%s4441_s1] sm:$0xff] }
 0x107   : > { %v3940_v43 = vpop.permute.xlu2 %1415  ;;  %1777 = vrot.lane.b32.xlu0 %v1606_v25, %s3113_s9  ;;  %v1256_v49 = vrot.slane %v1254_v26, 1  ;;  %v1759_v12 = vshll.u32 %v3963_v41, 16  ;;  %v1374_v25 = vrot.slane %v3916_v60, 1 }
 0x108   : > { %v1014_v7 = vpop.permute.xlu1 %1013 }
 0x109   : > { %v3948_v40 = vsel %vm2001_vm4, %v3813_v20, %v1014_v7  ;;  %v1012_v22 = vpop.permute.xlu0 %1011  ;;  %v2683_v20 = vld [vmem:[%s4441_s1 + $0x8] sm:$0xff]  ;;  %v1761_v60 = vrot.slane %v1759_v12, 1  ;;  %v3996_v7 = vpack.c.b16 %v1041_v42, %v1041_v42 }
 0x10a   : > { %v3953_v21 = vsel %vm2001_vm4, %v3686_v23, %v1012_v22  ;;  %v1872_v23 = vsel %vm830_vm1, %v1870_v36, %v1871_v56  ;;  %2880 = vmatpush.bf16.msra.mxu2 %v2683_v20  ;;  %2881 = vmatpush.bf16.msra.mxu3 %v2683_v20  ;;  %v1709_v56 = vor.u32 %v1708_v30, %v1704_v34  ;;  %v2874_v22 = vld [vmem:[%s3197_s30 + $0xc0] sm:$0xe]  ;;  %v1553_v34 = vunpack.c.l.b16 %v2623_v29 }
 0x10b   : > { %2266 = vmatpush.bf16.msra.mxu0 %v2683_v20  ;;  %2879 = vmatpush.bf16.msra.mxu1 %v2683_v20  ;;  %v1100_v20 = vrot.slane %v1098_v18, 1  ;;  %v1103_v26 = vshll.u32 %v3996_v7, 16  ;;  %v2875_v59 = vor.u32 %v2874_v22, %v2873_v19  ;;  %v1146_v30 = vshll.u32 %v3511_v3, 16  ;;  %v4033_v18 = vld [vmem:[%s3197_s30 + $0x30] sm:$0xff]  }
 0x10c   : > { %v1714_v57 = vsel %vm557_vm0, %v1709_v56, %v1713_v2  ;;  %v4453_v56 = vld [vmem:[#allocation8_spill] sm:$0xff]  ;;  %v1144_v22 = vshrl.u32 %v3511_v3, 16 }
 0x10d   : > { %1291 = vrot.lane.b32.xlu2 %v1250_v35, %s3111_s7  ;;  %v1897_v12 = vrot.slane %v2875_v59, 1 }
 0x10e   : > { %1283 = vrot.lane.b32.xlu1 %v1202_v39, %s3111_s7  ;;  %2883 = vmatpush.bf16.msra.mxu2 %v2682_v4  ;;  %v2867_v39 = vld [vmem:[%s3197_s30 + $0x90] sm:$0xf0] }
 0x10f   : > { %v3968_v54 = vpop.permute.xlu2 %1791  ;;  %1913 = vrot.lane.b32.xlu0 %v1872_v23, %s3115_s11  ;;  %2884 = vmatpush.bf16.msra.mxu3 %v2682_v4 }
 0x110   : > { %v1020_v47 = vpop.permute.xlu1 %1019  ;;  %2267 = vmatpush.bf16.msra.mxu0 %v2682_v4  ;;  %2882 = vmatpush.bf16.msra.mxu1 %v2682_v4  ;;  %v3014_v4 = vld [vmem:[%s3197_s30 + $0x24] sm:$0xe] }
 0x111   : > { %v3982_v61 = vsel %vm2001_vm4, %v3840_v48, %v1020_v47  ;;  %v1018_v10 = vpop.permute.xlu0 %1017  ;;  %v3991_v48 = vor.u32 %v1256_v49, %v1252_v45  ;;  %v1105_v45 = vrot.slane %v1103_v26, 1  ;;  %v1045_v49 = vunpack.c.l.b16 %v2563_v46 }
 0x112   : > { %v3987_v31 = vsel %vm2001_vm4, %v3710_v0, %v1018_v10  ;;  %v1375_v0 = vsel %vm830_vm1, %v1373_v58, %v1374_v25  ;;  %v1898_v58 = vrot.slane %v3963_v41, 1  ;;  %v1886_v10 = vrot.slane %v3972_v55, 1 }
 0x113   : > { %v1762_v35 = vsel %vm557_vm0, %v3991_v48, %v1761_v60  ;;  %v1061_v37 = vpack.c.b16 %v1045_v49, %v1045_v49  ;;  %v3012_v60 = vor.u32 %v3011_v15, %v3514_v38  ;;  %v3015_v2 = vor.u32 %v3014_v4, %v4453_v56  ;;  %v2572_v56 = vld [vmem:[%s3197_s30 + $0xc8] sm:$0x1] }
 0x114   : > { %v1899_v41 = vsel %vm830_vm1, %v1897_v12, %v1898_v58  ;;  %v1148_v38 = vrot.slane %v1146_v30, 1  ;;  %v1350_v26 = vrot.slane %v3996_v7, 1  ;;  %v1608_v15 = vshrl.u32 %v4033_v18, 16  ;;  %v2799_v58 = vld [vmem:[%s3197_s30 + $0x60] sm:$0xff]  }
 0x115   : > { %1523 = vrot.lane.b32.xlu2 %v2801_v52, %s3114_s10  ;;  %v2868_v52 = vld [vmem:[%s3197_s30 + $0x90] sm:$0xe]  ;;  %v1362_v55 = vrot.slane %v1061_v37, 1  ;;  %v1361_v19 = vrot.slane %v3012_v60, 1  ;;  %v1658_v30 = vshll.u32 %v2799_v58, 16 }
 0x116   : > { %1419 = vrot.lane.b32.xlu1 %v1387_v1, %s3112_s8  ;;  %v2869_v28 = vor.u32 %v2868_v52, %v2867_v39  ;;  %v1151_v39 = vshll.u32 %v1061_v37, 16  ;;  %v2019_v52 = vsel %vm2001_vm4, %v3784_v63, %v3919_v53 }
 0x117   : > { %v3999_v36 = vpop.permute.xlu2 %1927  ;;  %1411 = vrot.lane.b32.xlu0 %v1375_v0, %s3112_s8  ;;  %v1363_v59 = vsel %vm830_vm1, %v1361_v19, %v1362_v55  ;;  %v2052_v63 = vsel %vm2034_vm6, %v2019_v52, %v3914_v14  ;;  %v1660_v52 = vrot.slane %v1658_v30, 1  ;;  %v4112_v30 = vld [vmem:[%s3197_s30 + $0x9c] sm:$0xff]  }
 0x118   : > { %v1266_v27 = vpop.permute.xlu1 %1265  ;;  %v1885_v42 = vrot.slane %v2869_v28, 1  ;;  %v1149_v28 = vor.u32 %v1148_v38, %v1144_v22  ;;  %v1153_v4 = vrot.slane %v1151_v39, 1  ;;  %v2568_v38 = vld [vmem:[%s3197_s30 + $0x98] sm:$0x1] }
 0x119   : > { %v4009_v24 = vsel %vm2034_vm6, %v3875_v44, %v1266_v27  ;;  %v4014_v23 = vpop.permute.xlu0 %1263  ;;  %v1101_v44 = vor.u32 %v1100_v20, %v1096_v32  ;;  %v4039_v27 = vpack.c.b16 %v1553_v34, %v1553_v34  ;;  %v1349_v20 = vrot.slane %v3015_v2, 1 }
 0x11a   : > { %v1154_v14 = vsel %vm557_vm0, %v1149_v28, %v1153_v4  ;;  %v2843_v28 = vld [vmem:[%s3197_s30 + $0x90] sm:$0xf0]  ;;  %v2844_v4 = vld [vmem:[%s3197_s30 + $0x90] sm:$0xe] }
 0x11b   : > { %v1106_v1 = vsel %vm557_vm0, %v1101_v44, %v1105_v45  ;;  %v2627_v44 = vld [vmem:[%s3197_s30 + $0x68] sm:$0x1]  ;;  %v1351_v53 = vsel %vm830_vm1, %v1349_v20, %v1350_v26  ;;  %v2027_v45 = vsel %vm2001_vm4, %v3805_v50, %v3859_v8  ;;  %v2861_v8 = vld [vmem:[%s3197_s30 + $0x60] sm:$0xf0]  ;;  %v1054_v20 = vunpack.c.l.b16 %v2572_v56  ;;  %v2850_v56 = vld [vmem:[%s3197_s30 + $0xc0] sm:$0xe] }
 0x11d   : > { %1803 = vrot.lane.b32.xlu2 %v1762_v35, %s3113_s9  ;;  %v1610_v35 = vshll.u32 %v4033_v18, 16 }
 0x11e   : > { %1795 = vrot.lane.b32.xlu1 %v1714_v57, %s3113_s9  ;;  %v1615_v57 = vshll.u32 %v4039_v27, 16 }
 0x11f   : > { %v4023_v47 = vpop.permute.xlu2 %1399  ;;  %1531 = vrot.lane.b32.xlu0 %v3588_v6, %s3114_s10  ;;  %v1887_v6 = vsel %vm830_vm1, %v1885_v42, %v1886_v10  ;;  %v1612_v3 = vrot.slane %v1610_v35, 1  ;;  %v1557_v10 = vunpack.c.l.b16 %v2627_v44  ;;  %v4096_v44 = vpack.c.b16 %v1054_v20, %v1054_v20 }
 0x120   : > { %v1408_v25 = vpop.permute.xlu1 %1407  ;;  %v1617_v12 = vrot.slane %v1615_v57, 1  ;;  %v1050_v57 = vunpack.c.l.b16 %v2568_v38  ;;  %v2632_v38 = vld [vmem:[%s3197_s30 + $0xa4] sm:$0x1] }
 0x121   : > { %v1288_v0 = vpop.permute.xlu0 %1287  ;;  %v2085_v49 = vsel %vm2067_vm7, %v2052_v63, %v1408_v25  ;;  %v1613_v29 = vor.u32 %v1612_v3, %v1608_v15  ;;  %v2862_v25 = vld [vmem:[%s3197_s30 + $0x60] sm:$0xe]  ;;  %v1573_v55 = vpack.c.b16 %v1557_v10, %v1557_v10 }
 0x122   : > { %v2060_v34 = vsel %vm2034_vm6, %v2027_v45, %v1288_v0  ;;  %v2856_v0 = vld [vmem:[%s3197_s30 + $0x30] sm:$0xe]  ;;  %v2863_v35 = vor.u32 %v2862_v25, %v2861_v8 }
 0x123   : > { %v1618_v60 = vsel %vm557_vm0, %v1613_v29, %v1617_v12  ;;  %v2093_v2 = vsel %vm2067_vm7, %v2060_v34, %v3940_v43  ;;  %v1656_v43 = vshrl.u32 %v2799_v58, 16  ;;  %v1874_v15 = vrot.slane %v1573_v55, 1 }
 0x124   : > { %v1663_v3 = vshll.u32 %v1573_v55, 16  ;;  %v1066_v29 = vpack.c.b16 %v1050_v57, %v1050_v57  ;;  %v2845_v12 = vor.u32 %v2844_v4, %v2843_v28 }
 0x125   : > { %1267 = vrot.lane.b32.xlu2 %v1106_v1, %s3111_s7  ;;  %v1661_v63 = vor.u32 %v1660_v52, %v1656_v43  ;;  %v4454_v52 = vld [vmem:[#allocation7_spill] sm:$0xff] }
 0x126   : > { %1931 = vrot.lane.b32.xlu1 %v1899_v41, %s3115_s11  ;;  %v2855_v41 = vld [vmem:[%s3197_s30 + $0x30] sm:$0xf0]  ;;  %v1376_v34 = vrot.slane %v2845_v12, 1  ;;  %v1377_v8 = vrot.slane %v1066_v29, 1  ;;  %v1211_v25 = vshll.u32 %v1066_v29, 16 }
 0x127   : > { %v4044_v32 = vpop.permute.xlu2 %1775  ;;  %1923 = vrot.lane.b32.xlu0 %v1887_v6, %s3115_s11  ;;  %v2857_v39 = vor.u32 %v2856_v0, %v2855_v41  ;;  %v2849_v0 = vld [vmem:[%s3197_s30 + $0xc0] sm:$0xf0] }
 0x128   : > { %v1528_v46 = vpop.permute.xlu1 %1527  ;;  %v1213_v55 = vrot.slane %v1211_v25, 1 }
 0x129   : > { %v1520_v7 = vpop.permute.xlu0 %1519  ;;  %v2126_v19 = vsel %vm2100_vm8, %v2093_v2, %v1528_v46  ;;  %v1873_v46 = vrot.slane %v2863_v35, 1  ;;  %v2636_v2 = vld [vmem:[%s3197_s30 + $0xd4] sm:$0x1]  ;;  %v3017_v35 = vld [vmem:[%s3197_s30 + $0x9c] sm:$0xe] }
 0x12a   : > { %v2118_v42 = vsel %vm2100_vm8, %v2085_v49, %v1520_v7  ;;  %v1861_v7 = vrot.slane %v2857_v39, 1  ;;  %v1665_v49 = vrot.slane %v1663_v3, 1  ;;  %v2851_v39 = vor.u32 %v2850_v56, %v2849_v0 }
 0x12b   : > { %v2151_v37 = vsel %vm2133_vm9, %v2118_v42, %v3968_v54  ;;  %v1875_v45 = vsel %vm830_vm1, %v1873_v46, %v1874_v15  ;;  %v1566_v20 = vunpack.c.l.b16 %v2636_v2  ;;  %v1214_v46 = vsel %vm557_vm0, %v4454_v52, %v1213_v55  ;;  %v3020_v2 = vld [vmem:[%s3197_s30 + $0xcc] sm:$0xe] }
 0x12c   : > { %v1666_v10 = vsel %vm557_vm0, %v1661_v63, %v1665_v49  ;;  %v1562_v15 = vunpack.c.l.b16 %v2632_v38  ;;  %v1388_v57 = vrot.slane %v2851_v39, 1 }
 0x12d   : > { %1403 = vrot.lane.b32.xlu2 %v1363_v59, %s3112_s8  ;;  %v4142_v28 = vpack.c.b16 %v1566_v20, %v1566_v20 }
 0x12e   : > { %1395 = vrot.lane.b32.xlu1 %v1351_v53, %s3112_s8  ;;  %v1578_v29 = vpack.c.b16 %v1562_v15, %v1562_v15 }
 0x12f   : > { %v4068_v50 = vpop.permute.xlu2 %1911  ;;  %1275 = vrot.lane.b32.xlu0 %v1154_v14, %s3111_s7  ;;  %v4105_v14 = vld [vmem:[%s3197_s30 + $0xcc] sm:$0xff]  }
 0x130   : > { %v1920_v1 = vpop.permute.xlu1 %1919  ;;  %v1766_v3 = vshll.u32 %v4105_v14, 16  ;;  %v1723_v0 = vshll.u32 %v1578_v29, 16 }
 0x131   : > { %v2184_v6 = vsel %vm2166_vm10, %v2151_v37, %v1920_v1  ;;  %v1800_v22 = vpop.permute.xlu0 %1799  ;;  %v3016_v1 = vld [vmem:[%s3197_s30 + $0x9c] sm:$0xf0] }
 0x132   : > { %2669 = vmatmul.msk.bf16.vlgmr.msra.gmra.mxu2 %vm2223_vm11, %v2184_v6  ;;  %v2159_v54 = vsel %vm2133_vm9, %v2126_v19, %v1800_v22  ;;  %v1378_v6 = vsel %vm830_vm1, %v1376_v34, %v1377_v8  ;;  %v2036_v19 = vsel %vm2034_vm6, %v3733_v11, %v4014_v23  ;;  %v2564_v23 = vld [vmem:[%s3197_s30 + $0x68] sm:$0x1]  ;;  %v3018_v63 = vor.u32 %v3017_v35, %v3016_v1 }
 0x133   : > { %v2192_v26 = vsel %vm2166_vm10, %v2159_v54, %v3999_v36  ;;  %v1862_v36 = vrot.slane %v4039_v27, 1  ;;  %v1259_v27 = vshll.u32 %v4096_v44, 16  ;;  %v1046_v12 = vunpack.c.l.b16 %v2564_v23  ;;  %v2838_v23 = vld [vmem:[%s3197_s30 + $0x60] sm:$0xe] }
 0x134   : > { %2673 = vmatmul.msk.bf16.vlgmr.msra.gmra.mxu3 %vm2223_vm11, %v2192_v26  ;;  %v1888_v25 = vrot.slane %v3018_v63, 1  ;;  %v1889_v1 = vrot.slane %v1578_v29, 1  ;;  %v2831_v29 = vld [vmem:[%s3197_s30 + $0x30] sm:$0xf0] }
 0x135   : > { %1779 = vrot.lane.b32.xlu2 %v1618_v60, %s3113_s9  ;;  %v1863_v42 = vsel %vm830_vm1, %v1861_v7, %v1862_v36  ;;  %v1261_v60 = vrot.slane %v1259_v27, 1  ;;  %v1718_v36 = vshll.u32 %v4112_v30, 16  ;;  %v1062_v56 = vpack.c.b16 %v1046_v12, %v1046_v12  ;;  %v2832_v12 = vld [vmem:[%s3197_s30 + $0x30] sm:$0xe] }
 0x136   : > { %1515 = vrot.lane.b32.xlu1 %v2799_v58, %s3114_s10  ;;  %v1890_v35 = vsel %vm830_vm1, %v1888_v25, %v1889_v1 }
 0x137   : > { %v4091_v59 = vpop.permute.xlu2 %1409  ;;  %1507 = vrot.lane.b32.xlu0 %v4033_v18, %s3114_s10  ;;  %v4108_v18 = vld [vmem:[%s3197_s30 + $0xcc] sm:$0xf0]  ;;  %v1262_v54 = vsel %vm557_vm0, %v3991_v48, %v1261_v60  ;;  %v1716_v60 = vshrl.u32 %v4112_v30, 16  ;;  %v1163_v38 = vshll.u32 %v1062_v56, 16 }
 0x138   : > { %v1392_v53 = vpop.permute.xlu1 %1391  ;;  %v3021_v15 = vor.u32 %v3020_v2, %v4108_v18  ;;  %v1901_v18 = vrot.slane %v4142_v28, 1 }
 0x139   : > { %v1272_v58 = vpop.permute.xlu0 %1271  ;;  %v2069_v26 = vsel %vm2067_vm7, %v2036_v19, %v1392_v53  ;;  %v2560_v53 = vld [vmem:[%s3197_s30 + $0x38] sm:$0x1] }
 0x13a   : > { %v2044_v11 = vsel %vm2034_vm6, %v3900_v5, %v1272_v58  ;;  %v1389_v5 = vrot.slane %v4096_v44, 1  ;;  %v1768_v44 = vrot.slane %v1766_v3, 1  ;;  %v1042_v34 = vunpack.c.l.b16 %v2560_v53 }
 0x13b   : > { %v1900_v53 = vrot.slane %v3021_v15, 1 }
 0x13c   : > { %v1390_v8 = vsel %vm830_vm1, %v1388_v57, %v1389_v5  ;;  %v4191_v57 = vld [vmem:[%s3197_s30 + $0x6c] sm:$0xff]  }
 0x13d   : > { %1915 = vrot.lane.b32.xlu2 %v1875_v45, %s3115_s11  ;;  %v2077_v45 = vsel %vm2067_vm7, %v2044_v11, %v4023_v47  ;;  %v2837_v11 = vld [vmem:[%s3197_s30 + $0x60] sm:$0xf0]  ;;  %v4455_v5 = vld [vmem:[#allocation6_spill] sm:$0xff] }
 0x13e   : > { %1907 = vrot.lane.b32.xlu1 %v1863_v42, %s3115_s11 }
 0x13f   : > { %v4116_v37 = vpop.permute.xlu2 %1529  ;;  %1787 = vrot.lane.b32.xlu0 %v1666_v10, %s3113_s9  ;;  %v1771_v10 = vshll.u32 %v4142_v28, 16 }
 0x140   : > { %v1512_v41 = vpop.permute.xlu1 %1511 }
 0x141   : > { %v1504_v22 = vpop.permute.xlu0 %1503  ;;  %v2110_v58 = vsel %vm2100_vm8, %v2077_v45, %v1512_v41  ;;  %v1720_v41 = vrot.slane %v1718_v36, 1  ;;  %v2624_v36 = vld [vmem:[%s3197_s30 + $0x44] sm:$0x1]  ;;  %v2839_v45 = vor.u32 %v2838_v23, %v2837_v11 }
 0x142   : > { %v2102_v43 = vsel %vm2100_vm8, %v2069_v26, %v1504_v22  ;;  %v4180_v26 = vld [vmem:[%s3197_s30 + $0x3c] sm:$0xff]  }
 0x143   : > { %v2135_v7 = vsel %vm2133_vm9, %v2102_v43, %v4044_v32  ;;  %v1764_v32 = vshrl.u32 %v4105_v14, 16  ;;  %v1721_v22 = vor.u32 %v1720_v41, %v1716_v60  ;;  %v4183_v43 = vld [vmem:[%s3197_s30 + $0x3c] sm:$0xf0]  ;;  %v1622_v60 = vshll.u32 %v4180_v26, 16 }
 0x145   : > { %1413 = vrot.lane.b32.xlu2 %v1378_v6, %s3112_s8  ;;  %v1773_v6 = vrot.slane %v1771_v10, 1  ;;  %v1902_v10 = vsel %vm830_vm1, %v1900_v53, %v1901_v18 }
 0x146   : > { %1293 = vrot.lane.b32.xlu1 %v1262_v54, %s3111_s7 }
 0x147   : > { %v4139_v48 = vpop.permute.xlu2 %1921  ;;  %1285 = vrot.lane.b32.xlu0 %v1214_v46, %s3111_s7  ;;  %v1165_v46 = vrot.slane %v1163_v38, 1  ;;  %v1620_v38 = vshrl.u32 %v4180_v26, 16 }
 0x148   : > { %v1904_v4 = vpop.permute.xlu1 %1903 }
 0x149   : > { %v2168_v49 = vsel %vm2166_vm10, %v2135_v7, %v1904_v4  ;;  %v1784_v42 = vpop.permute.xlu0 %1783  ;;  %v4194_v4 = vld [vmem:[%s3197_s30 + $0x6c] sm:$0xf0]  ;;  %v1166_v63 = vsel %vm557_vm0, %v4455_v5, %v1165_v46 }
 0x14a   : > { %2661 = vmatmul.msk.bf16.vlgmr.msra.gmra.mxu0 %vm2223_vm11, %v2168_v49  ;;  %v2143_v27 = vsel %vm2133_vm9, %v2110_v58, %v1784_v42  ;;  %v4456_v42 = vld [vmem:[#allocation5_spill] sm:$0xff] }
 0x14b   : > { %v2176_v47 = vsel %vm2166_vm10, %v2143_v27, %v4068_v50  ;;  %v1769_v50 = vor.u32 %v1768_v44, %v1764_v32  ;;  %v1554_v27 = vunpack.c.l.b16 %v2624_v36  ;;  %v2628_v44 = vld [vmem:[%s3197_s30 + $0x74] sm:$0x1] }
 0x14c   : > { %2665 = vmatmul.msk.bf16.vlgmr.msra.gmra.mxu1 %vm2223_vm11, %v2176_v47  ;;  %v2833_v47 = vor.u32 %v2832_v12, %v2831_v29  ;;  %v1558_v25 = vunpack.c.l.b16 %v2628_v44 }
 0x14d   : > { %1533 = vrot.lane.b32.xlu2 %v4105_v14, %s3114_s10  ;;  %v4168_v14 = vpack.c.b16 %v1042_v34, %v1042_v34  ;;  %v1774_v39 = vsel %vm557_vm0, %v1769_v50, %v1773_v6  ;;  %v1364_v34 = vrot.slane %v2839_v45, 1  ;;  %v1570_v1 = vpack.c.b16 %v1554_v27, %v1554_v27 }
 0x14e   : > { %1525 = vrot.lane.b32.xlu1 %v4112_v30, %s3114_s10  ;;  %v1725_v30 = vrot.slane %v1723_v0, 1  ;;  %v1670_v0 = vshll.u32 %v4191_v57, 16  ;;  %v1352_v50 = vrot.slane %v2833_v47, 1 }
 0x14f   : > { %1421 = vrot.lane.b32.xlu0 %v1390_v8, %s3112_s8  ;;  %v4174_v19 = vpop.permute.xlu2 %1393  ;;  %v1115_v20 = vshll.u32 %v4168_v14, 16  ;;  %v1365_v8 = vrot.slane %v1062_v56, 1  ;;  %v1353_v6 = vrot.slane %v4168_v14, 1  ;;  %v1668_v14 = vshrl.u32 %v4191_v57, 16 }
 0x150   : > { %v4171_v55 = vpop.permute.xlu1 %1289  ;;  %v1726_v52 = vsel %vm557_vm0, %v1721_v22, %v1725_v30  ;;  %v1574_v22 = vpack.c.b16 %v1558_v25, %v1558_v25 }
 0x151   : > { %v1282_v54 = vpop.permute.xlu0 %1281  ;;  %v1117_v3 = vrot.slane %v1115_v20, 1  ;;  %v1366_v56 = vsel %vm830_vm1, %v1364_v34, %v1365_v8  ;;  %v2062_v15 = vsel %vm2034_vm6, %v3987_v31, %v4171_v55  ;;  %v1354_v23 = vsel %vm830_vm1, %v1352_v50, %v1353_v6 }
 0x152   : > { %v2054_v28 = vsel %vm2034_vm6, %v3826_v13, %v1282_v54  ;;  %v1624_v54 = vrot.slane %v1622_v60, 1  ;;  %v1675_v46 = vshll.u32 %v1574_v22, 16 }
 0x153   : > { %v1118_v32 = vsel %vm557_vm0, %v4456_v42, %v1117_v3  ;;  %v2087_v2 = vsel %vm2067_vm7, %v2054_v28, %v4091_v59  ;;  %v3023_v59 = vld [vmem:[%s3197_s30 + $0x6c] sm:$0xe]  ;;  %v2071_v28 = vsel %vm2067_vm7, %v4009_v24, %v4174_v19 }
 0x154   : > { %v1625_v36 = vor.u32 %v1624_v54, %v1620_v38  ;;  %v3024_v29 = vor.u32 %v3023_v59, %v4194_v4 }
 0x155   : > { %1925 = vrot.lane.b32.xlu2 %v1890_v35, %s3115_s11 }
 0x156   : > { %1805 = vrot.lane.b32.xlu1 %v1774_v39, %s3113_s9  ;;  %v1627_v39 = vshll.u32 %v1570_v1, 16  ;;  %v1876_v42 = vrot.slane %v3024_v29, 1 }
 0x157   : > { %1797 = vrot.lane.b32.xlu0 %v1726_v52, %s3113_s9  ;;  %v4203_v58 = vpop.permute.xlu2 %1513  ;;  %v1672_v52 = vrot.slane %v1670_v0, 1 }
 0x158   : > { %v1522_v7 = vpop.permute.xlu1 %1521  ;;  %v1629_v5 = vrot.slane %v1627_v39, 1 }
 0x159   : > { %v1418_v49 = vpop.permute.xlu0 %1417  ;;  %v2120_v13 = vsel %vm2100_vm8, %v2087_v2, %v1522_v7  ;;  %v1673_v7 = vor.u32 %v1672_v52, %v1668_v14 }
 0x15a   : > { %v2095_v3 = vsel %vm2067_vm7, %v2062_v15, %v1418_v49  ;;  %v1630_v49 = vsel %vm557_vm0, %v1625_v36, %v1629_v5 }
 0x15b   : > { %v2128_v31 = vsel %vm2100_vm8, %v2095_v3, %v4116_v37 }
 0x15d   : > { %1277 = vrot.lane.b32.xlu2 %v1166_v63, %s3111_s7 }
 0x15e   : > { %1269 = vrot.lane.b32.xlu1 %v1118_v32, %s3111_s7  ;;  %v1877_v32 = vrot.slane %v1574_v22, 1  ;;  %s2684_s7 = sshll.u32 %s3098_s15, 8  ;;  %s2382_s15 = scalar_lea.sflag [#allocation3], %s208_s28 }
 0x15f   : > { %1933 = vrot.lane.b32.xlu0 %v1902_v10, %s3115_s11  ;;  %v1906_v11 = vpop.permute.xlu2 %1905  ;;  %v1865_v10 = vrot.slane %v1570_v1, 1 }
 0x160   : > { %v1802_v41 = vpop.permute.xlu1 %1801  ;;  %v1878_v4 = vsel %vm830_vm1, %v1876_v42, %v1877_v32 }
 0x161   : > { %v1794_v35 = vpop.permute.xlu0 %1793  ;;  %v2161_v53 = vsel %vm2133_vm9, %v2128_v31, %v1802_v41 }
 0x162   : > { %v2153_v30 = vsel %vm2133_vm9, %v2120_v13, %v1794_v35 }
 0x163   : > { %v2186_v20 = vsel %vm2166_vm10, %v2153_v30, %v4139_v48  ;;  %v3026_v48 = vld [vmem:[%s3197_s30 + $0x3c] sm:$0xe] }
 0x164   : > { %2670 = vmatmul.msk.bf16.gmra.mxu2 %vm2223_vm11, %v2186_v20  ;;  %v3027_v12 = vor.u32 %v3026_v48, %v4183_v43 }
 0x165   : > { %1509 = vrot.lane.b32.xlu2 %v4180_v26, %s3114_s10  ;;  %v1677_v26 = vrot.slane %v1675_v46, 1 }
 0x166   : > { %1405 = vrot.lane.b32.xlu1 %v1366_v56, %s3112_s8  ;;  %v1864_v44 = vrot.slane %v3027_v12, 1 }
 0x167   : > { %1397 = vrot.lane.b32.xlu0 %v1354_v23, %s3112_s8  ;;  %v1678_v55 = vsel %vm557_vm0, %v1673_v7, %v1677_v26  ;;  %v1292_v37 = vpop.permute.xlu2 %1291 }
 0x168   : > { %v1274_v63 = vpop.permute.xlu1 %1273  ;;  %v1866_v47 = vsel %vm830_vm1, %v1864_v44, %v1865_v10  ;;  %v2064_v38 = vsel %vm2034_vm6, %v3982_v61, %v1292_v37 }
 0x169   : > { %v1930_v18 = vpop.permute.xlu0 %1929  ;;  %v2046_v41 = vsel %vm2034_vm6, %v3894_v17, %v1274_v63 }
 0x16a   : > { %v2194_v45 = vsel %vm2166_vm10, %v2161_v53, %v1930_v18 }
 0x16b   : > { %2674 = vmatmul.msk.bf16.gmra.mxu3 %vm2223_vm11, %v2194_v45 }
 0x16d   : > { %1789 = vrot.lane.b32.xlu2 %v1678_v55, %s3113_s9 }
 0x16e   : > { %1781 = vrot.lane.b32.xlu1 %v1630_v49, %s3113_s9 }
 0x16f   : > { %1517 = vrot.lane.b32.xlu0 %v4191_v57, %s3114_s10  ;;  %v1524_v8 = vpop.permute.xlu2 %1523  ;;  %s2396_s10 = scalar_lea.hbm %s4443_s3, %s2684_s7 }
 0x170   : > { %v1506_v27 = vpop.permute.xlu1 %1505  ;;  %s2399_s18 = sshll.u32 %s2396_s10, 4  ;;  %s2400_s18 = int_to_ptr.hbm [resolvable:$true] %s2399_s18 }
 0x171   : > { %v1402_v34 = vpop.permute.xlu0 %1401  ;;  %v2104_v57 = vsel %vm2100_vm8, %v2071_v28, %v1506_v27  ;;  %s3042_s19 = sshra.s32 %s2400_s18, 4  ;;  %s3043_s19 = int_to_ptr.hbm [resolvable:$true] %s3042_s19 }
 0x172   : > { %v2079_v0 = vsel %vm2067_vm7, %v2046_v41, %v1402_v34  ;;  %s3044_s21 = scalar_lea.hbm %s3043_s19, 256  ;;  %p3049_p1 = scmp.lt.s32.totalorder %s3043_s19, %s4443_s3 }
 0x173   : > { %v2112_v50 = vsel %vm2100_vm8, %v2079_v0, %v4203_v58  ;;  %p3045_p12 = scmp.ne.s32.totalorder %s3043_s19, %s3044_s21  ;;  %p3050_p2 = scmp.lt.s32.totalorder %s3048_s27, %s3044_s21 }
 0x175   : > { %p3046_p13 = pnand %p3045_p12, %p3177_p4  ;;  %p3051_p3 = por %p3050_p2, %p3049_p1 }
 0x176   : > { %1917 = vrot.lane.b32.xlu1 %v1878_v4, %s3115_s11 }
 0x177   : > { %1909 = vrot.lane.b32.xlu0 %v1866_v47, %s3115_s11  ;;  %v1804_v6 = vpop.permute.xlu2 %1803  ;;  %s2397_s11 = sshll.u32 %s4307_s6, 4  ;;  %p3047_p0 = pneg %p3046_p13  ;;  %s2398_s11 = int_to_ptr.vmem [resolvable:$true] %s2397_s11 }
 0x178   : > { %v1786_v43 = vpop.permute.xlu1 %1785 }
 0x179   : > { %v1778_v25 = vpop.permute.xlu0 %1777  ;;  %v2145_v24 = vsel %vm2133_vm9, %v2112_v50, %v1786_v43  ;;  %p3052_p5 = pnand %p3051_p3, %p3047_p0 }
 0x17a   : > { %v2137_v1 = vsel %vm2133_vm9, %v2104_v57, %v1778_v25 }
 0x17b   : > { %v2170_v60 = vsel %vm2166_vm10, %v2137_v1, %v1906_v11 }
 0x17c   : > { %2662 = vmatmul.msk.bf16.gmra.mxu0 %vm2223_vm11, %v2170_v60 }
 0x17f   : > { %v1268_v22 = vpop.permute.xlu2 %1267 }
 0x180   : > { %v1284_v2 = vpop.permute.xlu1 %1283  ;;  %v2040_v36 = vsel %vm2034_vm6, %v3866_v51, %v1268_v22  ;;  %v4301_v51 = vld [vmem:[%s4442_s2] ss:$0 sm:$0xff] }
 0x181   : > { %v1914_v19 = vpop.permute.xlu0 %1913  ;;  %v2056_v58 = vsel %vm2034_vm6, %v3953_v21, %v1284_v2 }
 0x182   : > { %v2178_v13 = vsel %vm2166_vm10, %v2145_v24, %v1914_v19 }
 0x183   : > { %2666 = vmatmul.msk.bf16.gmra.mxu1 %vm2223_vm11, %v2178_v13 }
 0x187   : > { %v1404_v59 = vpop.permute.xlu2 %1403 }
 0x188   : > { %v1420_v35 = vpop.permute.xlu1 %1419 }
 0x189   : > { %v1412_v56 = vpop.permute.xlu0 %1411  ;;  %v2097_v54 = vsel %vm2067_vm7, %v2064_v38, %v1420_v35 }
 0x18a   : > { %v2089_v20 = vsel %vm2067_vm7, %v2056_v58, %v1412_v56 }
 0x18b   : > { %v2122_v46 = vsel %vm2100_vm8, %v2089_v20, %v1524_v8 }
 0x18f   : > { %v1780_v3 = vpop.permute.xlu2 %1779 }
 0x190   : > { %v1796_v17 = vpop.permute.xlu1 %1795 }
 0x191   : > { %v1532_v30 = vpop.permute.xlu0 %1531  ;;  %v2155_v61 = vsel %vm2133_vm9, %v2122_v46, %v1796_v17 }
 0x192   : > { %v2130_v39 = vsel %vm2100_vm8, %v2097_v54, %v1532_v30 }
 0x193   : > { %v2163_v52 = vsel %vm2133_vm9, %v2130_v39, %v1804_v6 }
 0x197   : > { %v1916_v5 = vpop.permute.xlu2 %1915 }
 0x198   : > { %v1932_v14 = vpop.permute.xlu1 %1931 }
 0x199   : > { %v2196_v15 = vsel %vm2166_vm10, %v2163_v52, %v1932_v14  ;;  %v1924_v11 = vpop.permute.xlu0 %1923 }
 0x19a   : > { %2675 = vmatmul.msk.bf16.gmra.mxu3 %vm2223_vm11, %v2196_v15  ;;  %v2188_v21 = vsel %vm2166_vm10, %v2155_v61, %v1924_v11 }
 0x19b   : > { %2671 = vmatmul.msk.bf16.gmra.mxu2 %vm2223_vm11, %v2188_v21 }
 0x19f   : > { %v1414_v42 = vpop.permute.xlu2 %1413 }
 0x1a0   : > { %v1396_v23 = vpop.permute.xlu1 %1395 }
 0x1a1   : > { %v1276_v48 = vpop.permute.xlu0 %1275  ;;  %v2073_v63 = vsel %vm2067_vm7, %v2040_v36, %v1396_v23 }
 0x1a2   : > { %v2048_v55 = vsel %vm2034_vm6, %v3793_v33, %v1276_v48 }
 0x1a3   : > { %v2081_v45 = vsel %vm2067_vm7, %v2048_v55, %v1404_v59 }
 0x1a7   : > { %v1534_v28 = vpop.permute.xlu2 %1533 }
 0x1a8   : > { %v1516_v7 = vpop.permute.xlu1 %1515 }
 0x1a9   : > { %v1508_v26 = vpop.permute.xlu0 %1507  ;;  %v2114_v29 = vsel %vm2100_vm8, %v2081_v45, %v1516_v7 }
 0x1aa   : > { %v2106_v31 = vsel %vm2100_vm8, %v2073_v63, %v1508_v26 }
 0x1ab   : > { %v2139_v18 = vsel %vm2133_vm9, %v2106_v31, %v1780_v3 }
 0x1af   : > { %v1926_v50 = vpop.permute.xlu2 %1925 }
 0x1b0   : > { %v1908_v53 = vpop.permute.xlu1 %1907 }
 0x1b1   : > { %v2172_v49 = vsel %vm2166_vm10, %v2139_v18, %v1908_v53  ;;  %v1788_v12 = vpop.permute.xlu0 %1787 }
 0x1b2   : > { %2663 = vmatmul.msk.bf16.gmra.mxu0 %vm2223_vm11, %v2172_v49  ;;  %v2147_v33 = vsel %vm2133_vm9, %v2114_v29, %v1788_v12 }
 0x1b3   : > { %v2180_v37 = vsel %vm2166_vm10, %v2147_v33, %v1916_v5 }
 0x1b4   : > { %2667 = vmatmul.msk.bf16.gmra.mxu1 %vm2223_vm11, %v2180_v37 }
 0x1b5   : > { %v2309_v32 = vpop.f32.mrf.mxu2 }
 0x1b6   : > { %v2310_v27 = vadd.f32 %v4301_v51, %v2309_v32 }
 0x1b7   : > { %v2329_v44 = vpop.f32.mrf.mxu3  ;;  %v1278_v14 = vpop.permute.xlu2 %1277 }
 0x1b8   : > { %2365 = vst [vmem:[%s4307_s6 + $0x80] sm:$0xff] %v2310_v27  ;;  %v1294_v10 = vpop.permute.xlu1 %1293  ;;  %v2330_v34 = vadd.f32 %v4301_v51, %v2329_v44  ;;  %v2050_v23 = vsel %vm2034_vm6, %v3927_v9, %v1278_v14 }
 0x1b9   : > { %v1286_v4 = vpop.permute.xlu0 %1285 }
 0x1ba   : > { %2373 = vst [vmem:[%s4307_s6 + $0xc0] sm:$0xff] %v2330_v34  ;;  %v2058_v60 = vsel %vm2034_vm6, %v3948_v40, %v1286_v4  ;;  %v2066_v40 = vsel %vm2034_vm6, %v3884_v16, %v1294_v10 }
 0x1bb   : > { %v2091_v24 = vsel %vm2067_vm7, %v2058_v60, %v1414_v42 }
 0x1bd   : > { %v2311_v47 = vpop.f32.mrf.mxu2 }
 0x1be   : > { %v2312_v43 = vadd.f32 %v4301_v51, %v2311_v47 }
 0x1bf   : > { %v2331_v8 = vpop.f32.mrf.mxu3  ;;  %v1510_v61 = vpop.permute.xlu2 %1509 }
 0x1c0   : > { %2366 = vst [vmem:[%s4307_s6 + $0x88] sm:$0xff] %v2312_v43  ;;  %v1526_v57 = vpop.permute.xlu1 %1525  ;;  %v2332_v25 = vadd.f32 %v4301_v51, %v2331_v8 }
 0x1c1   : > { %v1422_v1 = vpop.permute.xlu0 %1421  ;;  %v2124_v19 = vsel %vm2100_vm8, %v2091_v24, %v1526_v57 }
 0x1c2   : > { %2374 = vst [vmem:[%s4307_s6 + $0xc8] sm:$0xff] %v2332_v25  ;;  %v2099_v17 = vsel %vm2067_vm7, %v2066_v40, %v1422_v1 }
 0x1c3   : > { %v2132_v58 = vsel %vm2100_vm8, %v2099_v17, %v1534_v28 }
 0x1c7   : > { %v2269_v41 = vpop.f32.mrf.mxu0  ;;  %v1790_v26 = vpop.permute.xlu2 %1789 }
 0x1c8   : > { %v2270_v0 = vadd.f32 %v4301_v51, %v2269_v41  ;;  %v1806_v2 = vpop.permute.xlu1 %1805 }
 0x1c9   : > { %v2289_v6 = vpop.f32.mrf.mxu1  ;;  %v1798_v13 = vpop.permute.xlu0 %1797  ;;  %v2165_v39 = vsel %vm2133_vm9, %v2132_v58, %v1806_v2 }
 0x1ca   : > { %2349 = vst [vmem:[%s4307_s6] sm:$0xff] %v2270_v0  ;;  %v2290_v35 = vadd.f32 %v4301_v51, %v2289_v6  ;;  %v2157_v56 = vsel %vm2133_vm9, %v2124_v19, %v1798_v13 }
 0x1cb   : > { %v2190_v22 = vsel %vm2166_vm10, %v2157_v56, %v1926_v50 }
 0x1cc   : > { %2357 = vst [vmem:[%s4307_s6 + $0x40] sm:$0xff] %v2290_v35  ;;  %2672 = vmatmul.msk.bf16.gmra.mxu2 %vm2223_vm11, %v2190_v22 }
 0x1cf   : > { %v2271_v30 = vpop.f32.mrf.mxu0 }
 0x1d0   : > { %v2272_v38 = vadd.f32 %v4301_v51, %v2271_v30  ;;  %v1270_v54 = vpop.permute.xlu1 %1269 }
 0x1d1   : > { %v2291_v20 = vpop.f32.mrf.mxu1  ;;  %v1934_v59 = vpop.permute.xlu0 %1933  ;;  %v2042_v48 = vsel %vm2034_vm6, %v3767_v62, %v1270_v54 }
 0x1d2   : > { %2350 = vst [vmem:[%s4307_s6 + $0x8] sm:$0xff] %v2272_v38  ;;  %v2292_v16 = vadd.f32 %v4301_v51, %v2291_v20  ;;  %v2198_v52 = vsel %vm2166_vm10, %v2165_v39, %v1934_v59 }
 0x1d3   : > { %2676 = vmatmul.msk.bf16.gmra.mxu3 %vm2223_vm11, %v2198_v52 }
 0x1d4   : > { %2358 = vst [vmem:[%s4307_s6 + $0x48] sm:$0xff] %v2292_v16 }
 0x1d8   : > { %v1406_v46 = vpop.permute.xlu1 %1405 }
 0x1d9   : > { %v1398_v15 = vpop.permute.xlu0 %1397  ;;  %v2083_v3 = vsel %vm2067_vm7, %v2050_v23, %v1406_v46 }
 0x1da   : > { %v2075_v36 = vsel %vm2067_vm7, %v2042_v48, %v1398_v15 }
 0x1db   : > { %v2108_v55 = vsel %vm2100_vm8, %v2075_v36, %v1510_v61 }
 0x1e0   : > { %v1782_v11 = vpop.permute.xlu1 %1781 }
 0x1e1   : > { %v1518_v21 = vpop.permute.xlu0 %1517  ;;  %v2141_v62 = vsel %vm2133_vm9, %v2108_v55, %v1782_v11 }
 0x1e2   : > { %v2116_v7 = vsel %vm2100_vm8, %v2083_v3, %v1518_v21 }
 0x1e3   : > { %v2149_v5 = vsel %vm2133_vm9, %v2116_v7, %v1790_v26 }
 0x1e7   : > { %v2314_v63 = vpop.f32.mrf.mxu2 }
 0x1e8   : > { %v1918_v31 = vpop.permute.xlu1 %1917  ;;  %v2315_v9 = vadd.f32 %v4301_v51, %v2314_v63 }
 0x1e9   : > { %v2182_v53 = vsel %vm2166_vm10, %v2149_v5, %v1918_v31  ;;  %v1910_v18 = vpop.permute.xlu0 %1909 }
 0x1ea   : > { %2668 = vmatmul.msk.bf16.gmra.mxu1 %vm2223_vm11, %v2182_v53  ;;  %2367 = vst [vmem:[%s4307_s6 + $0x90] sm:$0xff] %v2315_v9  ;;  %v2174_v45 = vsel %vm2166_vm10, %v2141_v62, %v1910_v18 }
 0x1eb   : > { %2664 = vmatmul.msk.bf16.gmra.mxu0 %vm2223_vm11, %v2174_v45 }
 0x1ee   : > { %v2334_v49 = vpop.f32.mrf.mxu3 }
 0x1ef   : > { %v2335_v29 = vadd.f32 %v4301_v51, %v2334_v49  ;;  %v2316_v12 = vpop.f32.mrf.mxu2 }
 0x1f0   : > { %v2317_v33 = vadd.f32 %v4301_v51, %v2316_v12 }
 0x1f1   : > { %2375 = vst [vmem:[%s4307_s6 + $0xd0] sm:$0xff] %v2335_v29 }
 0x1f2   : > { %2368 = vst [vmem:[%s4307_s6 + $0x98] sm:$0xff] %v2317_v33 }
 0x1f6   : > { %v2336_v37 = vpop.f32.mrf.mxu3 }
 0x1f7   : > { %v2337_v42 = vadd.f32 %v4301_v51, %v2336_v37 }
 0x1f9   : > { %2376 = vst [vmem:[%s4307_s6 + $0xd8] sm:$0xff] %v2337_v42  ;;  %v2274_v32 = vpop.f32.mrf.mxu0 }
 0x1fa   : > { %v2275_v27 = vadd.f32 %v4301_v51, %v2274_v32 }
 0x1fc   : > { %2351 = vst [vmem:[%s4307_s6 + $0x10] sm:$0xff] %v2275_v27 }
 0x200   : > { %v2294_v44 = vpop.f32.mrf.mxu1 }
 0x201   : > { %v2295_v10 = vadd.f32 %v4301_v51, %v2294_v44  ;;  %v2276_v34 = vpop.f32.mrf.mxu0 }
 0x202   : > { %v2277_v4 = vadd.f32 %v4301_v51, %v2276_v34 }
 0x203   : > { %2359 = vst [vmem:[%s4307_s6 + $0x50] sm:$0xff] %v2295_v10 }
 0x204   : > { %2352 = vst [vmem:[%s4307_s6 + $0x18] sm:$0xff] %v2277_v4 }
 0x208   : > { %v2296_v47 = vpop.f32.mrf.mxu1 }
 0x209   : > { %v2297_v43 = vadd.f32 %v4301_v51, %v2296_v47 }
 0x20b   : > { %2360 = vst [vmem:[%s4307_s6 + $0x58] sm:$0xff] %v2297_v43 }
 0x21d   : > { %v2339_v28 = vpop.f32.mrf.mxu3 }
 0x21e   : > { %v2340_v8 = vadd.f32 %v4301_v51, %v2339_v28  ;;  %v2319_v57 = vpop.f32.mrf.mxu2 }
 0x21f   : > { %v2320_v25 = vadd.f32 %v4301_v51, %v2319_v57 }
 0x220   : > { %2377 = vst [vmem:[%s4307_s6 + $0xe0] sm:$0xff] %v2340_v8 }
 0x221   : > { %2369 = vst [vmem:[%s4307_s6 + $0xa0] sm:$0xff] %v2320_v25 }
 0x225   : > { %v2341_v1 = vpop.f32.mrf.mxu3 }
 0x226   : > { %v2342_v60 = vadd.f32 %v4301_v51, %v2341_v1  ;;  %v2321_v41 = vpop.f32.mrf.mxu2 }
 0x227   : > { %v2322_v0 = vadd.f32 %v4301_v51, %v2321_v41 }
 0x228   : > { %2378 = vst [vmem:[%s4307_s6 + $0xe8] sm:$0xff] %v2342_v60 }
 0x229   : > { %2370 = vst [vmem:[%s4307_s6 + $0xa8] sm:$0xff] %v2322_v0 }
 0x22f   : > { %v2279_v2 = vpop.f32.mrf.mxu0 }
 0x230   : > { %v2280_v50 = vadd.f32 %v4301_v51, %v2279_v2 }
 0x231   : > { %v2299_v24 = vpop.f32.mrf.mxu1 }
 0x232   : > { %2353 = vst [vmem:[%s4307_s6 + $0x20] sm:$0xff] %v2280_v50  ;;  %v2300_v19 = vadd.f32 %v4301_v51, %v2299_v24 }
 0x234   : > { %2361 = vst [vmem:[%s4307_s6 + $0x60] sm:$0xff] %v2300_v19 }
 0x237   : > { %v2281_v6 = vpop.f32.mrf.mxu0 }
 0x238   : > { %v2282_v13 = vadd.f32 %v4301_v51, %v2281_v6 }
 0x239   : > { %v2301_v35 = vpop.f32.mrf.mxu1 }
 0x23a   : > { %2354 = vst [vmem:[%s4307_s6 + $0x28] sm:$0xff] %v2282_v13  ;;  %v2302_v56 = vadd.f32 %v4301_v51, %v2301_v35 }
 0x23c   : > { %2362 = vst [vmem:[%s4307_s6 + $0x68] sm:$0xff] %v2302_v56 }
 0x24f   : > { %v2324_v22 = vpop.f32.mrf.mxu2 }
 0x250   : > { %v2325_v40 = vadd.f32 %v4301_v51, %v2324_v22 }
 0x252   : > { %2371 = vst [vmem:[%s4307_s6 + $0xb0] sm:$0xff] %v2325_v40 }
 0x256   : > { %v2344_v17 = vpop.f32.mrf.mxu3 }
 0x257   : > { %v2345_v30 = vadd.f32 %v4301_v51, %v2344_v17  ;;  %v2326_v38 = vpop.f32.mrf.mxu2 }
 0x258   : > { %v2327_v54 = vadd.f32 %v4301_v51, %v2326_v38 }
 0x259   : > { %2379 = vst [vmem:[%s4307_s6 + $0xf0] sm:$0xff] %v2345_v30 }
 0x25a   : > { %2372 = vst [vmem:[%s4307_s6 + $0xb8] sm:$0xff] %v2327_v54 }
 0x25e   : > { %v2346_v58 = vpop.f32.mrf.mxu3 }
 0x25f   : > { %v2347_v39 = vadd.f32 %v4301_v51, %v2346_v58 }
 0x261   : > { %2380 = vst [vmem:[%s4307_s6 + $0xf8] sm:$0xff] %v2347_v39 }
 0x267   : > { %v2304_v20 = vpop.f32.mrf.mxu1 }
 0x268   : > { %v2305_v59 = vadd.f32 %v4301_v51, %v2304_v20  ;;  %v2284_v14 = vpop.f32.mrf.mxu0 }
 0x269   : > { %v2285_v16 = vadd.f32 %v4301_v51, %v2284_v14 }
 0x26a   : > { %2363 = vst [vmem:[%s4307_s6 + $0x70] sm:$0xff] %v2305_v59 }
 0x26b   : > { %2355 = vst [vmem:[%s4307_s6 + $0x30] sm:$0xff] %v2285_v16 }
 0x26f   : > { %v2306_v52 = vpop.f32.mrf.mxu1 }
 0x270   : > { %v2307_v46 = vadd.f32 %v4301_v51, %v2306_v52  ;;  %v2286_v15 = vpop.f32.mrf.mxu0 }
 0x271   : > { %v2287_v61 = vadd.f32 %v4301_v51, %v2286_v15 }
 0x272   : > { %2364 = vst [vmem:[%s4307_s6 + $0x78] sm:$0xff] %v2307_v46 }
 0x273   : > { %2356 = vst [vmem:[%s4307_s6 + $0x38] sm:$0xff] %v2287_v61 }
 0x274   : > { %3055 = shalt.err (!%p3052_p5)
}
 0x275   : > { %s3116_s28 = smov 128  }
 0x276   : > { %2886 = dma.vmem_to_hbm [thread:$0]  (%p3177_p4), %s2398_s11, 4096, %s2400_s18, %s2382_s15, %s3116_s28, %s3116_s28, %s3109_s5  }
 0x277 PF: > { %p2892_p6 = scmp.ge.s32.totalorder %s3106_s17, 2  ;;  %s2414_s4 = sand.u32 1, %s3086_s12  }
 0x278   : > { %s2415_s6 = scalar_lea.sflag [#allocation3], %s2414_s4 }
 0x279   : > { %p2889_p7 = pnand %p2892_p6, %p3184_p8 }
 0x27b   : > { %p2890_p9 = pneg %p2889_p7 }
 0x27d   : > { %3081 = dma.done.wait (%p2890_p9), %s2415_s6, 4096  }
 0x27e   : > { %3083 = vsyncadd (%p2890_p9), %s2415_s6, 4294963200  ;;  %s16_s17 = sadd.s32 1, %s3106_s17   ;;  %s4457_s12 = smov %s3090_s13 }
 0x27f   : > { %p13_p10 = scmp.ge.s32.totalorder %s16_s17, 4   ;;  %s4458_s13 = smov %s3094_s14 }
 0x280   : > { %s4459_s14 = smov %s3190_s25  ;;  %s4460_s15 = smov %s3102_s16 }
 0x281   : > { %s4461_s16 = smov %s4463_s20  ;;  %15 = sbr.rel (!%p13_p10) target bundleno = 4 (0x4), region = 76 }
 0x286   :  { %2421 = vsyncpa [#allocation3], 1 }
 0x287   :  { %2423 = vsyncpa [#allocation3 + $0x1], 1 }

// kernel: tpu_custom_call.1
= control target key start
LH: loop header
LB: loop body
LE: loop exit
PB: predicated region body
PF: predicated region fallthrough
CT: control target
= control target key end

     0   :  { %8 = vsyncpa [#allocation3], 0  ;;  %s4438_s0 = inlined_call_operand.vmem [shape: bf16[2,18,18,4], index: 0, kind: input, shape index: {}]   ;;  %s4439_s1 = inlined_call_operand.vmem [shape: bf16[36,128], index: 1, kind: input, shape index: {}]   ;;  %s4440_s2 = inlined_call_operand.vmem [shape: f32[1,128], index: 2, kind: input, shape index: {}]   ;;  %s4441_s3 = inlined_call_operand.hbm [shape: f32[2,256,128], index: 3, kind: output, shape index: {}]  }
   0x1   :  { %10 = vsyncpa [#allocation3 + $0x1], 0  ;;  %s3135_s12 = smov 0   ;;  %s3137_s13 = smov 0  }
   0x2   :  { %s3139_s14 = smov 0   ;;  %s3141_s15 = smov 0  }
   0x3   :  { %s3143_s16 = smov 0   ;;  %s3145_s17 = smov 0  }
   0x4 LB: > { %s2514_s18 = sadd.s32 4294967295, %s3104_s17   ;;  %s2515_s19 = sadd.s32 4294967294, %s3104_s17   ;;  %s3104_s17 = sphi %s3145_s17, %s16_s17   ;;  %s3100_s16 = sphi %s3143_s16, %s4459_s16   ;;  %s3096_s15 = sphi %s3141_s15, %s4458_s15   ;;  %s3092_s14 = sphi %s3139_s14, %s4457_s14   ;;  %s3088_s13 = sphi %s3137_s13, %s4456_s13   ;;  %s3084_s12 = sphi %s3135_s12, %s4455_s12  }
   0x5   : > { %s35_s20 = sadd.s32 1, %s3100_s16  ;;  %s124_s21 = sadd.s32 1, %s3092_s14 }
   0x6   : > { %p37_p0 = scmp.ge.s32.totalorder %s35_s20, 2  ;;  %p134_p1 = scmp.ne.s32.totalorder %s3092_s14, %s3088_s13 }
   0x7   : > { %p135_p2 = scmp.eq.s32.totalorder %s2514_s18, 1  ;;  %p140_p3 = scmp.ne.s32.totalorder %s3088_s13, %s3084_s12 }
   0x8   : > { %s4461_s20 = smov (%p37_p0, %s35_s20), 0  ;;  %p141_p5 = scmp.eq.s32.totalorder %s2515_s19, 1 }
   0x9   : > { %p3175_p4 = por %p135_p2, %p134_p1  ;;  %s117_s23 = ssub.s32 %s3100_s16, %s4461_s20 }
   0xa   : > { %p2520_p6 = scmp.ge.s32.totalorder %s3104_s17, 1  ;;  %p122_p7 = scmp.eq.s32.totalorder %s117_s23, 0 }
   0xb   : > { %p3182_p8 = por %p141_p5, %p140_p3  ;;  %p180_p9 = scmp.lt.s32.totalorder %s3104_s17, 3 }
   0xc   : > { %s3188_s25 = scalar_select %p122_p7, %s3092_s14, %s124_s21  }
   0xd   : > { %p181_p10 = pnand %p2520_p6, %p180_p9 }
   0xf   : > { %184 = sbr.rel (%p181_p10) target bundleno = 631 (0x277), region = 32 }
  0x14   : > { %p211_p11 = scmp.lt.s32.totalorder %s3096_s15, 1  ;;  %vm557_vm0 = vsmask.f32 7424  ;;  %s3106_s4 = smov 4   ;;  %vm830_vm1 = vcmask 1046528   ;;  %vm1935_vm2 = vcmask 31744  }
  0x15   : > { %s3107_s5 = smov 8   ;;  %s3108_s6 = smov 12   ;;  %vm1968_vm3 = vcmask 64512   ;;  %vm2001_vm4 = vcmask 97280   ;;  %vm2256_vm5 = vcmask 1041408   ;;  %vm2034_vm6 = vcmask 130048  }
  0x16   : > { %s212_s26 = scalar_select %p211_p11, %s3096_s15, 1  ;;  %vm2067_vm7 = vcmask 162816   ;;  %vm2100_vm8 = vcmask 195584   ;;  %vm2133_vm9 = vcmask 228352   ;;  %vm2166_vm10 = vcmask 261120  }
  0x17   : > { %s3109_s7 = smov 16   ;;  %s3110_s8 = smov 20   ;;  %vm2223_vm11 = vcmask 293888  }
  0x18   : > { %s2883_s27 = smul.u32 216, %s212_s26  ;;  %s3111_s9 = smov 28  }
  0x19   : > { %s3112_s10 = smov 24   ;;  %s3113_s11 = smov 32  }
  0x1a   : > { %s3195_s30 = scalar_lea.vmem %s4438_s0, %s2883_s27  ;;  %s208_s28 = sand.u32 1, %s3088_s13  }
  0x1b   : > { %v3198_v0 = vld [vmem:[%s3195_s30 + $0x30] sm:$0xff]   ;;  %v265_v1 = vld [vmem:[%s3195_s30 + $0x38] sm:$0x1]  ;;  %v263_v6 = vld [vmem:[%s3195_s30 + $0x20] sm:$0x1]  ;;  %s2521_s29 = sshll.u32 %s208_s28, 8 }
  0x1c   : > { %v3202_v2 = vld [vmem:[%s3195_s30 + $0x18] sm:$0xff]   ;;  %v529_v3 = vunpack.c.l.b16 %v265_v1  ;;  %v607_v4 = vshrl.u32 %v3198_v0, 16  ;;  %v609_v5 = vshll.u32 %v3198_v0, 16  ;;  %v2684_v8 = vld [vmem:[%s3195_s30] sm:$0xff]   ;;  %v527_v9 = vunpack.c.l.b16 %v263_v6  ;;  %v261_v11 = vld [vmem:[%s3195_s30 + $0x8] sm:$0x1] }
  0x1d   : > { %v583_v7 = vshrl.u32 %v3202_v2, 16  ;;  %v585_v10 = vshll.u32 %v3202_v2, 16  ;;  %v559_v12 = vshrl.u32 %v2684_v8, 16  ;;  %v561_v13 = vshll.u32 %v2684_v8, 16  ;;  %v3212_v14 = vld [vmem:[%s3195_s30 + $0x60] sm:$0xff]   ;;  %v3242_v42 = vld [vmem:[%s3195_s30 + $0x48] sm:$0xff]  }
  0x1e   : > { %v3214_v15 = vpack.c.b16 %v529_v3, %v529_v3  ;;  %v611_v16 = vrot.slane %v609_v5, 1  ;;  %v525_v17 = vunpack.c.l.b16 %v261_v11  ;;  %v269_v18 = vld [vmem:[%s3195_s30 + $0x68] sm:$0x1]  ;;  %v655_v19 = vshrl.u32 %v3212_v14, 16  ;;  %v264_v30 = vld [vmem:[%s3195_s30 + $0x2c] sm:$0x1] }
  0x1f   : > { %v3218_v20 = vpack.c.b16 %v527_v9, %v527_v9  ;;  %v587_v21 = vrot.slane %v585_v10, 1  ;;  %v563_v22 = vrot.slane %v561_v13, 1  ;;  %v533_v23 = vunpack.c.l.b16 %v269_v18  ;;  %v3221_v24 = vld [vmem:[%s3195_s30 + $0x24] sm:$0xff]   ;;  %v267_v35 = vld [vmem:[%s3195_s30 + $0x50] sm:$0x1]  ;;  %v3254_v50 = vld [vmem:[%s3195_s30 + $0x3c] sm:$0xff]  }
  0x20   : > { %v3224_v25 = vld [vmem:[%s3195_s30 + $0x24] sm:$0xf0]  ;;  %v3226_v26 = vor.u32 %v611_v16, %v607_v4  ;;  %v614_v27 = vshll.u32 %v3214_v15, 16  ;;  %v3229_v28 = vpack.c.b16 %v525_v17, %v525_v17  ;;  %v657_v29 = vshll.u32 %v3212_v14, 16  ;;  %v3257_v51 = vld [vmem:[%s3195_s30 + $0x3c] sm:$0xf0] }
  0x21   : > { %v3233_v31 = vor.u32 %v587_v21, %v583_v7  ;;  %v590_v32 = vshll.u32 %v3218_v20, 16  ;;  %v564_v33 = vor.u32 %v563_v22, %v559_v12  ;;  %v3236_v34 = vpack.c.b16 %v533_v23, %v533_v23  ;;  %v266_v56 = vld [vmem:[%s3195_s30 + $0x44] sm:$0x1]  ;;  %v3267_v57 = vld [vmem:[%s3195_s30 + $0x54] sm:$0xff]   ;;  %v268_v3 = vld [vmem:[%s3195_s30 + $0x5c] sm:$0x1] }
  0x22   : > { %4447 = vst [vmem:[#allocation5_spill] sm:$0xff] %v3226_v26  ;;  %v616_v36 = vrot.slane %v614_v27, 1  ;;  %v566_v37 = vshll.u32 %v3229_v28, 16  ;;  %v659_v38 = vrot.slane %v657_v29, 1  ;;  %v528_v41 = vunpack.c.l.b16 %v264_v30  ;;  %v3270_v58 = vld [vmem:[%s3195_s30 + $0x54] sm:$0xf0] }
  0x23   : > { %v592_v39 = vrot.slane %v590_v32, 1  ;;  %v662_v40 = vshll.u32 %v3236_v34, 16  ;;  %v531_v46 = vunpack.c.l.b16 %v267_v35  ;;  %v631_v54 = vshrl.u32 %v3242_v42, 16  ;;  %v3281_v4 = vld [vmem:[%s3195_s30 + $0xc] sm:$0xff]   ;;  %v262_v16 = vld [vmem:[%s3195_s30 + $0x14] sm:$0x1] }
  0x24   : > { %v617_v43 = vsel %vm557_vm0, %v3226_v26, %v616_v36  ;;  %v568_v44 = vrot.slane %v566_v37, 1  ;;  %v3246_v45 = vor.u32 %v659_v38, %v655_v19  ;;  %v3251_v49 = vpack.c.b16 %v528_v41, %v528_v41  ;;  %v3284_v5 = vld [vmem:[%s3195_s30 + $0xc] sm:$0xf0]  ;;  %v3296_v21 = vld [vmem:[%s3195_s30 + $0x84] sm:$0xff]   ;;  %v272_v36 = vld [vmem:[%s3195_s30 + $0x8c] sm:$0x1] }
  0x25   : > { %758 = vrot.lane.b32.xlu2 %v617_v43, %s3106_s4  ;;  %v593_v47 = vsel %vm557_vm0, %v3233_v31, %v592_v39  ;;  %v664_v48 = vrot.slane %v662_v40, 1  ;;  %v3261_v53 = vpack.c.b16 %v531_v46, %v531_v46  ;;  %v633_v55 = vshll.u32 %v3242_v42, 16  ;;  %v3299_v22 = vld [vmem:[%s3195_s30 + $0x84] sm:$0xf0]  ;;  %v271_v43 = vld [vmem:[%s3195_s30 + $0x80] sm:$0x1] }
  0x26   : > { %4448 = vst [vmem:[#allocation6_spill] sm:$0xff] %v3246_v45  ;;  %754 = vrot.lane.b32.xlu1 %v593_v47, %s3106_s4  ;;  %v569_v52 = vsel %vm557_vm0, %v564_v33, %v568_v44  ;;  %v595_v60 = vshrl.u32 %v3221_v24, 16  ;;  %v597_v61 = vshll.u32 %v3221_v24, 16  ;;  %v602_v62 = vshll.u32 %v3251_v49, 16  ;;  %s3046_s27 = scalar_lea.hbm %s4441_s3, 512 }
  0x27   : > { %750 = vrot.lane.b32.xlu0 %v569_v52, %s3106_s4  ;;  %v665_v59 = vsel %vm557_vm0, %v3246_v45, %v664_v48  ;;  %v635_v63 = vrot.slane %v633_v55, 1  ;;  %v638_v1 = vshll.u32 %v3261_v53, 16  ;;  %v530_v8 = vunpack.c.l.b16 %v266_v56  ;;  %v3320_v56 = vld [vmem:[%s3195_s30 + $0x78] sm:$0xff]   ;;  %v2958_v45 = vld [vmem:[%s3195_s30 + $0x24] sm:$0xe] }
  0x28   : > { %v599_v6 = vrot.slane %v597_v61, 1  ;;  %v604_v7 = vrot.slane %v602_v62, 1  ;;  %v532_v13 = vunpack.c.l.b16 %v268_v3  ;;  %v619_v18 = vshrl.u32 %v3254_v50, 16  ;;  %v270_v3 = vld [vmem:[%s3195_s30 + $0x74] sm:$0x1] }
  0x29   : > { %v3286_v9 = vor.u32 %v635_v63, %v631_v54  ;;  %v640_v10 = vrot.slane %v638_v1, 1  ;;  %v3288_v12 = vpack.c.b16 %v530_v8, %v530_v8  ;;  %v621_v19 = vshll.u32 %v3254_v50, 16  ;;  %v3326_v63 = vld [vmem:[%s3195_s30 + $0x6c] sm:$0xff]  }
  0x2a   : > { %v600_v11 = vor.u32 %v599_v6, %v595_v60  ;;  %v3304_v29 = vpack.c.b16 %v532_v13, %v532_v13  ;;  %v643_v32 = vshrl.u32 %v3267_v57, 16  ;;  %v645_v33 = vshll.u32 %v3267_v57, 16  ;;  %v3329_v1 = vld [vmem:[%s3195_s30 + $0x6c] sm:$0xf0] }
  0x2b   : > { %v641_v17 = vsel %vm557_vm0, %v3286_v9, %v640_v10  ;;  %v626_v27 = vshll.u32 %v3288_v12, 16  ;;  %v623_v30 = vrot.slane %v621_v19, 1  ;;  %v526_v35 = vunpack.c.l.b16 %v262_v16 }
  0x2c   : > { %v605_v23 = vsel %vm557_vm0, %v600_v11, %v604_v7  ;;  %v650_v38 = vshll.u32 %v3304_v29, 16  ;;  %v647_v40 = vrot.slane %v645_v33, 1  ;;  %v571_v46 = vshrl.u32 %v3281_v4, 16 }
  0x2d   : > { %766 = vrot.lane.b32.xlu2 %v665_v59, %s3106_s4  ;;  %v628_v37 = vrot.slane %v626_v27, 1  ;;  %v624_v39 = vor.u32 %v623_v30, %v619_v18  ;;  %v3312_v41 = vpack.c.b16 %v526_v35, %v526_v35  ;;  %v573_v47 = vshll.u32 %v3281_v4, 16  ;;  %v275_v18 = vld [vmem:[%s3195_s30 + $0xb0] sm:$0x1]  ;;  %v3343_v27 = vld [vmem:[%s3195_s30 + $0xa8] sm:$0xff]  }
  0x2e   : > { %756 = vrot.lane.b32.xlu1 %v605_v23, %s3106_s4  ;;  %v652_v44 = vrot.slane %v650_v38, 1  ;;  %v536_v48 = vunpack.c.l.b16 %v272_v36  ;;  %v648_v54 = vor.u32 %v647_v40, %v643_v32  ;;  %v535_v61 = vunpack.c.l.b16 %v271_v43  ;;  %v3354_v40 = vld [vmem:[%s3195_s30 + $0x9c] sm:$0xf0] }
  0x2f   : > { %762 = vrot.lane.b32.xlu0 %v641_v17, %s3106_s4  ;;  %v629_v52 = vsel %vm557_vm0, %v624_v39, %v628_v37  ;;  %v578_v55 = vshll.u32 %v3312_v41, 16  ;;  %v575_v59 = vrot.slane %v573_v47, 1  ;;  %v679_v62 = vshrl.u32 %v3320_v56, 16  ;;  %v3351_v39 = vld [vmem:[%s3195_s30 + $0x9c] sm:$0xff]  }
  0x30   : > { %v3322_v60 = vpack.c.b16 %v536_v48, %v536_v48  ;;  %v653_v6 = vsel %vm557_vm0, %v648_v54, %v652_v44  ;;  %v691_v8 = vshrl.u32 %v3296_v21, 16  ;;  %v693_v10 = vshll.u32 %v3296_v21, 16  ;;  %v274_v48 = vld [vmem:[%s3195_s30 + $0xa4] sm:$0x1] }
  0x31   : > { %v580_v7 = vrot.slane %v578_v55, 1  ;;  %v576_v11 = vor.u32 %v575_v59, %v571_v46  ;;  %v3337_v16 = vpack.c.b16 %v535_v61, %v535_v61  ;;  %v681_v17 = vshll.u32 %v3320_v56, 16  ;;  %v273_v61 = vld [vmem:[%s3195_s30 + $0x98] sm:$0x1] }
  0x32   : > { %v698_v13 = vshll.u32 %v3322_v60, 16  ;;  %v695_v19 = vrot.slane %v693_v10, 1  ;;  %v534_v23 = vunpack.c.l.b16 %v270_v3  ;;  %v539_v38 = vunpack.c.l.b16 %v275_v18 }
  0x33   : > { %v581_v30 = vsel %vm557_vm0, %v576_v11, %v580_v7  ;;  %v683_v33 = vrot.slane %v681_v17, 1  ;;  %v686_v35 = vshll.u32 %v3337_v16, 16  ;;  %v727_v46 = vshrl.u32 %v3343_v27, 16  ;;  %v3371_v7 = vld [vmem:[%s3195_s30 + $0x90] sm:$0xff]  }
  0x34   : > { %v700_v32 = vrot.slane %v698_v13, 1  ;;  %v696_v36 = vor.u32 %v695_v19, %v691_v8  ;;  %v3348_v37 = vpack.c.b16 %v534_v23, %v534_v23  ;;  %v729_v47 = vshll.u32 %v3343_v27, 16  ;;  %v2955_v13 = vld [vmem:[%s3195_s30 + $0xc] sm:$0xe] }
  0x35   : > { %760 = vrot.lane.b32.xlu2 %v629_v52, %s3106_s4  ;;  %v3356_v43 = vor.u32 %v683_v33, %v679_v62  ;;  %v688_v44 = vrot.slane %v686_v35, 1  ;;  %v667_v54 = vshrl.u32 %v3326_v63, 16  ;;  %v669_v55 = vshll.u32 %v3326_v63, 16 }
  0x36   : > { %764 = vrot.lane.b32.xlu1 %v653_v6, %s3106_s4  ;;  %v701_v52 = vsel %vm557_vm0, %v696_v36, %v700_v32  ;;  %v674_v59 = vshll.u32 %v3348_v37, 16  ;;  %v3368_v3 = vpack.c.b16 %v539_v38, %v539_v38  ;;  %v731_v6 = vrot.slane %v729_v47, 1 }
  0x37   : > { %752 = vrot.lane.b32.xlu0 %v581_v30, %s3106_s4  ;;  %v689_v62 = vsel %vm557_vm0, %v3356_v43, %v688_v44  ;;  %v671_v8 = vrot.slane %v669_v55, 1  ;;  %v538_v11 = vunpack.c.l.b16 %v274_v48  ;;  %v537_v19 = vunpack.c.l.b16 %v273_v61  ;;  %v3390_v48 = vld [vmem:[%s3195_s30 + $0xb4] sm:$0xff]   ;;  %v2803_v61 = vld [vmem:[%s3195_s30] sm:$0xe] }
  0x38   : > { %v676_v10 = vrot.slane %v674_v59, 1  ;;  %v3375_v17 = vor.u32 %v731_v6, %v727_v46  ;;  %v734_v18 = vshll.u32 %v3368_v3, 16  ;;  %v705_v32 = vshll.u32 %v3371_v7, 16  ;;  %v2802_v59 = vld [vmem:[%s3195_s30] sm:$0xf0] }
  0x39   : > { %v672_v23 = vor.u32 %v671_v8, %v667_v54  ;;  %v3379_v30 = vpack.c.b16 %v538_v11, %v538_v11  ;;  %v3382_v35 = vpack.c.b16 %v537_v19, %v537_v19  ;;  %v703_v36 = vshrl.u32 %v3371_v7, 16  ;;  %v276_v11 = vld [vmem:[%s3195_s30 + $0xbc] sm:$0x1] }
  0x3a   : > { %v736_v33 = vrot.slane %v734_v18, 1  ;;  %v715_v44 = vshrl.u32 %v3351_v39, 16  ;;  %v717_v46 = vshll.u32 %v3351_v39, 16  ;;  %v707_v54 = vrot.slane %v705_v32, 1 }
  0x3b   : > { %v677_v38 = vsel %vm557_vm0, %v672_v23, %v676_v10  ;;  %v722_v47 = vshll.u32 %v3379_v30, 16  ;;  %v710_v55 = vshll.u32 %v3382_v35, 16  ;;  %v2956_v10 = vor.u32 %v2955_v13, %v3284_v5 }
  0x3c   : > { %v719_v6 = vrot.slane %v717_v46, 1  ;;  %v3403_v18 = vor.u32 %v707_v54, %v703_v36  ;;  %v2804_v32 = vor.u32 %v2803_v61, %v2802_v59  ;;  %v540_v26 = vunpack.c.l.b16 %v276_v11 }
  0x3d   : > { %772 = vrot.lane.b32.xlu2 %v701_v52, %s3106_s4  ;;  %v3393_v52 = vld [vmem:[%s3195_s30 + $0xb4] sm:$0xf0]  ;;  %v724_v8 = vrot.slane %v722_v47, 1  ;;  %v712_v19 = vrot.slane %v710_v55, 1  ;;  %v834_v5 = vrot.slane %v2956_v10, 1  ;;  %v832_v13 = vrot.slane %v3229_v28, 1 }
  0x3e   : > { %770 = vrot.lane.b32.xlu1 %v689_v62, %s3106_s4  ;;  %v737_v62 = vsel %vm557_vm0, %v3375_v17, %v736_v33  ;;  %4449 = vst [vmem:[#allocation7_spill] sm:$0xff] %v3403_v18  ;;  %v720_v23 = vor.u32 %v719_v6, %v715_v44  ;;  %v3413_v36 = vpack.c.b16 %v540_v26, %v540_v26  ;;  %v2808_v44 = vld [vmem:[%s3195_s30 + $0x30] sm:$0xf0]  ;;  %v831_v47 = vrot.slane %v2804_v32, 1  ;;  %v2806_v26 = vld [vmem:[%s3195_s30 + $0x18] sm:$0xe] }
  0x3f   : > { %768 = vrot.lane.b32.xlu0 %v677_v38, %s3106_s4  ;;  %v835_v38 = vrot.slane %v3312_v41, 1  ;;  %v713_v46 = vsel %vm557_vm0, %v3403_v18, %v712_v19  ;;  %v2809_v41 = vld [vmem:[%s3195_s30 + $0x30] sm:$0xe]  ;;  %v739_v54 = vshrl.u32 %v3390_v48, 16  ;;  %v741_v55 = vshll.u32 %v3390_v48, 16 }
  0x40   : > { %v725_v33 = vsel %vm557_vm0, %v720_v23, %v724_v8  ;;  %v746_v59 = vshll.u32 %v3413_v36, 16  ;;  %v2810_v6 = vor.u32 %v2809_v41, %v2808_v44  ;;  %v2805_v8 = vld [vmem:[%s3195_s30 + $0x18] sm:$0xf0]  ;;  %v2961_v10 = vld [vmem:[%s3195_s30 + $0x54] sm:$0xe]  ;;  %v833_v11 = vsel %vm830_vm1, %v831_v47, %v832_v13 }
  0x41   : > { %v836_v61 = vsel %vm830_vm1, %v834_v5, %v835_v38  ;;  %v2959_v23 = vor.u32 %v2958_v45, %v3224_v25  ;;  %v844_v32 = vrot.slane %v3214_v15, 1  ;;  %v2964_v5 = vld [vmem:[%s3195_s30 + $0x3c] sm:$0xe]  ;;  %v841_v13 = vrot.slane %v3251_v49, 1  ;;  %v2811_v45 = vld [vmem:[%s3195_s30 + $0x48] sm:$0xf0] }
  0x42   : > { %v748_v28 = vrot.slane %v746_v59, 1  ;;  %v838_v25 = vrot.slane %v3218_v20, 1  ;;  %v2812_v41 = vld [vmem:[%s3195_s30 + $0x48] sm:$0xe]  ;;  %v2967_v49 = vld [vmem:[%s3195_s30 + $0x6c] sm:$0xe] }
  0x43   : > { %v840_v44 = vrot.slane %v2959_v23, 1  ;;  %v2813_v59 = vor.u32 %v2812_v41, %v2811_v45  ;;  %v856_v45 = vrot.slane %v3236_v34, 1  ;;  %v2821_v41 = vld [vmem:[%s3195_s30 + $0x90] sm:$0xe] }
  0x45   : > { %778 = vrot.lane.b32.xlu2 %v737_v62, %s3106_s4  ;;  %v743_v62 = vrot.slane %v741_v55, 1  ;;  %v842_v55 = vsel %vm830_vm1, %v840_v44, %v841_v13 }
  0x46   : > { %776 = vrot.lane.b32.xlu1 %v725_v33, %s3106_s4  ;;  %v843_v33 = vrot.slane %v2810_v6, 1  ;;  %v2965_v6 = vor.u32 %v2964_v5, %v3257_v51  ;;  %v2970_v51 = vld [vmem:[%s3195_s30 + $0x9c] sm:$0xe] }
  0x47   : > { %774 = vrot.lane.b32.xlu0 %v713_v46, %s3106_s4  ;;  %v744_v19 = vor.u32 %v743_v62, %v739_v54  ;;  %v2807_v46 = vor.u32 %v2806_v26, %v2805_v8  ;;  %v2962_v54 = vor.u32 %v2961_v10, %v3270_v58  ;;  %v853_v62 = vrot.slane %v3304_v29, 1  ;;  %v2817_v8 = vld [vmem:[%s3195_s30 + $0x78] sm:$0xf0]  ;;  %v2818_v58 = vld [vmem:[%s3195_s30 + $0x78] sm:$0xe] }
  0x48   : > { %v845_v15 = vsel %vm830_vm1, %v843_v33, %v844_v32  ;;  %v850_v26 = vrot.slane %v3261_v53, 1  ;;  %v2819_v23 = vor.u32 %v2818_v58, %v2817_v8  ;;  %v2814_v32 = vld [vmem:[%s3195_s30 + $0x60] sm:$0xf0]  ;;  %v2815_v29 = vld [vmem:[%s3195_s30 + $0x60] sm:$0xe]  ;;  %v2968_v33 = vor.u32 %v2967_v49, %v3329_v1  ;;  %v3481_v58 = vld [vmem:[%s3195_s30 + $0xc] sm:$0xff]  }
  0x49   : > { %v749_v38 = vsel %vm557_vm0, %v744_v19, %v748_v28  ;;  %v837_v47 = vrot.slane %v2807_v46, 1  ;;  %v852_v20 = vrot.slane %v2962_v54, 1  ;;  %v849_v28 = vrot.slane %v2813_v59, 1  ;;  %v2820_v1 = vld [vmem:[%s3195_s30 + $0x90] sm:$0xf0] }
  0x4a   : > { %v847_v19 = vrot.slane %v3288_v12, 1  ;;  %v862_v53 = vrot.slane %v3337_v16, 1  ;;  %v861_v5 = vrot.slane %v2819_v23, 1  ;;  %v2816_v44 = vor.u32 %v2815_v29, %v2814_v32  ;;  %v2973_v12 = vld [vmem:[%s3195_s30 + $0x84] sm:$0xe] }
  0x4b   : > { %v854_v10 = vsel %vm830_vm1, %v852_v20, %v853_v62  ;;  %v858_v13 = vrot.slane %v2968_v33, 1  ;;  %v871_v49 = vrot.slane %v3379_v30, 1  ;;  %v868_v20 = vrot.slane %v3382_v35, 1  ;;  %v2823_v30 = vld [vmem:[%s3195_s30 + $0xa8] sm:$0xf0]  ;;  %v3498_v29 = vld [vmem:[%s3195_s30 + $0x24] sm:$0xff]  }
  0x4c   : > { %v855_v16 = vrot.slane %v2816_v44, 1  ;;  %v865_v8 = vrot.slane %v3322_v60, 1  ;;  %v874_v32 = vrot.slane %v3368_v3, 1  ;;  %v3509_v3 = vld [vmem:[%s3195_s30 + $0x54] sm:$0xff]   ;;  %v3517_v33 = vld [vmem:[%s3195_s30 + $0x3c] sm:$0xff]  }
  0x4d   : > { %881 = vrot.lane.b32.xlu2 %v836_v61, %s3107_s5  ;;  %v839_v61 = vsel %vm830_vm1, %v837_v47, %v838_v25  ;;  %v859_v25 = vrot.slane %v3348_v37, 1  ;;  %v2971_v47 = vor.u32 %v2970_v51, %v3354_v40  ;;  %v2976_v37 = vld [vmem:[%s3195_s30 + $0xb4] sm:$0xe]  ;;  %v3501_v51 = vld [vmem:[%s3195_s30 + $0x24] sm:$0xf0] }
  0x4e   : > { %879 = vrot.lane.b32.xlu1 %v833_v11, %s3107_s5  ;;  %v846_v11 = vrot.slane %v2965_v6, 1  ;;  %v857_v59 = vsel %vm830_vm1, %v855_v16, %v856_v45  ;;  %4450 = vst [vmem:[#allocation8_spill] sm:$0xff] %v3501_v51  ;;  %v3530_v44 = vld [vmem:[%s3195_s30 + $0x6c] sm:$0xf0]  ;;  %v3550_v45 = vld [vmem:[%s3195_s30 + $0x84] sm:$0xf0] }
  0x4f   : > { %780 = vrot.lane.b32.xlu0 %v749_v38, %s3106_s4  ;;  %v851_v38 = vsel %vm830_vm1, %v849_v28, %v850_v26  ;;  %v860_v54 = vsel %vm830_vm1, %v858_v13, %v859_v25  ;;  %v870_v34 = vrot.slane %v2971_v47, 1  ;;  %v3484_v28 = vld [vmem:[%s3195_s30 + $0xc] sm:$0xf0]  ;;  %v3541_v13 = vld [vmem:[%s3195_s30 + $0x9c] sm:$0xff]   ;;  %v3547_v25 = vld [vmem:[%s3195_s30 + $0x84] sm:$0xff]  }
  0x50   : > { %v848_v46 = vsel %vm830_vm1, %v846_v11, %v847_v19  ;;  %v877_v19 = vrot.slane %v3413_v36, 1  ;;  %v2555_v16 = vld [vmem:[%s3195_s30 + $0x14] sm:$0x1]  ;;  %v1216_v51 = vshrl.u32 %v3541_v13, 16 }
  0x51   : > { %v872_v62 = vsel %vm830_vm1, %v870_v34, %v871_v49  ;;  %v3561_v47 = vld [vmem:[%s3195_s30 + $0xb4] sm:$0xff]  }
  0x55   : > { %887 = vrot.lane.b32.xlu2 %v845_v15, %s3107_s5  ;;  %v863_v15 = vsel %vm830_vm1, %v861_v5, %v862_v53  ;;  %v3520_v53 = vld [vmem:[%s3195_s30 + $0x3c] sm:$0xf0]  ;;  %v2539_v5 = vld [vmem:[%s3195_s30 + $0x6c] sm:$0xff]  }
  0x56   : > { %885 = vrot.lane.b32.xlu1 %v842_v55, %s3107_s5  ;;  %v2822_v55 = vor.u32 %v2821_v41, %v2820_v1  ;;  %v2556_v41 = vld [vmem:[%s3195_s30 + $0x20] sm:$0x1] }
  0x57   : > { %883 = vrot.lane.b32.xlu0 %v839_v61, %s3107_s5  ;;  %v2974_v61 = vor.u32 %v2973_v12, %v3299_v22  ;;  %v2824_v22 = vld [vmem:[%s3195_s30 + $0xa8] sm:$0xe] }
  0x58   : > { %v867_v40 = vrot.slane %v2822_v55, 1  ;;  %v2825_v11 = vor.u32 %v2824_v22, %v2823_v30  ;;  %v1040_v55 = vunpack.c.l.b16 %v2556_v41 }
  0x59   : > { %v864_v6 = vrot.slane %v2974_v61, 1 }
  0x5a   : > { %v869_v26 = vsel %vm830_vm1, %v867_v40, %v868_v20  ;;  %v873_v23 = vrot.slane %v2825_v11, 1  ;;  %v3576_v61 = vpack.c.b16 %v1040_v55, %v1040_v55  ;;  %v1074_v40 = vshll.u32 %v3481_v58, 16 }
  0x5b   : > { %v866_v35 = vsel %vm830_vm1, %v864_v6, %v865_v8  ;;  %v3586_v6 = vld [vmem:[%s3195_s30 + $0xc0] sm:$0xff]   ;;  %v1168_v8 = vshrl.u32 %v2539_v5, 16  ;;  %v1072_v11 = vshrl.u32 %v3481_v58, 16 }
  0x5c   : > { %v875_v36 = vsel %vm830_vm1, %v873_v23, %v874_v32  ;;  %v2982_v23 = vld [vmem:[%s3195_s30 + $0x6c] sm:$0xe] }
  0x5d   : > { %893 = vrot.lane.b32.xlu2 %v854_v10, %s3107_s5  ;;  %v2977_v10 = vor.u32 %v2976_v37, %v3393_v52  ;;  %v1039_v37 = vunpack.c.l.b16 %v2555_v16  ;;  %v1218_v16 = vshll.u32 %v3541_v13, 16 }
  0x5e   : > { %891 = vrot.lane.b32.xlu1 %v851_v38, %s3107_s5  ;;  %v3512_v38 = vld [vmem:[%s3195_s30 + $0x54] sm:$0xf0] }
  0x5f   : > { %889 = vrot.lane.b32.xlu0 %v848_v46, %s3107_s5  ;;  %v876_v60 = vrot.slane %v2977_v10, 1  ;;  %v2979_v10 = vld [vmem:[%s3195_s30 + $0x9c] sm:$0xe] }
  0x61   : > { %v878_v52 = vsel %vm830_vm1, %v876_v60, %v877_v19  ;;  %v1076_v60 = vrot.slane %v1074_v40, 1 }
  0x63   : > { %v1077_v55 = vor.u32 %v1076_v60, %v1072_v11  ;;  %v1220_v60 = vrot.slane %v1218_v16, 1  ;;  %v2631_v16 = vld [vmem:[%s3195_s30 + $0xb0] sm:$0x1] }
  0x65   : > { %899 = vrot.lane.b32.xlu2 %v863_v15, %s3107_s5 }
  0x66   : > { %897 = vrot.lane.b32.xlu1 %v860_v54, %s3107_s5  ;;  %v3564_v54 = vld [vmem:[%s3195_s30 + $0xb4] sm:$0xf0] }
  0x67   : > { %895 = vrot.lane.b32.xlu0 %v857_v59, %s3107_s5  ;;  %v1170_v59 = vshll.u32 %v2539_v5, 16 }
  0x69   : > { %v1172_v30 = vrot.slane %v1170_v59, 1 }
  0x6b   : > { %v1173_v32 = vor.u32 %v1172_v30, %v1168_v8 }
  0x6d   : > { %905 = vrot.lane.b32.xlu2 %v872_v62, %s3107_s5  ;;  %v3583_v62 = vpack.c.b16 %v1039_v37, %v1039_v37 }
  0x6e   : > { %903 = vrot.lane.b32.xlu1 %v869_v26, %s3107_s5  ;;  %v2567_v26 = vld [vmem:[%s3195_s30 + $0xa4] sm:$0x1] }
  0x6f   : > { %901 = vrot.lane.b32.xlu0 %v866_v35, %s3107_s5  ;;  %v1091_v35 = vshll.u32 %v3576_v61, 16  ;;  %v1079_v19 = vshll.u32 %v3583_v62, 16 }
  0x71   : > { %v1081_v37 = vrot.slane %v1079_v19, 1 }
  0x75   : > { %991 = vrot.lane.b32.xlu2 %v3481_v58, %s3108_s6 }
  0x76   : > { %909 = vrot.lane.b32.xlu1 %v878_v52, %s3107_s5 }
  0x77   : > { %907 = vrot.lane.b32.xlu0 %v875_v36, %s3107_s5  ;;  %v1051_v36 = vunpack.c.l.b16 %v2567_v26  ;;  %v2983_v26 = vor.u32 %v2982_v23, %v3530_v44 }
  0x79   : > { %v1067_v40 = vpack.c.b16 %v1051_v36, %v1051_v36 }
  0x7b   : > { %v1380_v18 = vrot.slane %v1067_v40, 1  ;;  %v1223_v19 = vshll.u32 %v1067_v40, 16  ;;  %v2868_v40 = vld [vmem:[%s3195_s30 + $0xa8] sm:$0xf0] }
  0x7d   : > { %997 = vrot.lane.b32.xlu2 %v3198_v0, %s3108_s6  ;;  %v1225_v36 = vrot.slane %v1223_v19, 1 }
  0x7e   : > { %995 = vrot.lane.b32.xlu1 %v3498_v29, %s3108_s6 }
  0x7f   : > { %v3524_v46 = vpop.permute.xlu2 %758  ;;  %993 = vrot.lane.b32.xlu0 %v3202_v2, %s3108_s6  ;;  %v2978_v2 = vld [vmem:[%s3195_s30 + $0x9c] sm:$0xf0] }
  0x80   : > { %v2980_v8 = vor.u32 %v2979_v10, %v2978_v2  ;;  %v1367_v10 = vrot.slane %v2983_v26, 1  ;;  %v2862_v26 = vld [vmem:[%s3195_s30 + $0x78] sm:$0xf0] }
  0x82   : > { %v1379_v11 = vrot.slane %v2980_v8, 1  ;;  %v2869_v8 = vld [vmem:[%s3195_s30 + $0xa8] sm:$0xe] }
  0x83   : > { %v2870_v19 = vor.u32 %v2869_v8, %v2868_v40 }
  0x85   : > { %1003 = vrot.lane.b32.xlu2 %v3509_v3, %s3108_s6 }
  0x86   : > { %1001 = vrot.lane.b32.xlu1 %v3242_v42, %s3108_s6  ;;  %v2563_v42 = vld [vmem:[%s3195_s30 + $0x74] sm:$0x1] }
  0x87   : > { %v3536_v12 = vpop.permute.xlu2 %766  ;;  %999 = vrot.lane.b32.xlu0 %v3517_v33, %s3108_s6  ;;  %v1047_v15 = vunpack.c.l.b16 %v2563_v42  ;;  %v2627_v42 = vld [vmem:[%s3195_s30 + $0x80] sm:$0x1] }
  0x88   : > { %v1559_v30 = vunpack.c.l.b16 %v2627_v42 }
  0x89   : > { %v3568_v34 = vpack.c.b16 %v1047_v15, %v1047_v15  ;;  %v1093_v15 = vrot.slane %v1091_v35, 1  ;;  %v1082_v35 = vsel %vm557_vm0, %v1077_v55, %v1081_v37  ;;  %v1563_v37 = vunpack.c.l.b16 %v2631_v16  ;;  %v2619_v16 = vld [vmem:[%s3195_s30 + $0x20] sm:$0x1] }
  0x8a   : > { %v1551_v40 = vunpack.c.l.b16 %v2619_v16 }
  0x8b   : > { %v1175_v22 = vshll.u32 %v3568_v34, 16  ;;  %v1368_v44 = vrot.slane %v3568_v34, 1 }
  0x8d   : > { %1009 = vrot.lane.b32.xlu2 %v3320_v56, %s3108_s6  ;;  %v1177_v52 = vrot.slane %v1175_v22, 1  ;;  %v1094_v22 = vsel %vm557_vm0, %v3233_v31, %v1093_v15  ;;  %v1369_v34 = vsel %vm830_vm1, %v1367_v10, %v1368_v44 }
  0x8e   : > { %1007 = vrot.lane.b32.xlu1 %v2539_v5, %s3108_s6 }
  0x8f   : > { %v3553_v1 = vpop.permute.xlu2 %760  ;;  %1005 = vrot.lane.b32.xlu0 %v3212_v14, %s3108_s6  ;;  %v1178_v59 = vsel %vm557_vm0, %v1173_v32, %v1177_v52  ;;  %v3616_v32 = vpack.c.b16 %v1559_v30, %v1559_v30  ;;  %v1221_v52 = vor.u32 %v1220_v60, %v1216_v51  ;;  %v1579_v60 = vpack.c.b16 %v1563_v37, %v1563_v37 }
  0x90   : > { %v1122_v37 = vshll.u32 %v3517_v33, 16 }
  0x91   : > { %v1687_v42 = vshll.u32 %v3616_v32, 16 }
  0x93   : > { %v1689_v51 = vrot.slane %v1687_v42, 1 }
  0x95   : > { %1015 = vrot.lane.b32.xlu2 %v3541_v13, %s3108_s6  ;;  %v1381_v13 = vsel %vm830_vm1, %v1379_v11, %v1380_v18  ;;  %v1226_v18 = vsel %vm557_vm0, %v1221_v52, %v1225_v36  ;;  %v1690_v11 = vsel %vm557_vm0, %v3356_v43, %v1689_v51  ;;  %v1892_v52 = vrot.slane %v1579_v60, 1 }
  0x96   : > { %1013 = vrot.lane.b32.xlu1 %v3371_v7, %s3108_s6  ;;  %v1735_v36 = vshll.u32 %v1579_v60, 16  ;;  %v1880_v51 = vrot.slane %v3616_v32, 1 }
  0x97   : > { %v3572_v14 = vpop.permute.xlu2 %772  ;;  %1011 = vrot.lane.b32.xlu0 %v3547_v25, %s3108_s6 }
  0x98   : > { %v3574_v49 = vpop.permute.xlu1 %754 }
  0x99   : > { %v3581_v20 = vpop.permute.xlu0 %750 }
  0x9d   : > { %1021 = vrot.lane.b32.xlu2 %v3586_v6, %s3108_s6 }
  0x9e   : > { %1019 = vrot.lane.b32.xlu1 %v3561_v47, %s3108_s6 }
  0x9f   : > { %v3599_v5 = vpop.permute.xlu2 %778  ;;  %1017 = vrot.lane.b32.xlu0 %v3343_v27, %s3108_s6  ;;  %s4305_s6 = scalar_lea.vmem [#allocation2], %s2521_s29 }
  0xa0   : > { %v3602_v41 = vpop.permute.xlu1 %756 }
  0xa1   : > { %v3607_v58 = vpop.permute.xlu0 %762 }
  0xa5   : > { %1279 = vrot.lane.b32.xlu2 %v1178_v59, %s3109_s7 }
  0xa6   : > { %1265 = vrot.lane.b32.xlu1 %v1094_v22, %s3109_s7 }
  0xa7   : > { %v882_v2 = vpop.permute.xlu2 %881  ;;  %1263 = vrot.lane.b32.xlu0 %v1082_v35, %s3109_s7  ;;  %v2863_v35 = vld [vmem:[%s3195_s30 + $0x78] sm:$0xe] }
  0xa8   : > { %v765_v31 = vpop.permute.xlu1 %764  ;;  %v2864_v10 = vor.u32 %v2863_v35, %v2862_v26  ;;  %v3669_v26 = vld [vmem:[%s3195_s30 + $0x18] sm:$0xff]  }
  0xa9   : > { %v753_v23 = vpop.permute.xlu0 %752  ;;  %v1951_v42 = vsel %vm1935_vm2, %v3267_v57, %v765_v31 }
  0xaa   : > { %v1939_v15 = vsel %vm1935_vm2, %v3281_v4, %v753_v23  ;;  %v1945_v4 = vsel %vm1935_vm2, %v3198_v0, %v3524_v46  ;;  %v2559_v0 = vld [vmem:[%s3195_s30 + $0x44] sm:$0x1]  ;;  %v2985_v46 = vld [vmem:[%s3195_s30 + $0x3c] sm:$0xe]  ;;  %v2988_v23 = vld [vmem:[%s3195_s30 + $0xc] sm:$0xe] }
  0xab   : > { %v3628_v55 = vsel %vm1968_vm3, %v1939_v15, %v882_v2  ;;  %v1043_v44 = vunpack.c.l.b16 %v2559_v0  ;;  %v2986_v31 = vor.u32 %v2985_v46, %v3520_v53  ;;  %v1120_v53 = vshrl.u32 %v3517_v33, 16 }
  0xad   : > { %1415 = vrot.lane.b32.xlu2 %v1381_v13, %s3110_s8  ;;  %v1891_v13 = vrot.slane %v2870_v19, 1  ;;  %v1059_v57 = vpack.c.b16 %v1043_v44, %v1043_v44  ;;  %v1355_v60 = vrot.slane %v2986_v31, 1  ;;  %v1124_v19 = vrot.slane %v1122_v37, 1 }
  0xae   : > { %1407 = vrot.lane.b32.xlu1 %v1369_v34, %s3110_s8  ;;  %v1586_v44 = vshll.u32 %v3669_v26, 16 }
  0xaf   : > { %v888_v59 = vpop.permute.xlu2 %887  ;;  %1287 = vrot.lane.b32.xlu0 %v1226_v18, %s3109_s7  ;;  %v1879_v18 = vrot.slane %v2864_v10, 1  ;;  %v1356_v32 = vrot.slane %v1059_v57, 1  ;;  %v1127_v0 = vshll.u32 %v1059_v57, 16  ;;  %v3677_v10 = vpack.c.b16 %v1551_v40, %v1551_v40  ;;  %v2623_v57 = vld [vmem:[%s3195_s30 + $0x50] sm:$0x1] }
  0xb0   : > { %v771_v30 = vpop.permute.xlu1 %770  ;;  %v3639_v22 = vsel %vm1968_vm3, %v1945_v4, %v888_v59  ;;  %v1893_v59 = vsel %vm830_vm1, %v1891_v13, %v1892_v52  ;;  %v1344_v52 = vrot.slane %v3583_v62, 1  ;;  %v1588_v37 = vrot.slane %v1586_v44, 1 }
  0xb1   : > { %v3648_v2 = vpop.permute.xlu0 %768  ;;  %v1881_v35 = vsel %vm830_vm1, %v1879_v18, %v1880_v51  ;;  %v1957_v13 = vsel %vm1935_vm2, %v3320_v56, %v771_v30  ;;  %v1125_v30 = vor.u32 %v1124_v19, %v1120_v53  ;;  %v1129_v16 = vrot.slane %v1127_v0, 1  ;;  %v2856_v53 = vld [vmem:[%s3195_s30 + $0x48] sm:$0xf0]  ;;  %v2857_v19 = vld [vmem:[%s3195_s30 + $0x48] sm:$0xe] }
  0xb2   : > { %v1584_v51 = vshrl.u32 %v3669_v26, 16  ;;  %v1591_v62 = vshll.u32 %v3677_v10, 16  ;;  %v1943_v44 = vsel %vm1935_vm2, %v3221_v24, %v3602_v41  ;;  %v2564_v24 = vld [vmem:[%s3195_s30 + $0x80] sm:$0x1] }
  0xb3   : > { %v1130_v40 = vsel %vm557_vm0, %v1125_v30, %v1129_v16 }
  0xb5   : > { %1791 = vrot.lane.b32.xlu2 %v1690_v11, %s3111_s9  ;;  %v2989_v11 = vor.u32 %v2988_v23, %v3484_v28 }
  0xb6   : > { %1527 = vrot.lane.b32.xlu1 %v3343_v27, %s3112_s10  ;;  %v1737_v27 = vrot.slane %v1735_v36, 1  ;;  %v2949_v36 = vld [vmem:[%s3195_s30] sm:$0xff]  }
  0xb7   : > { %v894_v15 = vpop.permute.xlu2 %893  ;;  %1519 = vrot.lane.b32.xlu0 %v3320_v56, %s3112_s10  ;;  %v1343_v33 = vrot.slane %v2989_v11, 1  ;;  %v1357_v56 = vsel %vm830_vm1, %v1355_v60, %v1356_v32  ;;  %v1593_v32 = vrot.slane %v1591_v62, 1 }
  0xb8   : > { %v3658_v34 = vsel %vm1968_vm3, %v1951_v42, %v894_v15  ;;  %v777_v4 = vpop.permute.xlu1 %776  ;;  %v1738_v46 = vsel %vm557_vm0, %v3375_v17, %v1737_v27  ;;  %v1937_v42 = vsel %vm1935_vm2, %v2949_v36, %v3581_v20  ;;  %v1555_v27 = vunpack.c.l.b16 %v2623_v57 }
  0xb9   : > { %v3666_v8 = vpop.permute.xlu0 %774  ;;  %v1345_v20 = vsel %vm830_vm1, %v1343_v33, %v1344_v52  ;;  %v1963_v11 = vsel %vm1935_vm2, %v3351_v39, %v777_v4  ;;  %v2850_v39 = vld [vmem:[%s3195_s30 + $0x18] sm:$0xf0]  ;;  %v2851_v4 = vld [vmem:[%s3195_s30 + $0x18] sm:$0xe]  ;;  %v2568_v33 = vld [vmem:[%s3195_s30 + $0xb0] sm:$0x1] }
  0xba   : > { %v2852_v16 = vor.u32 %v2851_v4, %v2850_v39 }
  0xbd   : > { %1927 = vrot.lane.b32.xlu2 %v1893_v59, %s3113_s11  ;;  %v2796_v59 = vld [vmem:[%s3195_s30 + $0x48] sm:$0xff]  }
  0xbe   : > { %1919 = vrot.lane.b32.xlu1 %v1881_v35, %s3113_s11  ;;  %v1589_v35 = vor.u32 %v1588_v37, %v1584_v51  ;;  %v1052_v51 = vunpack.c.l.b16 %v2568_v33  ;;  %v1632_v37 = vshrl.u32 %v2796_v59, 16  ;;  %v1947_v33 = vsel %vm1935_vm2, %v3254_v50, %v3553_v1 }
  0xbf   : > { %v900_v28 = vpop.permute.xlu2 %899  ;;  %1799 = vrot.lane.b32.xlu0 %v1738_v46, %s3111_s9  ;;  %v1634_v46 = vshll.u32 %v2796_v59, 16 }
  0xc0   : > { %v3684_v23 = vsel %vm1968_vm3, %v1957_v13, %v900_v28  ;;  %v880_v15 = vpop.permute.xlu1 %879  ;;  %v1571_v28 = vpack.c.b16 %v1555_v27, %v1555_v27  ;;  %v1594_v36 = vsel %vm557_vm0, %v1589_v35, %v1593_v32  ;;  %v2838_v35 = vld [vmem:[%s3195_s30 + $0x78] sm:$0xf0]  ;;  %v2839_v32 = vld [vmem:[%s3195_s30 + $0x78] sm:$0xe] }
  0xc1   : > { %v1970_v18 = vsel %vm1968_vm3, %v1937_v42, %v880_v15  ;;  %v3696_v31 = vpop.permute.xlu0 %780  ;;  %v2858_v42 = vor.u32 %v2857_v19, %v2856_v53  ;;  %v2950_v15 = vld [vmem:[%s3195_s30 + $0x18] sm:$0xff]   ;;  %v1636_v62 = vrot.slane %v1634_v46, 1  ;;  %v1856_v53 = vrot.slane %v3677_v10, 1 }
  0xc2   : > { %v1639_v57 = vshll.u32 %v1571_v28, 16  ;;  %v1868_v27 = vrot.slane %v1571_v28, 1  ;;  %v3734_v19 = vpack.c.b16 %v1052_v51, %v1052_v51  ;;  %v2840_v4 = vor.u32 %v2839_v32, %v2838_v35  ;;  %v2990_v51 = vld [vmem:[%s3195_s30 + $0x84] sm:$0xf0] }
  0xc4   : > { %v1641_v28 = vrot.slane %v1639_v57, 1 }
  0xc5   : > { %1399 = vrot.lane.b32.xlu2 %v1357_v56, %s3110_s8  ;;  %v1941_v56 = vsel %vm1935_vm2, %v2950_v15, %v3574_v49  ;;  %v3753_v15 = vld [vmem:[%s3195_s30 + $0xb4] sm:$0xff]  }
  0xc6   : > { %1391 = vrot.lane.b32.xlu1 %v1345_v20, %s3110_s8  ;;  %v1867_v20 = vrot.slane %v2858_v42, 1  ;;  %v1235_v42 = vshll.u32 %v3734_v19, 16 }
  0xc7   : > { %v906_v60 = vpop.permute.xlu2 %905  ;;  %1271 = vrot.lane.b32.xlu0 %v1130_v40, %s3109_s7  ;;  %v1048_v40 = vunpack.c.l.b16 %v2564_v24  ;;  %v1370_v24 = vrot.slane %v2840_v4, 1 }
  0xc8   : > { %v3708_v0 = vsel %vm1968_vm3, %v1963_v11, %v906_v60  ;;  %v886_v13 = vpop.permute.xlu1 %885  ;;  %v1855_v60 = vrot.slane %v2852_v16, 1  ;;  %v1869_v39 = vsel %vm830_vm1, %v1867_v20, %v1868_v27  ;;  %v3760_v16 = vld [vmem:[%s3195_s30 + $0x84] sm:$0xff]   ;;  %v1237_v57 = vrot.slane %v1235_v42, 1 }
  0xc9   : > { %v1976_v52 = vsel %vm1968_vm3, %v1943_v44, %v886_v13  ;;  %v884_v30 = vpop.permute.xlu0 %883  ;;  %v2951_v44 = vld [vmem:[%s3195_s30 + $0x48] sm:$0xff]   ;;  %v1637_v13 = vor.u32 %v1636_v62, %v1632_v37  ;;  %v1064_v10 = vpack.c.b16 %v1048_v40, %v1048_v40  ;;  %v1955_v20 = vsel %vm1935_vm2, %v3326_v63, %v3648_v2  ;;  %v2632_v40 = vld [vmem:[%s3195_s30 + $0xbc] sm:$0x1] }
  0xca   : > { %v3724_v41 = vsel %vm1968_vm3, %v1941_v56, %v884_v30  ;;  %v1949_v46 = vsel %vm1935_vm2, %v2951_v44, %v3607_v58  ;;  %v3756_v56 = vld [vmem:[%s3195_s30 + $0xb4] sm:$0xf0]  ;;  %v2952_v44 = vld [vmem:[%s3195_s30 + $0x60] sm:$0xff]   ;;  %v1238_v2 = vsel %vm557_vm0, %v3375_v17, %v1237_v57  ;;  %v1961_v17 = vsel %vm1935_vm2, %v3371_v7, %v3666_v8 }
  0xcb   : > { %v1642_v30 = vsel %vm557_vm0, %v1637_v13, %v1641_v28  ;;  %v1371_v50 = vrot.slane %v1064_v10, 1  ;;  %v1187_v1 = vshll.u32 %v1064_v10, 16  ;;  %v2628_v13 = vld [vmem:[%s3195_s30 + $0x8c] sm:$0x1]  ;;  %v1564_v28 = vunpack.c.l.b16 %v2632_v40 }
  0xcc   : > { %v1560_v4 = vunpack.c.l.b16 %v2628_v13  ;;  %v1959_v57 = vsel %vm1935_vm2, %v3296_v21, %v3572_v14  ;;  %v1740_v8 = vshrl.u32 %v3753_v15, 16 }
  0xcd   : > { %1775 = vrot.lane.b32.xlu2 %v1594_v36, %s3111_s9  ;;  %v1372_v35 = vsel %vm830_vm1, %v1370_v24, %v1371_v50  ;;  %v1189_v32 = vrot.slane %v1187_v1, 1  ;;  %v2560_v24 = vld [vmem:[%s3195_s30 + $0x50] sm:$0x1] }
  0xce   : > { %1511 = vrot.lane.b32.xlu1 %v2796_v59, %s3112_s10  ;;  %v1576_v1 = vpack.c.b16 %v1560_v4, %v1560_v4 }
  0xcf   : > { %v992_v49 = vpop.permute.xlu2 %991  ;;  %1503 = vrot.lane.b32.xlu0 %v3669_v26, %s3112_s10  ;;  %v1857_v26 = vsel %vm830_vm1, %v1855_v60, %v1856_v53  ;;  %v2844_v60 = vld [vmem:[%s3195_s30 + $0xa8] sm:$0xf0]  ;;  %v2845_v53 = vld [vmem:[%s3195_s30 + $0xa8] sm:$0xe]  ;;  %v1190_v10 = vsel %vm557_vm0, %v3356_v43, %v1189_v32  ;;  %v1694_v43 = vshll.u32 %v3760_v16, 16 }
  0xd0   : > { %v3731_v11 = vsel %vm2001_vm4, %v1970_v18, %v992_v49  ;;  %v892_v59 = vpop.permute.xlu1 %891  ;;  %v1883_v32 = vrot.slane %v1576_v1, 1 }
  0xd1   : > { %v1982_v18 = vsel %vm1968_vm3, %v1949_v46, %v892_v59  ;;  %v890_v58 = vpop.permute.xlu0 %889  ;;  %v2991_v59 = vld [vmem:[%s3195_s30 + $0x84] sm:$0xe] }
  0xd2   : > { %v3747_v36 = vsel %vm1968_vm3, %v1947_v33, %v890_v58  ;;  %v1742_v58 = vshll.u32 %v3753_v15, 16 }
  0xd5   : > { %1911 = vrot.lane.b32.xlu2 %v1869_v39, %s3113_s11  ;;  %v2846_v39 = vor.u32 %v2845_v53, %v2844_v60  ;;  %v1699_v60 = vshll.u32 %v1576_v1, 16  ;;  %v2994_v53 = vld [vmem:[%s3195_s30 + $0xb4] sm:$0xe] }
  0xd6   : > { %1903 = vrot.lane.b32.xlu1 %v1857_v26, %s3113_s11  ;;  %v3794_v26 = vpack.c.b16 %v1564_v28, %v1564_v28  ;;  %v1967_v28 = vsel %vm1935_vm2, %v3390_v48, %v3696_v31 }
  0xd7   : > { %v998_v37 = vpop.permute.xlu2 %997  ;;  %1783 = vrot.lane.b32.xlu0 %v1642_v30, %s3111_s9  ;;  %v1382_v30 = vrot.slane %v2846_v39, 1 }
  0xd8   : > { %v3765_v62 = vsel %vm2001_vm4, %v1976_v52, %v998_v37  ;;  %v898_v27 = vpop.permute.xlu1 %897  ;;  %v1953_v52 = vsel %vm1935_vm2, %v2952_v44, %v3536_v12  ;;  %v2992_v37 = vor.u32 %v2991_v59, %v2990_v51  ;;  %v1747_v40 = vshll.u32 %v3794_v26, 16 }
  0xd9   : > { %v1988_v49 = vsel %vm1968_vm3, %v1955_v20, %v898_v27  ;;  %v896_v46 = vpop.permute.xlu0 %895  ;;  %v1744_v27 = vrot.slane %v1742_v58, 1  ;;  %v1696_v51 = vrot.slane %v1694_v43, 1  ;;  %v2953_v58 = vld [vmem:[%s3195_s30 + $0xa8] sm:$0xff]  }
  0xda   : > { %v3782_v63 = vsel %vm1968_vm3, %v1953_v52, %v896_v46  ;;  %v1882_v14 = vrot.slane %v2992_v37, 1  ;;  %v2826_v52 = vld [vmem:[%s3195_s30 + $0x18] sm:$0xf0]  ;;  %v2827_v46 = vld [vmem:[%s3195_s30 + $0x18] sm:$0xe]  ;;  %v1749_v59 = vrot.slane %v1747_v40, 1 }
  0xdb   : > { %v1347_v37 = vrot.slane %v3576_v61, 1 }
  0xdc   : > { %v1884_v4 = vsel %vm830_vm1, %v1882_v14, %v1883_v32  ;;  %v2833_v14 = vld [vmem:[%s3195_s30 + $0x48] sm:$0xe]  ;;  %v2997_v32 = vld [vmem:[%s3195_s30 + $0x24] sm:$0xe] }
  0xdd   : > { %1409 = vrot.lane.b32.xlu2 %v1372_v35, %s3110_s8  ;;  %v1044_v35 = vunpack.c.l.b16 %v2560_v24  ;;  %v3845_v24 = vld [vmem:[%s3195_s30 + $0x54] sm:$0xff]  }
  0xde   : > { %1289 = vrot.lane.b32.xlu1 %v1238_v2, %s3109_s7 }
  0xdf   : > { %v1004_v12 = vpop.permute.xlu2 %1003  ;;  %1281 = vrot.lane.b32.xlu0 %v1190_v10, %s3109_s7  ;;  %v3826_v2 = vpack.c.b16 %v1044_v35, %v1044_v35  ;;  %v1895_v35 = vrot.slane %v3794_v26, 1 }
  0xe0   : > { %v3791_v33 = vsel %vm2001_vm4, %v1982_v18, %v1004_v12  ;;  %v904_v42 = vpop.permute.xlu1 %903  ;;  %v1383_v18 = vrot.slane %v3734_v19, 1  ;;  %v1692_v19 = vshrl.u32 %v3760_v16, 16  ;;  %v2828_v12 = vor.u32 %v2827_v46, %v2826_v52 }
  0xe1   : > { %v3803_v50 = vsel %vm1968_vm3, %v1961_v17, %v904_v42  ;;  %v902_v7 = vpop.permute.xlu0 %901  ;;  %v1965_v17 = vsel %vm1935_vm2, %v2953_v58, %v3599_v5  ;;  %v1139_v43 = vshll.u32 %v3826_v2, 16  ;;  %v2565_v58 = vld [vmem:[%s3195_s30 + $0x8c] sm:$0x1] }
  0xe2   : > { %v3811_v20 = vsel %vm1968_vm3, %v1959_v57, %v902_v7  ;;  %v1384_v21 = vsel %vm830_vm1, %v1382_v30, %v1383_v18  ;;  %v1697_v39 = vor.u32 %v1696_v51, %v1692_v19  ;;  %v2995_v30 = vor.u32 %v2994_v53, %v3756_v56  ;;  %v3848_v18 = vld [vmem:[%s3195_s30 + $0x54] sm:$0xf0]  ;;  %v3853_v57 = vld [vmem:[%s3195_s30 + $0x24] sm:$0xff]   ;;  %v2624_v19 = vld [vmem:[%s3195_s30 + $0x5c] sm:$0x1] }
  0xe3   : > { %v1346_v1 = vrot.slane %v2828_v12, 1  ;;  %v2996_v7 = vld [vmem:[%s3195_s30 + $0x24] sm:$0xf0]  ;;  %v1141_v56 = vrot.slane %v1139_v43, 1  ;;  %v2620_v53 = vld [vmem:[%s3195_s30 + $0x2c] sm:$0x1]  ;;  %v1556_v52 = vunpack.c.l.b16 %v2624_v19 }
  0xe4   : > { %v1894_v40 = vrot.slane %v2995_v30, 1  ;;  %v2998_v12 = vor.u32 %v2997_v32, %v2996_v7  ;;  %v1644_v30 = vshrl.u32 %v3845_v24, 16  ;;  %v1049_v7 = vunpack.c.l.b16 %v2565_v58  ;;  %v2203_v58 = vld [vmem:[%s4439_s1 + $0x10] sm:$0x3] }
  0xe5   : > { %1529 = vrot.lane.b32.xlu2 %v3753_v15, %s3112_s10  ;;  %v1745_v15 = vor.u32 %v1744_v27, %v1740_v8  ;;  %v1348_v61 = vsel %vm830_vm1, %v1346_v1, %v1347_v37  ;;  %v1142_v26 = vsel %vm557_vm0, %v3286_v9, %v1141_v56 }
  0xe6   : > { %1521 = vrot.lane.b32.xlu1 %v3760_v16, %s3112_s10  ;;  %v1896_v46 = vsel %vm830_vm1, %v1894_v40, %v1895_v35  ;;  %v1242_v40 = vshll.u32 %v3561_v47, 16 }
  0xe7   : > { %v1010_v44 = vpop.permute.xlu2 %1009  ;;  %1417 = vrot.lane.b32.xlu0 %v1384_v21, %s3110_s8  ;;  %v1750_v31 = vsel %vm557_vm0, %v1745_v15, %v1749_v59  ;;  %v2832_v21 = vld [vmem:[%s3195_s30 + $0x48] sm:$0xf0]  ;;  %v1552_v15 = vunpack.c.l.b16 %v2620_v53 }
  0xe8   : > { %v3824_v13 = vsel %vm2001_vm4, %v1988_v49, %v1010_v44  ;;  %v910_v16 = vpop.permute.xlu1 %909  ;;  %v1701_v49 = vrot.slane %v1699_v60, 1 }
  0xe9   : > { %v2000_v10 = vsel %vm1968_vm3, %v1967_v28, %v910_v16  ;;  %v908_v42 = vpop.permute.xlu0 %907  ;;  %v2569_v28 = vld [vmem:[%s3195_s30 + $0xbc] sm:$0x1] }
  0xea   : > { %v3838_v48 = vsel %vm1968_vm3, %v1965_v17, %v908_v42  ;;  %v1702_v5 = vsel %vm557_vm0, %v1697_v39, %v1701_v49  ;;  %v3885_v39 = vpack.c.b16 %v1556_v52, %v1556_v52  ;;  %v1359_v42 = vrot.slane %v3826_v2, 1 }
  0xeb   : > { %v1596_v2 = vshrl.u32 %v3853_v57, 16 }
  0xec   : > { %v1651_v37 = vshll.u32 %v3885_v39, 16 }
  0xed   : > { %1921 = vrot.lane.b32.xlu2 %v1884_v4, %s3113_s11  ;;  %v1598_v4 = vshll.u32 %v3853_v57, 16 }
  0xee   : > { %1801 = vrot.lane.b32.xlu1 %v1750_v31, %s3111_s9  ;;  %v1053_v31 = vunpack.c.l.b16 %v2569_v28  ;;  %v1653_v32 = vrot.slane %v1651_v37, 1  ;;  %v1192_v28 = vshrl.u32 %v3547_v25, 16 }
  0xef   : > { %v3857_v8 = vpop.permute.xlu2 %1015  ;;  %1793 = vrot.lane.b32.xlu0 %v1702_v5, %s3111_s9 }
  0xf0   : > { %v996_v27 = vpop.permute.xlu1 %995 }
  0xf1   : > { %v3864_v51 = vsel %vm2001_vm4, %v3724_v41, %v996_v27  ;;  %v994_v60 = vpop.permute.xlu0 %993  ;;  %v2834_v41 = vor.u32 %v2833_v14, %v2832_v21  ;;  %v1600_v27 = vrot.slane %v1598_v4, 1  ;;  %v1194_v21 = vshll.u32 %v3547_v25, 16 }
  0xf2   : > { %v3873_v44 = vsel %vm2001_vm4, %v3628_v55, %v994_v60  ;;  %v1646_v55 = vshll.u32 %v3845_v24, 16  ;;  %v3914_v60 = vpack.c.b16 %v1049_v7, %v1049_v7 }
  0xf3   : > { %v1358_v49 = vrot.slane %v2834_v41, 1  ;;  %v1601_v52 = vor.u32 %v1600_v27, %v1596_v2  ;;  %v2629_v27 = vld [vmem:[%s3195_s30 + $0x98] sm:$0x1] }
  0xf4   : > { %v1648_v1 = vrot.slane %v1646_v55, 1  ;;  %v1196_v55 = vrot.slane %v1194_v21, 1 }
  0xf5   : > { %1393 = vrot.lane.b32.xlu2 %v1348_v61, %s3110_s8  ;;  %v1360_v35 = vsel %vm830_vm1, %v1358_v49, %v1359_v42  ;;  %v3906_v61 = vpack.c.b16 %v1053_v31, %v1053_v31  ;;  %v1199_v49 = vshll.u32 %v3914_v60, 16  ;;  %v2217_v31 = vunpack.c.l.b16 %v2203_v58 }
  0xf6   : > { %1273 = vrot.lane.b32.xlu1 %v1142_v26, %s3109_s7 }
  0xf7   : > { %v1022_v59 = vpop.permute.xlu2 %1021  ;;  %1929 = vrot.lane.b32.xlu0 %v1896_v46, %s3113_s11  ;;  %v1240_v46 = vshrl.u32 %v3561_v47, 16  ;;  %v1201_v37 = vrot.slane %v1199_v49, 1 }
  0xf8   : > { %v3882_v16 = vsel %vm2001_vm4, %v2000_v10, %v1022_v59  ;;  %v1002_v9 = vpop.permute.xlu1 %1001  ;;  %v1568_v10 = vpack.c.b16 %v1552_v15, %v1552_v15  ;;  %v1244_v15 = vrot.slane %v1242_v40, 1 }
  0xf9   : > { %v3892_v17 = vsel %vm2001_vm4, %v3747_v36, %v1002_v9  ;;  %v1000_v43 = vpop.permute.xlu0 %999  ;;  %v1858_v36 = vrot.slane %v2998_v12, 1  ;;  %v3003_v12 = vld [vmem:[%s3195_s30 + $0xb4] sm:$0xe] }
  0xfa   : > { %v3898_v5 = vsel %vm2001_vm4, %v3639_v22, %v1000_v43  ;;  %v1859_v56 = vrot.slane %v1568_v10, 1  ;;  %v1603_v19 = vshll.u32 %v1568_v10, 16  ;;  %v3000_v22 = vld [vmem:[%s3195_s30 + $0x54] sm:$0xe]  ;;  %v1245_v42 = vor.u32 %v1244_v15, %v1240_v46  ;;  %v2557_v15 = vld [vmem:[%s3195_s30 + $0x2c] sm:$0x1] }
  0xfb   : > { %v3001_v47 = vor.u32 %v3000_v22, %v3848_v18  ;;  %v2220_v18 = vpack.c.b16 %v2217_v31, %v2217_v31 }
  0xfc   : > { %v1860_v26 = vsel %vm830_vm1, %v1858_v36, %v1859_v56  ;;  %v1605_v41 = vrot.slane %v1603_v19, 1  ;;  %v1871_v56 = vrot.slane %v3885_v39, 1 }
  0xfd   : > { %1513 = vrot.lane.b32.xlu2 %v3845_v24, %s3112_s10  ;;  %v1649_v24 = vor.u32 %v1648_v1, %v1644_v30  ;;  %v1197_v30 = vor.u32 %v1196_v55, %v1192_v28  ;;  %v3006_v1 = vld [vmem:[%s3195_s30 + $0x84] sm:$0xe]  ;;  %v1870_v36 = vrot.slane %v3001_v47, 1  ;;  %v2258_v19 = vsel %vm2256_vm5, %v2220_v18, 0 }
  0xfe   : > { %1505 = vrot.lane.b32.xlu1 %v3853_v57, %s3112_s10  ;;  %v1247_v57 = vshll.u32 %v3906_v61, 16  ;;  %v1606_v25 = vsel %vm557_vm0, %v1601_v52, %v1605_v41  ;;  %2875 = vmatpush.bf16.msra.mxu2 %v2258_v19  ;;  %v2799_v52 = vld [vmem:[%s3195_s30 + $0x90] sm:$0xff]   ;;  %v3007_v46 = vor.u32 %v3006_v1, %v3550_v45  ;;  %v1386_v28 = vrot.slane %v3906_v61, 1 }
  0xff   : > { %v3912_v14 = vpop.permute.xlu2 %1279  ;;  %1401 = vrot.lane.b32.xlu0 %v1360_v35, %s3110_s8  ;;  %v1654_v4 = vsel %vm557_vm0, %v1649_v24, %v1653_v32  ;;  %2876 = vmatpush.bf16.msra.mxu3 %v2258_v19  ;;  %v1202_v39 = vsel %vm557_vm0, %v1197_v30, %v1201_v37  ;;  %v3004_v24 = vor.u32 %v3003_v12, %v3564_v54  ;;  %v1561_v32 = vunpack.c.l.b16 %v2629_v27 }
 0x100   : > { %v3917_v53 = vpop.permute.xlu1 %1007  ;;  %v1249_v10 = vrot.slane %v1247_v57, 1  ;;  %2265 = vmatpush.bf16.msra.mxu0 %v2258_v19  ;;  %2874 = vmatpush.bf16.msra.mxu1 %v2258_v19  ;;  %v1706_v57 = vshll.u32 %v2799_v52, 16  ;;  %v1252_v45 = vshrl.u32 %v3586_v6, 16  ;;  %v1373_v58 = vrot.slane %v3007_v46, 1  ;;  %v2871_v19 = vld [vmem:[%s3195_s30 + $0xc0] sm:$0xf0] }
 0x101   : > { %v1006_v59 = vpop.permute.xlu0 %1005  ;;  %v3970_v55 = vpack.c.b16 %v1561_v32, %v1561_v32  ;;  %v1098_v18 = vshll.u32 %v3498_v29, 16  ;;  %v1096_v32 = vshrl.u32 %v3498_v29, 16  ;;  %v2561_v46 = vld [vmem:[%s3195_s30 + $0x5c] sm:$0x1]  ;;  %v2621_v29 = vld [vmem:[%s3195_s30 + $0x38] sm:$0x1] }
 0x102   : > { %v3925_v9 = vsel %vm2001_vm4, %v3658_v34, %v1006_v59  ;;  %v2633_v34 = vld [vmem:[%s3195_s30 + $0xc8] sm:$0x1]  ;;  %v1250_v35 = vsel %vm557_vm0, %v1245_v42, %v1249_v10  ;;  %v1385_v59 = vrot.slane %v3004_v24, 1  ;;  %v1041_v42 = vunpack.c.l.b16 %v2557_v15  ;;  %v3009_v15 = vld [vmem:[%s3195_s30 + $0x54] sm:$0xe] }
 0x103   : > { %v1565_v2 = vunpack.c.l.b16 %v2633_v34  ;;  %v1704_v34 = vshrl.u32 %v2799_v52, 16  ;;  %v1708_v30 = vrot.slane %v1706_v57, 1  ;;  %v1711_v37 = vshll.u32 %v3970_v55, 16 }
 0x104   : > { %v1387_v1 = vsel %vm830_vm1, %v1385_v59, %v1386_v28 }
 0x105   : > { %1905 = vrot.lane.b32.xlu2 %v1860_v26, %s3113_s11  ;;  %v1254_v26 = vshll.u32 %v3586_v6, 16  ;;  %v3961_v41 = vpack.c.b16 %v1565_v2, %v1565_v2  ;;  %v1713_v2 = vrot.slane %v1711_v37, 1 }
 0x106   : > { %1785 = vrot.lane.b32.xlu1 %v1654_v4, %s3111_s9  ;;  %v2680_v4 = vld [vmem:[%s4439_s1] sm:$0xff] }
 0x107   : > { %v3938_v43 = vpop.permute.xlu2 %1415  ;;  %1777 = vrot.lane.b32.xlu0 %v1606_v25, %s3111_s9  ;;  %v1256_v49 = vrot.slane %v1254_v26, 1  ;;  %v1759_v12 = vshll.u32 %v3961_v41, 16  ;;  %v1374_v25 = vrot.slane %v3914_v60, 1 }
 0x108   : > { %v1014_v7 = vpop.permute.xlu1 %1013 }
 0x109   : > { %v3946_v40 = vsel %vm2001_vm4, %v3811_v20, %v1014_v7  ;;  %v1012_v22 = vpop.permute.xlu0 %1011  ;;  %v2681_v20 = vld [vmem:[%s4439_s1 + $0x8] sm:$0xff]  ;;  %v1761_v60 = vrot.slane %v1759_v12, 1  ;;  %v3994_v7 = vpack.c.b16 %v1041_v42, %v1041_v42 }
 0x10a   : > { %v3951_v21 = vsel %vm2001_vm4, %v3684_v23, %v1012_v22  ;;  %v1872_v23 = vsel %vm830_vm1, %v1870_v36, %v1871_v56  ;;  %2878 = vmatpush.bf16.msra.mxu2 %v2681_v20  ;;  %2879 = vmatpush.bf16.msra.mxu3 %v2681_v20  ;;  %v1709_v56 = vor.u32 %v1708_v30, %v1704_v34  ;;  %v2872_v22 = vld [vmem:[%s3195_s30 + $0xc0] sm:$0xe]  ;;  %v1553_v34 = vunpack.c.l.b16 %v2621_v29 }
 0x10b   : > { %2266 = vmatpush.bf16.msra.mxu0 %v2681_v20  ;;  %2877 = vmatpush.bf16.msra.mxu1 %v2681_v20  ;;  %v1100_v20 = vrot.slane %v1098_v18, 1  ;;  %v1103_v26 = vshll.u32 %v3994_v7, 16  ;;  %v2873_v59 = vor.u32 %v2872_v22, %v2871_v19  ;;  %v1146_v30 = vshll.u32 %v3509_v3, 16  ;;  %v4031_v18 = vld [vmem:[%s3195_s30 + $0x30] sm:$0xff]  }
 0x10c   : > { %v1714_v57 = vsel %vm557_vm0, %v1709_v56, %v1713_v2  ;;  %v4451_v56 = vld [vmem:[#allocation8_spill] sm:$0xff]  ;;  %v1144_v22 = vshrl.u32 %v3509_v3, 16 }
 0x10d   : > { %1291 = vrot.lane.b32.xlu2 %v1250_v35, %s3109_s7  ;;  %v1897_v12 = vrot.slane %v2873_v59, 1 }
 0x10e   : > { %1283 = vrot.lane.b32.xlu1 %v1202_v39, %s3109_s7  ;;  %2881 = vmatpush.bf16.msra.mxu2 %v2680_v4  ;;  %v2865_v39 = vld [vmem:[%s3195_s30 + $0x90] sm:$0xf0] }
 0x10f   : > { %v3966_v54 = vpop.permute.xlu2 %1791  ;;  %1913 = vrot.lane.b32.xlu0 %v1872_v23, %s3113_s11  ;;  %2882 = vmatpush.bf16.msra.mxu3 %v2680_v4 }
 0x110   : > { %v1020_v47 = vpop.permute.xlu1 %1019  ;;  %2267 = vmatpush.bf16.msra.mxu0 %v2680_v4  ;;  %2880 = vmatpush.bf16.msra.mxu1 %v2680_v4  ;;  %v3012_v4 = vld [vmem:[%s3195_s30 + $0x24] sm:$0xe] }
 0x111   : > { %v3980_v61 = vsel %vm2001_vm4, %v3838_v48, %v1020_v47  ;;  %v1018_v10 = vpop.permute.xlu0 %1017  ;;  %v3989_v48 = vor.u32 %v1256_v49, %v1252_v45  ;;  %v1105_v45 = vrot.slane %v1103_v26, 1  ;;  %v1045_v49 = vunpack.c.l.b16 %v2561_v46 }
 0x112   : > { %v3985_v31 = vsel %vm2001_vm4, %v3708_v0, %v1018_v10  ;;  %v1375_v0 = vsel %vm830_vm1, %v1373_v58, %v1374_v25  ;;  %v1898_v58 = vrot.slane %v3961_v41, 1  ;;  %v1886_v10 = vrot.slane %v3970_v55, 1 }
 0x113   : > { %v1762_v35 = vsel %vm557_vm0, %v3989_v48, %v1761_v60  ;;  %v1061_v37 = vpack.c.b16 %v1045_v49, %v1045_v49  ;;  %v3010_v60 = vor.u32 %v3009_v15, %v3512_v38  ;;  %v3013_v2 = vor.u32 %v3012_v4, %v4451_v56  ;;  %v2570_v56 = vld [vmem:[%s3195_s30 + $0xc8] sm:$0x1] }
 0x114   : > { %v1899_v41 = vsel %vm830_vm1, %v1897_v12, %v1898_v58  ;;  %v1148_v38 = vrot.slane %v1146_v30, 1  ;;  %v1350_v26 = vrot.slane %v3994_v7, 1  ;;  %v1608_v15 = vshrl.u32 %v4031_v18, 16  ;;  %v2797_v58 = vld [vmem:[%s3195_s30 + $0x60] sm:$0xff]  }
 0x115   : > { %1523 = vrot.lane.b32.xlu2 %v2799_v52, %s3112_s10  ;;  %v2866_v52 = vld [vmem:[%s3195_s30 + $0x90] sm:$0xe]  ;;  %v1362_v55 = vrot.slane %v1061_v37, 1  ;;  %v1361_v19 = vrot.slane %v3010_v60, 1  ;;  %v1658_v30 = vshll.u32 %v2797_v58, 16 }
 0x116   : > { %1419 = vrot.lane.b32.xlu1 %v1387_v1, %s3110_s8  ;;  %v2867_v28 = vor.u32 %v2866_v52, %v2865_v39  ;;  %v1151_v39 = vshll.u32 %v1061_v37, 16  ;;  %v2019_v52 = vsel %vm2001_vm4, %v3782_v63, %v3917_v53 }
 0x117   : > { %v3997_v36 = vpop.permute.xlu2 %1927  ;;  %1411 = vrot.lane.b32.xlu0 %v1375_v0, %s3110_s8  ;;  %v1363_v59 = vsel %vm830_vm1, %v1361_v19, %v1362_v55  ;;  %v2052_v63 = vsel %vm2034_vm6, %v2019_v52, %v3912_v14  ;;  %v1660_v52 = vrot.slane %v1658_v30, 1  ;;  %v4110_v30 = vld [vmem:[%s3195_s30 + $0x9c] sm:$0xff]  }
 0x118   : > { %v1266_v27 = vpop.permute.xlu1 %1265  ;;  %v1885_v42 = vrot.slane %v2867_v28, 1  ;;  %v1149_v28 = vor.u32 %v1148_v38, %v1144_v22  ;;  %v1153_v4 = vrot.slane %v1151_v39, 1  ;;  %v2566_v38 = vld [vmem:[%s3195_s30 + $0x98] sm:$0x1] }
 0x119   : > { %v4007_v24 = vsel %vm2034_vm6, %v3873_v44, %v1266_v27  ;;  %v4012_v23 = vpop.permute.xlu0 %1263  ;;  %v1101_v44 = vor.u32 %v1100_v20, %v1096_v32  ;;  %v4037_v27 = vpack.c.b16 %v1553_v34, %v1553_v34  ;;  %v1349_v20 = vrot.slane %v3013_v2, 1 }
 0x11a   : > { %v1154_v14 = vsel %vm557_vm0, %v1149_v28, %v1153_v4  ;;  %v2841_v28 = vld [vmem:[%s3195_s30 + $0x90] sm:$0xf0]  ;;  %v2842_v4 = vld [vmem:[%s3195_s30 + $0x90] sm:$0xe] }
 0x11b   : > { %v1106_v1 = vsel %vm557_vm0, %v1101_v44, %v1105_v45  ;;  %v2625_v44 = vld [vmem:[%s3195_s30 + $0x68] sm:$0x1]  ;;  %v1351_v53 = vsel %vm830_vm1, %v1349_v20, %v1350_v26  ;;  %v2027_v45 = vsel %vm2001_vm4, %v3803_v50, %v3857_v8  ;;  %v2859_v8 = vld [vmem:[%s3195_s30 + $0x60] sm:$0xf0]  ;;  %v1054_v20 = vunpack.c.l.b16 %v2570_v56  ;;  %v2848_v56 = vld [vmem:[%s3195_s30 + $0xc0] sm:$0xe] }
 0x11d   : > { %1803 = vrot.lane.b32.xlu2 %v1762_v35, %s3111_s9  ;;  %v1610_v35 = vshll.u32 %v4031_v18, 16 }
 0x11e   : > { %1795 = vrot.lane.b32.xlu1 %v1714_v57, %s3111_s9  ;;  %v1615_v57 = vshll.u32 %v4037_v27, 16 }
 0x11f   : > { %v4021_v47 = vpop.permute.xlu2 %1399  ;;  %1531 = vrot.lane.b32.xlu0 %v3586_v6, %s3112_s10  ;;  %v1887_v6 = vsel %vm830_vm1, %v1885_v42, %v1886_v10  ;;  %v1612_v3 = vrot.slane %v1610_v35, 1  ;;  %v1557_v10 = vunpack.c.l.b16 %v2625_v44  ;;  %v4094_v44 = vpack.c.b16 %v1054_v20, %v1054_v20 }
 0x120   : > { %v1408_v25 = vpop.permute.xlu1 %1407  ;;  %v1617_v12 = vrot.slane %v1615_v57, 1  ;;  %v1050_v57 = vunpack.c.l.b16 %v2566_v38  ;;  %v2630_v38 = vld [vmem:[%s3195_s30 + $0xa4] sm:$0x1] }
 0x121   : > { %v1288_v0 = vpop.permute.xlu0 %1287  ;;  %v2085_v49 = vsel %vm2067_vm7, %v2052_v63, %v1408_v25  ;;  %v1613_v29 = vor.u32 %v1612_v3, %v1608_v15  ;;  %v2860_v25 = vld [vmem:[%s3195_s30 + $0x60] sm:$0xe]  ;;  %v1573_v55 = vpack.c.b16 %v1557_v10, %v1557_v10 }
 0x122   : > { %v2060_v34 = vsel %vm2034_vm6, %v2027_v45, %v1288_v0  ;;  %v2854_v0 = vld [vmem:[%s3195_s30 + $0x30] sm:$0xe]  ;;  %v2861_v35 = vor.u32 %v2860_v25, %v2859_v8 }
 0x123   : > { %v1618_v60 = vsel %vm557_vm0, %v1613_v29, %v1617_v12  ;;  %v2093_v2 = vsel %vm2067_vm7, %v2060_v34, %v3938_v43  ;;  %v1656_v43 = vshrl.u32 %v2797_v58, 16  ;;  %v1874_v15 = vrot.slane %v1573_v55, 1 }
 0x124   : > { %v1663_v3 = vshll.u32 %v1573_v55, 16  ;;  %v1066_v29 = vpack.c.b16 %v1050_v57, %v1050_v57  ;;  %v2843_v12 = vor.u32 %v2842_v4, %v2841_v28 }
 0x125   : > { %1267 = vrot.lane.b32.xlu2 %v1106_v1, %s3109_s7  ;;  %v1661_v63 = vor.u32 %v1660_v52, %v1656_v43  ;;  %v4452_v52 = vld [vmem:[#allocation7_spill] sm:$0xff] }
 0x126   : > { %1931 = vrot.lane.b32.xlu1 %v1899_v41, %s3113_s11  ;;  %v2853_v41 = vld [vmem:[%s3195_s30 + $0x30] sm:$0xf0]  ;;  %v1376_v34 = vrot.slane %v2843_v12, 1  ;;  %v1377_v8 = vrot.slane %v1066_v29, 1  ;;  %v1211_v25 = vshll.u32 %v1066_v29, 16 }
 0x127   : > { %v4042_v32 = vpop.permute.xlu2 %1775  ;;  %1923 = vrot.lane.b32.xlu0 %v1887_v6, %s3113_s11  ;;  %v2855_v39 = vor.u32 %v2854_v0, %v2853_v41  ;;  %v2847_v0 = vld [vmem:[%s3195_s30 + $0xc0] sm:$0xf0] }
 0x128   : > { %v1528_v46 = vpop.permute.xlu1 %1527  ;;  %v1213_v55 = vrot.slane %v1211_v25, 1 }
 0x129   : > { %v1520_v7 = vpop.permute.xlu0 %1519  ;;  %v2126_v19 = vsel %vm2100_vm8, %v2093_v2, %v1528_v46  ;;  %v1873_v46 = vrot.slane %v2861_v35, 1  ;;  %v2634_v2 = vld [vmem:[%s3195_s30 + $0xd4] sm:$0x1]  ;;  %v3015_v35 = vld [vmem:[%s3195_s30 + $0x9c] sm:$0xe] }
 0x12a   : > { %v2118_v42 = vsel %vm2100_vm8, %v2085_v49, %v1520_v7  ;;  %v1861_v7 = vrot.slane %v2855_v39, 1  ;;  %v1665_v49 = vrot.slane %v1663_v3, 1  ;;  %v2849_v39 = vor.u32 %v2848_v56, %v2847_v0 }
 0x12b   : > { %v2151_v37 = vsel %vm2133_vm9, %v2118_v42, %v3966_v54  ;;  %v1875_v45 = vsel %vm830_vm1, %v1873_v46, %v1874_v15  ;;  %v1566_v20 = vunpack.c.l.b16 %v2634_v2  ;;  %v1214_v46 = vsel %vm557_vm0, %v4452_v52, %v1213_v55  ;;  %v3018_v2 = vld [vmem:[%s3195_s30 + $0xcc] sm:$0xe] }
 0x12c   : > { %v1666_v10 = vsel %vm557_vm0, %v1661_v63, %v1665_v49  ;;  %v1562_v15 = vunpack.c.l.b16 %v2630_v38  ;;  %v1388_v57 = vrot.slane %v2849_v39, 1 }
 0x12d   : > { %1403 = vrot.lane.b32.xlu2 %v1363_v59, %s3110_s8  ;;  %v4140_v28 = vpack.c.b16 %v1566_v20, %v1566_v20 }
 0x12e   : > { %1395 = vrot.lane.b32.xlu1 %v1351_v53, %s3110_s8  ;;  %v1578_v29 = vpack.c.b16 %v1562_v15, %v1562_v15 }
 0x12f   : > { %v4066_v50 = vpop.permute.xlu2 %1911  ;;  %1275 = vrot.lane.b32.xlu0 %v1154_v14, %s3109_s7  ;;  %v4103_v14 = vld [vmem:[%s3195_s30 + $0xcc] sm:$0xff]  }
 0x130   : > { %v1920_v1 = vpop.permute.xlu1 %1919  ;;  %v1766_v3 = vshll.u32 %v4103_v14, 16  ;;  %v1723_v0 = vshll.u32 %v1578_v29, 16 }
 0x131   : > { %v2184_v6 = vsel %vm2166_vm10, %v2151_v37, %v1920_v1  ;;  %v1800_v22 = vpop.permute.xlu0 %1799  ;;  %v3014_v1 = vld [vmem:[%s3195_s30 + $0x9c] sm:$0xf0] }
 0x132   : > { %2667 = vmatmul.msk.bf16.vlgmr.msra.gmra.mxu2 %vm2223_vm11, %v2184_v6  ;;  %v2159_v54 = vsel %vm2133_vm9, %v2126_v19, %v1800_v22  ;;  %v1378_v6 = vsel %vm830_vm1, %v1376_v34, %v1377_v8  ;;  %v2036_v19 = vsel %vm2034_vm6, %v3731_v11, %v4012_v23  ;;  %v2562_v23 = vld [vmem:[%s3195_s30 + $0x68] sm:$0x1]  ;;  %v3016_v63 = vor.u32 %v3015_v35, %v3014_v1 }
 0x133   : > { %v2192_v26 = vsel %vm2166_vm10, %v2159_v54, %v3997_v36  ;;  %v1862_v36 = vrot.slane %v4037_v27, 1  ;;  %v1259_v27 = vshll.u32 %v4094_v44, 16  ;;  %v1046_v12 = vunpack.c.l.b16 %v2562_v23  ;;  %v2836_v23 = vld [vmem:[%s3195_s30 + $0x60] sm:$0xe] }
 0x134   : > { %2671 = vmatmul.msk.bf16.vlgmr.msra.gmra.mxu3 %vm2223_vm11, %v2192_v26  ;;  %v1888_v25 = vrot.slane %v3016_v63, 1  ;;  %v1889_v1 = vrot.slane %v1578_v29, 1  ;;  %v2829_v29 = vld [vmem:[%s3195_s30 + $0x30] sm:$0xf0] }
 0x135   : > { %1779 = vrot.lane.b32.xlu2 %v1618_v60, %s3111_s9  ;;  %v1863_v42 = vsel %vm830_vm1, %v1861_v7, %v1862_v36  ;;  %v1261_v60 = vrot.slane %v1259_v27, 1  ;;  %v1718_v36 = vshll.u32 %v4110_v30, 16  ;;  %v1062_v56 = vpack.c.b16 %v1046_v12, %v1046_v12  ;;  %v2830_v12 = vld [vmem:[%s3195_s30 + $0x30] sm:$0xe] }
 0x136   : > { %1515 = vrot.lane.b32.xlu1 %v2797_v58, %s3112_s10  ;;  %v1890_v35 = vsel %vm830_vm1, %v1888_v25, %v1889_v1 }
 0x137   : > { %v4089_v59 = vpop.permute.xlu2 %1409  ;;  %1507 = vrot.lane.b32.xlu0 %v4031_v18, %s3112_s10  ;;  %v4106_v18 = vld [vmem:[%s3195_s30 + $0xcc] sm:$0xf0]  ;;  %v1262_v54 = vsel %vm557_vm0, %v3989_v48, %v1261_v60  ;;  %v1716_v60 = vshrl.u32 %v4110_v30, 16  ;;  %v1163_v38 = vshll.u32 %v1062_v56, 16 }
 0x138   : > { %v1392_v53 = vpop.permute.xlu1 %1391  ;;  %v3019_v15 = vor.u32 %v3018_v2, %v4106_v18  ;;  %v1901_v18 = vrot.slane %v4140_v28, 1 }
 0x139   : > { %v1272_v58 = vpop.permute.xlu0 %1271  ;;  %v2069_v26 = vsel %vm2067_vm7, %v2036_v19, %v1392_v53  ;;  %v2558_v53 = vld [vmem:[%s3195_s30 + $0x38] sm:$0x1] }
 0x13a   : > { %v2044_v11 = vsel %vm2034_vm6, %v3898_v5, %v1272_v58  ;;  %v1389_v5 = vrot.slane %v4094_v44, 1  ;;  %v1768_v44 = vrot.slane %v1766_v3, 1  ;;  %v1042_v34 = vunpack.c.l.b16 %v2558_v53 }
 0x13b   : > { %v1900_v53 = vrot.slane %v3019_v15, 1 }
 0x13c   : > { %v1390_v8 = vsel %vm830_vm1, %v1388_v57, %v1389_v5  ;;  %v4189_v57 = vld [vmem:[%s3195_s30 + $0x6c] sm:$0xff]  }
 0x13d   : > { %1915 = vrot.lane.b32.xlu2 %v1875_v45, %s3113_s11  ;;  %v2077_v45 = vsel %vm2067_vm7, %v2044_v11, %v4021_v47  ;;  %v2835_v11 = vld [vmem:[%s3195_s30 + $0x60] sm:$0xf0]  ;;  %v4453_v5 = vld [vmem:[#allocation6_spill] sm:$0xff] }
 0x13e   : > { %1907 = vrot.lane.b32.xlu1 %v1863_v42, %s3113_s11 }
 0x13f   : > { %v4114_v37 = vpop.permute.xlu2 %1529  ;;  %1787 = vrot.lane.b32.xlu0 %v1666_v10, %s3111_s9  ;;  %v1771_v10 = vshll.u32 %v4140_v28, 16 }
 0x140   : > { %v1512_v41 = vpop.permute.xlu1 %1511 }
 0x141   : > { %v1504_v22 = vpop.permute.xlu0 %1503  ;;  %v2110_v58 = vsel %vm2100_vm8, %v2077_v45, %v1512_v41  ;;  %v1720_v41 = vrot.slane %v1718_v36, 1  ;;  %v2622_v36 = vld [vmem:[%s3195_s30 + $0x44] sm:$0x1]  ;;  %v2837_v45 = vor.u32 %v2836_v23, %v2835_v11 }
 0x142   : > { %v2102_v43 = vsel %vm2100_vm8, %v2069_v26, %v1504_v22  ;;  %v4178_v26 = vld [vmem:[%s3195_s30 + $0x3c] sm:$0xff]  }
 0x143   : > { %v2135_v7 = vsel %vm2133_vm9, %v2102_v43, %v4042_v32  ;;  %v1764_v32 = vshrl.u32 %v4103_v14, 16  ;;  %v1721_v22 = vor.u32 %v1720_v41, %v1716_v60  ;;  %v4181_v43 = vld [vmem:[%s3195_s30 + $0x3c] sm:$0xf0]  ;;  %v1622_v60 = vshll.u32 %v4178_v26, 16 }
 0x145   : > { %1413 = vrot.lane.b32.xlu2 %v1378_v6, %s3110_s8  ;;  %v1773_v6 = vrot.slane %v1771_v10, 1  ;;  %v1902_v10 = vsel %vm830_vm1, %v1900_v53, %v1901_v18 }
 0x146   : > { %1293 = vrot.lane.b32.xlu1 %v1262_v54, %s3109_s7 }
 0x147   : > { %v4137_v48 = vpop.permute.xlu2 %1921  ;;  %1285 = vrot.lane.b32.xlu0 %v1214_v46, %s3109_s7  ;;  %v1165_v46 = vrot.slane %v1163_v38, 1  ;;  %v1620_v38 = vshrl.u32 %v4178_v26, 16 }
 0x148   : > { %v1904_v4 = vpop.permute.xlu1 %1903 }
 0x149   : > { %v2168_v49 = vsel %vm2166_vm10, %v2135_v7, %v1904_v4  ;;  %v1784_v42 = vpop.permute.xlu0 %1783  ;;  %v4192_v4 = vld [vmem:[%s3195_s30 + $0x6c] sm:$0xf0]  ;;  %v1166_v63 = vsel %vm557_vm0, %v4453_v5, %v1165_v46 }
 0x14a   : > { %2659 = vmatmul.msk.bf16.vlgmr.msra.gmra.mxu0 %vm2223_vm11, %v2168_v49  ;;  %v2143_v27 = vsel %vm2133_vm9, %v2110_v58, %v1784_v42  ;;  %v4454_v42 = vld [vmem:[#allocation5_spill] sm:$0xff] }
 0x14b   : > { %v2176_v47 = vsel %vm2166_vm10, %v2143_v27, %v4066_v50  ;;  %v1769_v50 = vor.u32 %v1768_v44, %v1764_v32  ;;  %v1554_v27 = vunpack.c.l.b16 %v2622_v36  ;;  %v2626_v44 = vld [vmem:[%s3195_s30 + $0x74] sm:$0x1] }
 0x14c   : > { %2663 = vmatmul.msk.bf16.vlgmr.msra.gmra.mxu1 %vm2223_vm11, %v2176_v47  ;;  %v2831_v47 = vor.u32 %v2830_v12, %v2829_v29  ;;  %v1558_v25 = vunpack.c.l.b16 %v2626_v44 }
 0x14d   : > { %1533 = vrot.lane.b32.xlu2 %v4103_v14, %s3112_s10  ;;  %v4166_v14 = vpack.c.b16 %v1042_v34, %v1042_v34  ;;  %v1774_v39 = vsel %vm557_vm0, %v1769_v50, %v1773_v6  ;;  %v1364_v34 = vrot.slane %v2837_v45, 1  ;;  %v1570_v1 = vpack.c.b16 %v1554_v27, %v1554_v27 }
 0x14e   : > { %1525 = vrot.lane.b32.xlu1 %v4110_v30, %s3112_s10  ;;  %v1725_v30 = vrot.slane %v1723_v0, 1  ;;  %v1670_v0 = vshll.u32 %v4189_v57, 16  ;;  %v1352_v50 = vrot.slane %v2831_v47, 1 }
 0x14f   : > { %1421 = vrot.lane.b32.xlu0 %v1390_v8, %s3110_s8  ;;  %v4172_v19 = vpop.permute.xlu2 %1393  ;;  %v1115_v20 = vshll.u32 %v4166_v14, 16  ;;  %v1365_v8 = vrot.slane %v1062_v56, 1  ;;  %v1353_v6 = vrot.slane %v4166_v14, 1  ;;  %v1668_v14 = vshrl.u32 %v4189_v57, 16 }
 0x150   : > { %v4169_v55 = vpop.permute.xlu1 %1289  ;;  %v1726_v52 = vsel %vm557_vm0, %v1721_v22, %v1725_v30  ;;  %v1574_v22 = vpack.c.b16 %v1558_v25, %v1558_v25 }
 0x151   : > { %v1282_v54 = vpop.permute.xlu0 %1281  ;;  %v1117_v3 = vrot.slane %v1115_v20, 1  ;;  %v1366_v56 = vsel %vm830_vm1, %v1364_v34, %v1365_v8  ;;  %v2062_v15 = vsel %vm2034_vm6, %v3985_v31, %v4169_v55  ;;  %v1354_v23 = vsel %vm830_vm1, %v1352_v50, %v1353_v6 }
 0x152   : > { %v2054_v28 = vsel %vm2034_vm6, %v3824_v13, %v1282_v54  ;;  %v1624_v54 = vrot.slane %v1622_v60, 1  ;;  %v1675_v46 = vshll.u32 %v1574_v22, 16 }
 0x153   : > { %v1118_v32 = vsel %vm557_vm0, %v4454_v42, %v1117_v3  ;;  %v2087_v2 = vsel %vm2067_vm7, %v2054_v28, %v4089_v59  ;;  %v3021_v59 = vld [vmem:[%s3195_s30 + $0x6c] sm:$0xe]  ;;  %v2071_v28 = vsel %vm2067_vm7, %v4007_v24, %v4172_v19 }
 0x154   : > { %v1625_v36 = vor.u32 %v1624_v54, %v1620_v38  ;;  %v3022_v29 = vor.u32 %v3021_v59, %v4192_v4 }
 0x155   : > { %1925 = vrot.lane.b32.xlu2 %v1890_v35, %s3113_s11 }
 0x156   : > { %1805 = vrot.lane.b32.xlu1 %v1774_v39, %s3111_s9  ;;  %v1627_v39 = vshll.u32 %v1570_v1, 16  ;;  %v1876_v42 = vrot.slane %v3022_v29, 1 }
 0x157   : > { %1797 = vrot.lane.b32.xlu0 %v1726_v52, %s3111_s9  ;;  %v4201_v58 = vpop.permute.xlu2 %1513  ;;  %v1672_v52 = vrot.slane %v1670_v0, 1 }
 0x158   : > { %v1522_v7 = vpop.permute.xlu1 %1521  ;;  %v1629_v5 = vrot.slane %v1627_v39, 1 }
 0x159   : > { %v1418_v49 = vpop.permute.xlu0 %1417  ;;  %v2120_v13 = vsel %vm2100_vm8, %v2087_v2, %v1522_v7  ;;  %v1673_v7 = vor.u32 %v1672_v52, %v1668_v14 }
 0x15a   : > { %v2095_v3 = vsel %vm2067_vm7, %v2062_v15, %v1418_v49  ;;  %v1630_v49 = vsel %vm557_vm0, %v1625_v36, %v1629_v5 }
 0x15b   : > { %v2128_v31 = vsel %vm2100_vm8, %v2095_v3, %v4114_v37 }
 0x15d   : > { %1277 = vrot.lane.b32.xlu2 %v1166_v63, %s3109_s7 }
 0x15e   : > { %1269 = vrot.lane.b32.xlu1 %v1118_v32, %s3109_s7  ;;  %v1877_v32 = vrot.slane %v1574_v22, 1  ;;  %s2682_s7 = sshll.u32 %s3096_s15, 8  ;;  %s2382_s15 = scalar_lea.sflag [#allocation3], %s208_s28 }
 0x15f   : > { %1933 = vrot.lane.b32.xlu0 %v1902_v10, %s3113_s11  ;;  %v1906_v11 = vpop.permute.xlu2 %1905  ;;  %v1865_v10 = vrot.slane %v1570_v1, 1 }
 0x160   : > { %v1802_v41 = vpop.permute.xlu1 %1801  ;;  %v1878_v4 = vsel %vm830_vm1, %v1876_v42, %v1877_v32 }
 0x161   : > { %v1794_v35 = vpop.permute.xlu0 %1793  ;;  %v2161_v53 = vsel %vm2133_vm9, %v2128_v31, %v1802_v41 }
 0x162   : > { %v2153_v30 = vsel %vm2133_vm9, %v2120_v13, %v1794_v35 }
 0x163   : > { %v2186_v20 = vsel %vm2166_vm10, %v2153_v30, %v4137_v48  ;;  %v3024_v48 = vld [vmem:[%s3195_s30 + $0x3c] sm:$0xe] }
 0x164   : > { %2668 = vmatmul.msk.bf16.gmra.mxu2 %vm2223_vm11, %v2186_v20  ;;  %v3025_v12 = vor.u32 %v3024_v48, %v4181_v43 }
 0x165   : > { %1509 = vrot.lane.b32.xlu2 %v4178_v26, %s3112_s10  ;;  %v1677_v26 = vrot.slane %v1675_v46, 1 }
 0x166   : > { %1405 = vrot.lane.b32.xlu1 %v1366_v56, %s3110_s8  ;;  %v1864_v44 = vrot.slane %v3025_v12, 1 }
 0x167   : > { %1397 = vrot.lane.b32.xlu0 %v1354_v23, %s3110_s8  ;;  %v1678_v55 = vsel %vm557_vm0, %v1673_v7, %v1677_v26  ;;  %v1292_v37 = vpop.permute.xlu2 %1291 }
 0x168   : > { %v1274_v63 = vpop.permute.xlu1 %1273  ;;  %v1866_v47 = vsel %vm830_vm1, %v1864_v44, %v1865_v10  ;;  %v2064_v38 = vsel %vm2034_vm6, %v3980_v61, %v1292_v37 }
 0x169   : > { %v1930_v18 = vpop.permute.xlu0 %1929  ;;  %v2046_v41 = vsel %vm2034_vm6, %v3892_v17, %v1274_v63 }
 0x16a   : > { %v2194_v45 = vsel %vm2166_vm10, %v2161_v53, %v1930_v18 }
 0x16b   : > { %2672 = vmatmul.msk.bf16.gmra.mxu3 %vm2223_vm11, %v2194_v45 }
 0x16d   : > { %1789 = vrot.lane.b32.xlu2 %v1678_v55, %s3111_s9 }
 0x16e   : > { %1781 = vrot.lane.b32.xlu1 %v1630_v49, %s3111_s9 }
 0x16f   : > { %1517 = vrot.lane.b32.xlu0 %v4189_v57, %s3112_s10  ;;  %v1524_v8 = vpop.permute.xlu2 %1523  ;;  %s2396_s10 = scalar_lea.hbm %s4441_s3, %s2682_s7 }
 0x170   : > { %v1506_v27 = vpop.permute.xlu1 %1505  ;;  %s2399_s18 = sshll.u32 %s2396_s10, 4  ;;  %s2400_s18 = int_to_ptr.hbm [resolvable:$true] %s2399_s18 }
 0x171   : > { %v1402_v34 = vpop.permute.xlu0 %1401  ;;  %v2104_v57 = vsel %vm2100_vm8, %v2071_v28, %v1506_v27  ;;  %s3040_s19 = sshra.s32 %s2400_s18, 4  ;;  %s3041_s19 = int_to_ptr.hbm [resolvable:$true] %s3040_s19 }
 0x172   : > { %v2079_v0 = vsel %vm2067_vm7, %v2046_v41, %v1402_v34  ;;  %s3042_s21 = scalar_lea.hbm %s3041_s19, 256  ;;  %p3047_p1 = scmp.lt.s32.totalorder %s3041_s19, %s4441_s3 }
 0x173   : > { %v2112_v50 = vsel %vm2100_vm8, %v2079_v0, %v4201_v58  ;;  %p3043_p12 = scmp.ne.s32.totalorder %s3041_s19, %s3042_s21  ;;  %p3048_p2 = scmp.lt.s32.totalorder %s3046_s27, %s3042_s21 }
 0x175   : > { %p3044_p13 = pnand %p3043_p12, %p3175_p4  ;;  %p3049_p3 = por %p3048_p2, %p3047_p1 }
 0x176   : > { %1917 = vrot.lane.b32.xlu1 %v1878_v4, %s3113_s11 }
 0x177   : > { %1909 = vrot.lane.b32.xlu0 %v1866_v47, %s3113_s11  ;;  %v1804_v6 = vpop.permute.xlu2 %1803  ;;  %s2397_s11 = sshll.u32 %s4305_s6, 4  ;;  %p3045_p0 = pneg %p3044_p13  ;;  %s2398_s11 = int_to_ptr.vmem [resolvable:$true] %s2397_s11 }
 0x178   : > { %v1786_v43 = vpop.permute.xlu1 %1785 }
 0x179   : > { %v1778_v25 = vpop.permute.xlu0 %1777  ;;  %v2145_v24 = vsel %vm2133_vm9, %v2112_v50, %v1786_v43  ;;  %p3050_p5 = pnand %p3049_p3, %p3045_p0 }
 0x17a   : > { %v2137_v1 = vsel %vm2133_vm9, %v2104_v57, %v1778_v25 }
 0x17b   : > { %v2170_v60 = vsel %vm2166_vm10, %v2137_v1, %v1906_v11 }
 0x17c   : > { %2660 = vmatmul.msk.bf16.gmra.mxu0 %vm2223_vm11, %v2170_v60 }
 0x17f   : > { %v1268_v22 = vpop.permute.xlu2 %1267 }
 0x180   : > { %v1284_v2 = vpop.permute.xlu1 %1283  ;;  %v2040_v36 = vsel %vm2034_vm6, %v3864_v51, %v1268_v22  ;;  %v4299_v51 = vld [vmem:[%s4440_s2] ss:$0 sm:$0xff] }
 0x181   : > { %v1914_v19 = vpop.permute.xlu0 %1913  ;;  %v2056_v58 = vsel %vm2034_vm6, %v3951_v21, %v1284_v2 }
 0x182   : > { %v2178_v13 = vsel %vm2166_vm10, %v2145_v24, %v1914_v19 }
 0x183   : > { %2664 = vmatmul.msk.bf16.gmra.mxu1 %vm2223_vm11, %v2178_v13 }
 0x187   : > { %v1404_v59 = vpop.permute.xlu2 %1403 }
 0x188   : > { %v1420_v35 = vpop.permute.xlu1 %1419 }
 0x189   : > { %v1412_v56 = vpop.permute.xlu0 %1411  ;;  %v2097_v54 = vsel %vm2067_vm7, %v2064_v38, %v1420_v35 }
 0x18a   : > { %v2089_v20 = vsel %vm2067_vm7, %v2056_v58, %v1412_v56 }
 0x18b   : > { %v2122_v46 = vsel %vm2100_vm8, %v2089_v20, %v1524_v8 }
 0x18f   : > { %v1780_v3 = vpop.permute.xlu2 %1779 }
 0x190   : > { %v1796_v17 = vpop.permute.xlu1 %1795 }
 0x191   : > { %v1532_v30 = vpop.permute.xlu0 %1531  ;;  %v2155_v61 = vsel %vm2133_vm9, %v2122_v46, %v1796_v17 }
 0x192   : > { %v2130_v39 = vsel %vm2100_vm8, %v2097_v54, %v1532_v30 }
 0x193   : > { %v2163_v52 = vsel %vm2133_vm9, %v2130_v39, %v1804_v6 }
 0x197   : > { %v1916_v5 = vpop.permute.xlu2 %1915 }
 0x198   : > { %v1932_v14 = vpop.permute.xlu1 %1931 }
 0x199   : > { %v2196_v15 = vsel %vm2166_vm10, %v2163_v52, %v1932_v14  ;;  %v1924_v11 = vpop.permute.xlu0 %1923 }
 0x19a   : > { %2673 = vmatmul.msk.bf16.gmra.mxu3 %vm2223_vm11, %v2196_v15  ;;  %v2188_v21 = vsel %vm2166_vm10, %v2155_v61, %v1924_v11 }
 0x19b   : > { %2669 = vmatmul.msk.bf16.gmra.mxu2 %vm2223_vm11, %v2188_v21 }
 0x19f   : > { %v1414_v42 = vpop.permute.xlu2 %1413 }
 0x1a0   : > { %v1396_v23 = vpop.permute.xlu1 %1395 }
 0x1a1   : > { %v1276_v48 = vpop.permute.xlu0 %1275  ;;  %v2073_v63 = vsel %vm2067_vm7, %v2040_v36, %v1396_v23 }
 0x1a2   : > { %v2048_v55 = vsel %vm2034_vm6, %v3791_v33, %v1276_v48 }
 0x1a3   : > { %v2081_v45 = vsel %vm2067_vm7, %v2048_v55, %v1404_v59 }
 0x1a7   : > { %v1534_v28 = vpop.permute.xlu2 %1533 }
 0x1a8   : > { %v1516_v7 = vpop.permute.xlu1 %1515 }
 0x1a9   : > { %v1508_v26 = vpop.permute.xlu0 %1507  ;;  %v2114_v29 = vsel %vm2100_vm8, %v2081_v45, %v1516_v7 }
 0x1aa   : > { %v2106_v31 = vsel %vm2100_vm8, %v2073_v63, %v1508_v26 }
 0x1ab   : > { %v2139_v18 = vsel %vm2133_vm9, %v2106_v31, %v1780_v3 }
 0x1af   : > { %v1926_v50 = vpop.permute.xlu2 %1925 }
 0x1b0   : > { %v1908_v53 = vpop.permute.xlu1 %1907 }
 0x1b1   : > { %v2172_v49 = vsel %vm2166_vm10, %v2139_v18, %v1908_v53  ;;  %v1788_v12 = vpop.permute.xlu0 %1787 }
 0x1b2   : > { %2661 = vmatmul.msk.bf16.gmra.mxu0 %vm2223_vm11, %v2172_v49  ;;  %v2147_v33 = vsel %vm2133_vm9, %v2114_v29, %v1788_v12 }
 0x1b3   : > { %v2180_v37 = vsel %vm2166_vm10, %v2147_v33, %v1916_v5 }
 0x1b4   : > { %2665 = vmatmul.msk.bf16.gmra.mxu1 %vm2223_vm11, %v2180_v37 }
 0x1b5   : > { %v2309_v32 = vpop.f32.mrf.mxu2 }
 0x1b6   : > { %v2310_v27 = vadd.f32 %v4299_v51, %v2309_v32 }
 0x1b7   : > { %v2329_v44 = vpop.f32.mrf.mxu3  ;;  %v1278_v14 = vpop.permute.xlu2 %1277 }
 0x1b8   : > { %2365 = vst [vmem:[%s4305_s6 + $0x80] sm:$0xff] %v2310_v27  ;;  %v1294_v10 = vpop.permute.xlu1 %1293  ;;  %v2330_v34 = vadd.f32 %v4299_v51, %v2329_v44  ;;  %v2050_v23 = vsel %vm2034_vm6, %v3925_v9, %v1278_v14 }
 0x1b9   : > { %v1286_v4 = vpop.permute.xlu0 %1285 }
 0x1ba   : > { %2373 = vst [vmem:[%s4305_s6 + $0xc0] sm:$0xff] %v2330_v34  ;;  %v2058_v60 = vsel %vm2034_vm6, %v3946_v40, %v1286_v4  ;;  %v2066_v40 = vsel %vm2034_vm6, %v3882_v16, %v1294_v10 }
 0x1bb   : > { %v2091_v24 = vsel %vm2067_vm7, %v2058_v60, %v1414_v42 }
 0x1bd   : > { %v2311_v47 = vpop.f32.mrf.mxu2 }
 0x1be   : > { %v2312_v43 = vadd.f32 %v4299_v51, %v2311_v47 }
 0x1bf   : > { %v2331_v8 = vpop.f32.mrf.mxu3  ;;  %v1510_v61 = vpop.permute.xlu2 %1509 }
 0x1c0   : > { %2366 = vst [vmem:[%s4305_s6 + $0x88] sm:$0xff] %v2312_v43  ;;  %v1526_v57 = vpop.permute.xlu1 %1525  ;;  %v2332_v25 = vadd.f32 %v4299_v51, %v2331_v8 }
 0x1c1   : > { %v1422_v1 = vpop.permute.xlu0 %1421  ;;  %v2124_v19 = vsel %vm2100_vm8, %v2091_v24, %v1526_v57 }
 0x1c2   : > { %2374 = vst [vmem:[%s4305_s6 + $0xc8] sm:$0xff] %v2332_v25  ;;  %v2099_v17 = vsel %vm2067_vm7, %v2066_v40, %v1422_v1 }
 0x1c3   : > { %v2132_v58 = vsel %vm2100_vm8, %v2099_v17, %v1534_v28 }
 0x1c7   : > { %v2269_v41 = vpop.f32.mrf.mxu0  ;;  %v1790_v26 = vpop.permute.xlu2 %1789 }
 0x1c8   : > { %v2270_v0 = vadd.f32 %v4299_v51, %v2269_v41  ;;  %v1806_v2 = vpop.permute.xlu1 %1805 }
 0x1c9   : > { %v2289_v6 = vpop.f32.mrf.mxu1  ;;  %v1798_v13 = vpop.permute.xlu0 %1797  ;;  %v2165_v39 = vsel %vm2133_vm9, %v2132_v58, %v1806_v2 }
 0x1ca   : > { %2349 = vst [vmem:[%s4305_s6] sm:$0xff] %v2270_v0  ;;  %v2290_v35 = vadd.f32 %v4299_v51, %v2289_v6  ;;  %v2157_v56 = vsel %vm2133_vm9, %v2124_v19, %v1798_v13 }
 0x1cb   : > { %v2190_v22 = vsel %vm2166_vm10, %v2157_v56, %v1926_v50 }
 0x1cc   : > { %2357 = vst [vmem:[%s4305_s6 + $0x40] sm:$0xff] %v2290_v35  ;;  %2670 = vmatmul.msk.bf16.gmra.mxu2 %vm2223_vm11, %v2190_v22 }
 0x1cf   : > { %v2271_v30 = vpop.f32.mrf.mxu0 }
 0x1d0   : > { %v2272_v38 = vadd.f32 %v4299_v51, %v2271_v30  ;;  %v1270_v54 = vpop.permute.xlu1 %1269 }
 0x1d1   : > { %v2291_v20 = vpop.f32.mrf.mxu1  ;;  %v1934_v59 = vpop.permute.xlu0 %1933  ;;  %v2042_v48 = vsel %vm2034_vm6, %v3765_v62, %v1270_v54 }
 0x1d2   : > { %2350 = vst [vmem:[%s4305_s6 + $0x8] sm:$0xff] %v2272_v38  ;;  %v2292_v16 = vadd.f32 %v4299_v51, %v2291_v20  ;;  %v2198_v52 = vsel %vm2166_vm10, %v2165_v39, %v1934_v59 }
 0x1d3   : > { %2674 = vmatmul.msk.bf16.gmra.mxu3 %vm2223_vm11, %v2198_v52 }
 0x1d4   : > { %2358 = vst [vmem:[%s4305_s6 + $0x48] sm:$0xff] %v2292_v16 }
 0x1d8   : > { %v1406_v46 = vpop.permute.xlu1 %1405 }
 0x1d9   : > { %v1398_v15 = vpop.permute.xlu0 %1397  ;;  %v2083_v3 = vsel %vm2067_vm7, %v2050_v23, %v1406_v46 }
 0x1da   : > { %v2075_v36 = vsel %vm2067_vm7, %v2042_v48, %v1398_v15 }
 0x1db   : > { %v2108_v55 = vsel %vm2100_vm8, %v2075_v36, %v1510_v61 }
 0x1e0   : > { %v1782_v11 = vpop.permute.xlu1 %1781 }
 0x1e1   : > { %v1518_v21 = vpop.permute.xlu0 %1517  ;;  %v2141_v62 = vsel %vm2133_vm9, %v2108_v55, %v1782_v11 }
 0x1e2   : > { %v2116_v7 = vsel %vm2100_vm8, %v2083_v3, %v1518_v21 }
 0x1e3   : > { %v2149_v5 = vsel %vm2133_vm9, %v2116_v7, %v1790_v26 }
 0x1e7   : > { %v2314_v63 = vpop.f32.mrf.mxu2 }
 0x1e8   : > { %v1918_v31 = vpop.permute.xlu1 %1917  ;;  %v2315_v9 = vadd.f32 %v4299_v51, %v2314_v63 }
 0x1e9   : > { %v2182_v53 = vsel %vm2166_vm10, %v2149_v5, %v1918_v31  ;;  %v1910_v18 = vpop.permute.xlu0 %1909 }
 0x1ea   : > { %2666 = vmatmul.msk.bf16.gmra.mxu1 %vm2223_vm11, %v2182_v53  ;;  %2367 = vst [vmem:[%s4305_s6 + $0x90] sm:$0xff] %v2315_v9  ;;  %v2174_v45 = vsel %vm2166_vm10, %v2141_v62, %v1910_v18 }
 0x1eb   : > { %2662 = vmatmul.msk.bf16.gmra.mxu0 %vm2223_vm11, %v2174_v45 }
 0x1ee   : > { %v2334_v49 = vpop.f32.mrf.mxu3 }
 0x1ef   : > { %v2335_v29 = vadd.f32 %v4299_v51, %v2334_v49  ;;  %v2316_v12 = vpop.f32.mrf.mxu2 }
 0x1f0   : > { %v2317_v33 = vadd.f32 %v4299_v51, %v2316_v12 }
 0x1f1   : > { %2375 = vst [vmem:[%s4305_s6 + $0xd0] sm:$0xff] %v2335_v29 }
 0x1f2   : > { %2368 = vst [vmem:[%s4305_s6 + $0x98] sm:$0xff] %v2317_v33 }
 0x1f6   : > { %v2336_v37 = vpop.f32.mrf.mxu3 }
 0x1f7   : > { %v2337_v42 = vadd.f32 %v4299_v51, %v2336_v37 }
 0x1f9   : > { %2376 = vst [vmem:[%s4305_s6 + $0xd8] sm:$0xff] %v2337_v42  ;;  %v2274_v32 = vpop.f32.mrf.mxu0 }
 0x1fa   : > { %v2275_v27 = vadd.f32 %v4299_v51, %v2274_v32 }
 0x1fc   : > { %2351 = vst [vmem:[%s4305_s6 + $0x10] sm:$0xff] %v2275_v27 }
 0x200   : > { %v2294_v44 = vpop.f32.mrf.mxu1 }
 0x201   : > { %v2295_v10 = vadd.f32 %v4299_v51, %v2294_v44  ;;  %v2276_v34 = vpop.f32.mrf.mxu0 }
 0x202   : > { %v2277_v4 = vadd.f32 %v4299_v51, %v2276_v34 }
 0x203   : > { %2359 = vst [vmem:[%s4305_s6 + $0x50] sm:$0xff] %v2295_v10 }
 0x204   : > { %2352 = vst [vmem:[%s4305_s6 + $0x18] sm:$0xff] %v2277_v4 }
 0x208   : > { %v2296_v47 = vpop.f32.mrf.mxu1 }
 0x209   : > { %v2297_v43 = vadd.f32 %v4299_v51, %v2296_v47 }
 0x20b   : > { %2360 = vst [vmem:[%s4305_s6 + $0x58] sm:$0xff] %v2297_v43 }
 0x21d   : > { %v2339_v28 = vpop.f32.mrf.mxu3 }
 0x21e   : > { %v2340_v8 = vadd.f32 %v4299_v51, %v2339_v28  ;;  %v2319_v57 = vpop.f32.mrf.mxu2 }
 0x21f   : > { %v2320_v25 = vadd.f32 %v4299_v51, %v2319_v57 }
 0x220   : > { %2377 = vst [vmem:[%s4305_s6 + $0xe0] sm:$0xff] %v2340_v8 }
 0x221   : > { %2369 = vst [vmem:[%s4305_s6 + $0xa0] sm:$0xff] %v2320_v25 }
 0x225   : > { %v2341_v1 = vpop.f32.mrf.mxu3 }
 0x226   : > { %v2342_v60 = vadd.f32 %v4299_v51, %v2341_v1  ;;  %v2321_v41 = vpop.f32.mrf.mxu2 }
 0x227   : > { %v2322_v0 = vadd.f32 %v4299_v51, %v2321_v41 }
 0x228   : > { %2378 = vst [vmem:[%s4305_s6 + $0xe8] sm:$0xff] %v2342_v60 }
 0x229   : > { %2370 = vst [vmem:[%s4305_s6 + $0xa8] sm:$0xff] %v2322_v0 }
 0x22f   : > { %v2279_v2 = vpop.f32.mrf.mxu0 }
 0x230   : > { %v2280_v50 = vadd.f32 %v4299_v51, %v2279_v2 }
 0x231   : > { %v2299_v24 = vpop.f32.mrf.mxu1 }
 0x232   : > { %2353 = vst [vmem:[%s4305_s6 + $0x20] sm:$0xff] %v2280_v50  ;;  %v2300_v19 = vadd.f32 %v4299_v51, %v2299_v24 }
 0x234   : > { %2361 = vst [vmem:[%s4305_s6 + $0x60] sm:$0xff] %v2300_v19 }
 0x237   : > { %v2281_v6 = vpop.f32.mrf.mxu0 }
 0x238   : > { %v2282_v13 = vadd.f32 %v4299_v51, %v2281_v6 }
 0x239   : > { %v2301_v35 = vpop.f32.mrf.mxu1 }
 0x23a   : > { %2354 = vst [vmem:[%s4305_s6 + $0x28] sm:$0xff] %v2282_v13  ;;  %v2302_v56 = vadd.f32 %v4299_v51, %v2301_v35 }
 0x23c   : > { %2362 = vst [vmem:[%s4305_s6 + $0x68] sm:$0xff] %v2302_v56 }
 0x24f   : > { %v2324_v22 = vpop.f32.mrf.mxu2 }
 0x250   : > { %v2325_v40 = vadd.f32 %v4299_v51, %v2324_v22 }
 0x252   : > { %2371 = vst [vmem:[%s4305_s6 + $0xb0] sm:$0xff] %v2325_v40 }
 0x256   : > { %v2344_v17 = vpop.f32.mrf.mxu3 }
 0x257   : > { %v2345_v30 = vadd.f32 %v4299_v51, %v2344_v17  ;;  %v2326_v38 = vpop.f32.mrf.mxu2 }
 0x258   : > { %v2327_v54 = vadd.f32 %v4299_v51, %v2326_v38 }
 0x259   : > { %2379 = vst [vmem:[%s4305_s6 + $0xf0] sm:$0xff] %v2345_v30 }
 0x25a   : > { %2372 = vst [vmem:[%s4305_s6 + $0xb8] sm:$0xff] %v2327_v54 }
 0x25e   : > { %v2346_v58 = vpop.f32.mrf.mxu3 }
 0x25f   : > { %v2347_v39 = vadd.f32 %v4299_v51, %v2346_v58 }
 0x261   : > { %2380 = vst [vmem:[%s4305_s6 + $0xf8] sm:$0xff] %v2347_v39 }
 0x267   : > { %v2304_v20 = vpop.f32.mrf.mxu1 }
 0x268   : > { %v2305_v59 = vadd.f32 %v4299_v51, %v2304_v20  ;;  %v2284_v14 = vpop.f32.mrf.mxu0 }
 0x269   : > { %v2285_v16 = vadd.f32 %v4299_v51, %v2284_v14 }
 0x26a   : > { %2363 = vst [vmem:[%s4305_s6 + $0x70] sm:$0xff] %v2305_v59 }
 0x26b   : > { %2355 = vst [vmem:[%s4305_s6 + $0x30] sm:$0xff] %v2285_v16 }
 0x26f   : > { %v2306_v52 = vpop.f32.mrf.mxu1 }
 0x270   : > { %v2307_v46 = vadd.f32 %v4299_v51, %v2306_v52  ;;  %v2286_v15 = vpop.f32.mrf.mxu0 }
 0x271   : > { %v2287_v61 = vadd.f32 %v4299_v51, %v2286_v15 }
 0x272   : > { %2364 = vst [vmem:[%s4305_s6 + $0x78] sm:$0xff] %v2307_v46 }
 0x273   : > { %2356 = vst [vmem:[%s4305_s6 + $0x38] sm:$0xff] %v2287_v61 }
 0x274   : > { %3053 = shalt.err (!%p3050_p5)
}
 0x275   : > { %s3114_s28 = smov 128  }
 0x276   : > { %2884 = dma.vmem_to_hbm [thread:$0]  (%p3175_p4), %s2398_s11, 4096, %s2400_s18, %s2382_s15, %s3114_s28, %s3114_s28, %s3107_s5  }
 0x277 PF: > { %p2890_p6 = scmp.ge.s32.totalorder %s3104_s17, 2  ;;  %s2414_s4 = sand.u32 1, %s3084_s12  }
 0x278   : > { %s2415_s6 = scalar_lea.sflag [#allocation3], %s2414_s4 }
 0x279   : > { %p2887_p7 = pnand %p2890_p6, %p3182_p8 }
 0x27b   : > { %p2888_p9 = pneg %p2887_p7 }
 0x27d   : > { %3079 = dma.done.wait (%p2888_p9), %s2415_s6, 4096  }
 0x27e   : > { %3081 = vsyncadd (%p2888_p9), %s2415_s6, 4294963200  ;;  %s16_s17 = sadd.s32 1, %s3104_s17   ;;  %s4455_s12 = smov %s3088_s13 }
 0x27f   : > { %p13_p10 = scmp.ge.s32.totalorder %s16_s17, 4   ;;  %s4456_s13 = smov %s3092_s14 }
 0x280   : > { %s4457_s14 = smov %s3188_s25  ;;  %s4458_s15 = smov %s3100_s16 }
 0x281   : > { %s4459_s16 = smov %s4461_s20  ;;  %15 = sbr.rel (!%p13_p10) target bundleno = 4 (0x4), region = 76 }
 0x286   :  { %2421 = vsyncpa [#allocation3], 1 }
 0x287   :  { %2423 = vsyncpa [#allocation3 + $0x1], 1 }

</bundles_post_ra>
